<compile_context>
chip_gen: v5e
topology: v5e:2x2
jax: 0.10.0
libtpu: 0.0.40
codegen_flags: <defaults>
</compile_context>

<pallas_src>
import jax
import jax.numpy as jnp
from jax import lax
from jax.experimental import pallas as pl
from jax.experimental.pallas import tpu as pltpu

DIM = 128
HEADS = 16
DIM_HEAD = 32
INNER = HEADS * DIM_HEAD          # 512
SCALE = DIM ** (-0.5)             # PyTorch: self.scale = dim ** -0.5


# --------------------------- Pallas kernel -----------------------------------

def cross_attn_kernel(x_ref, m_ref, wq_ref, wkv_ref, wo_ref, bo_ref, o_ref,
                      bstack_ref):
    """Btile batch elements of Cross_Attention (softmax=False, mask=None)."""
    Btile, N, _ = x_ref.shape
    Jp = m_ref.shape[1]

    # --- k/v projection: one batch-flattened bf16 MXU matmul (f32 acc).
    m_flat = m_ref[...].reshape(Btile * Jp, DIM)                      # bf16
    kv = jnp.dot(m_flat, wkv_ref[...],
                 preferred_element_type=jnp.float32)                  # (Btile*Jp, 2*INNER)
    kv = kv.astype(jnp.bfloat16)                                      # MXU operand dtype

    # --- assemble B_stack[b] = blockdiag_h(k_h^T v_h) @ Wo into VMEM scratch.
    for b in range(Btile):                                            # static unroll
        kv_b = kv[b * Jp:(b + 1) * Jp, :]                             # (Jp, 2*INNER)
        for h in range(HEADS):
            k_h = kv_b[:, h * DIM_HEAD:(h + 1) * DIM_HEAD]            # (Jp, 32)
            v_h = kv_b[:, INNER + h * DIM_HEAD:INNER + (h + 1) * DIM_HEAD]
            # a_h = k_h^T v_h : contract the memory-token axis (no transpose).
            a_h = lax.dot_general(k_h, v_h, (((0,), (0,)), ((), ())),
                                  preferred_element_type=jnp.float32)  # (32, 32)
            # Fused output projection; bf16 operands, f32 accumulation.
            b_h = jnp.dot(a_h.astype(jnp.bfloat16),
                          wo_ref[pl.ds(h * DIM_HEAD, DIM_HEAD), :],
                          preferred_element_type=jnp.float32)          # (32, DIM)
            bstack_ref[b, pl.ds(h * DIM_HEAD, DIM_HEAD), :] = (
                b_h.astype(jnp.bfloat16))

    # --- q projection AFTER the head loop (bounds live ranges), batch-flattened
    #     so the MXU sees Btile*N rows in one push.
    x_flat = x_ref[...].reshape(Btile * N, DIM)
    q = jnp.dot(x_flat, wq_ref[...],
                preferred_element_type=jnp.float32).astype(jnp.bfloat16)

    bias = bo_ref[...]                                                 # (1, DIM) f32
    for b in range(Btile):                                             # static unroll
        out_b = jnp.dot(q[b * N:(b + 1) * N, :], bstack_ref[b],
                        preferred_element_type=jnp.float32)            # (N, DIM)
        # SCALE applied once to the (N, DIM) f32 result (exact reassociation).
        o_ref[b, :, :] = (out_b * SCALE + bias).astype(o_ref.dtype)

    # TODO(synk): softmax=True / mask!=None paths of Cross_Attention are not
    # implemented (MGOD instantiates softmax=False, mask=None); they need an
    # explicit (N, J) dots tile with row-softmax / masked_fill and masking of
    # the zero-padded memory rows.


def _pick_btile(batch):
    """Largest divisor of batch that is <= 8 (fills MXU rows, bounds VMEM)."""
    for bt in (8, 4, 2, 1):
        if batch % bt == 0:
            return bt
    return 1


def cross_attention_pallas(x_b, m_b, wq, wkv, wo, bo, *, out_dtype=jnp.float32):
    """x_b: (B, N, DIM) bf16, m_b: (B, Jp, DIM) bf16, weights bf16, bo f32."""
    B, N, _ = x_b.shape
    Jp = m_b.shape[1]
    btile = _pick_btile(B)
    return pl.pallas_call(
        cross_attn_kernel,
        out_shape=jax.ShapeDtypeStruct((B, N, DIM), out_dtype),
        grid=(B // btile,),
        in_specs=[
            pl.BlockSpec((btile, N, DIM), lambda g: (g, 0, 0)),        # x (batch tile)
            pl.BlockSpec((btile, Jp, DIM), lambda g: (g, 0, 0)),       # m (batch tile)
            pl.BlockSpec((DIM, INNER), lambda g: (0, 0)),              # Wq    (resident)
            pl.BlockSpec((DIM, 2 * INNER), lambda g: (0, 0)),          # Wk|Wv (resident)
            pl.BlockSpec((INNER, DIM), lambda g: (0, 0)),              # Wo    (resident)
            pl.BlockSpec((1, DIM), lambda g: (0, 0)),                  # bias  (resident)
        ],
        out_specs=pl.BlockSpec((btile, N, DIM), lambda g: (g, 0, 0)),
        scratch_shapes=[pltpu.VMEM((btile, INNER, DIM), jnp.bfloat16)],
        compiler_params=pltpu.CompilerParams(
            dimension_semantics=("parallel",)),   # v7x: shard batch over both TCs
    )(x_b, m_b, wq, wkv, wo, bo)


# ----------------------------- wrapper ----------------------------------------

def init_params(key, depth=1):
    """Synthetic weights matching the nn.Linear shapes, stored pre-transposed
    (y = x @ W + b).  Master copies are f32; the wrapper casts to bf16."""
    params = []
    s = 0.02
    for d in range(depth):
        k1, k2, k3, k4, k5, key = jax.random.split(jax.random.fold_in(key, d), 6)
        params.append(dict(
            wq=s * jax.random.normal(k1, (DIM, INNER), jnp.float32),
            wk=s * jax.random.normal(k2, (DIM, INNER), jnp.float32),
            wv=s * jax.random.normal(k3, (DIM, INNER), jnp.float32),
            wo=s * jax.random.normal(k4, (INNER, DIM), jnp.float32),
            bo=s * jax.random.normal(k5, (1, DIM), jnp.float32),
        ))
    return params


@jax.jit
def transformer_decoder_forward(x, m, params):
    """TransformerDecoder.forward(x, m) with softmax=False, mask=None.
    x: (B, N, DIM) f32, m: (B, J, DIM) f32."""
    B, J, _ = m.shape
    jp = ((J + 15) // 16) * 16                     # pad memory tokens (exact no-op)
    if jp != J:
        m = jnp.pad(m, ((0, 0), (0, jp - J), (0, 0)))
    m_b = m.astype(jnp.bfloat16)

    out = x
    depth = len(params)
    for li, layer in enumerate(params):
        wq = layer["wq"].astype(jnp.bfloat16)
        wkv = jnp.concatenate([layer["wk"], layer["wv"]], axis=1).astype(jnp.bfloat16)
        wo = layer["wo"].astype(jnp.bfloat16)
        out_dtype = jnp.float32 if li == depth - 1 else jnp.bfloat16   # bf16 between layers
        out = cross_attention_pallas(out.astype(jnp.bfloat16), m_b,
                                     wq, wkv, wo, layer["bo"],
                                     out_dtype=out_dtype)
    return out


# --------------------------- pure-JAX reference -------------------------------

def _round_bf16(a):
    return a.astype(jnp.bfloat16).astype(jnp.float32)


def reference_forward(x, m, params):
    """Mirrors the PyTorch math (standard order: dots then @v then Wo), using
    the same bf16-rounded operand values the kernel sees."""
    with jax.default_matmul_precision("float32"):
        out = x
        for layer in params:
            wq, wk, wv = map(_round_bf16, (layer["wq"], layer["wk"], layer["wv"]))
            wo, bo = _round_bf16(layer["wo"]), layer["bo"]
            xb, mb = _round_bf16(out), _round_bf16(m)
            q = xb @ wq
            k = mb @ wk
            v = mb @ wv

            def split(t):  # b n (h d) -> b h n d
                bb, nn, _ = t.shape
                return jnp.transpose(t.reshape(bb, nn, HEADS, DIM_HEAD), (0, 2, 1, 3))

            qh, kh, vh = split(q), split(k), split(v)
            dots = jnp.einsum('bhid,bhjd->bhij', qh, kh) * SCALE
            o = jnp.einsum('bhij,bhjd->bhid', dots, vh)          # softmax=False
            o = jnp.transpose(o, (0, 2, 1, 3)).reshape(x.shape[0], -1, INNER)
            out = o @ wo + bo
        return out


# ------------------------------- demo ------------------------------------------

if __name__ == "__main__":
    key = jax.random.PRNGKey(0)
    kx, km, kp = jax.random.split(key, 3)

    B, N, J = 2, 32, 15                     # query tokens N = h*w*a, memory tokens J
    x = jax.random.normal(kx, (B, N, DIM), jnp.float32)
    m = jax.random.normal(km, (B, J, DIM), jnp.float32)
    params = init_params(kp, depth=1)

    out = transformer_decoder_forward(x, m, params)
    out = jax.block_until_ready(out)

    ref = reference_forward(x, m, params)
    assert out.shape == (B, N, DIM), out.shape
    max_err = float(jnp.max(jnp.abs(out - ref)))
    # bf16 MXU operands + bf16 intermediate rounding -> bf16-appropriate tolerance.
    assert jnp.allclose(out, ref, rtol=5e-3, atol=1e-3), max_err

    print("KERNEL_OK")
</pallas_src>

<mosaic_0001>
module attributes {stable_mosaic.version = 11 : i64} {
  func.func @cross_attn_kernel(%arg0: i32, %arg1: memref<2x32x128xbf16, #tpu.memory_space<vmem>>, %arg2: memref<2x16x128xbf16, #tpu.memory_space<vmem>>, %arg3: memref<128x512xbf16, #tpu.memory_space<vmem>>, %arg4: memref<128x1024xbf16, #tpu.memory_space<vmem>>, %arg5: memref<512x128xbf16, #tpu.memory_space<vmem>>, %arg6: memref<1x128xf32, #tpu.memory_space<vmem>>, %arg7: memref<2x32x128xf32, #tpu.memory_space<vmem>>, %arg8: memref<2x512x128xbf16, #tpu.memory_space<vmem>>) attributes {dimension_semantics = [#tpu.dimension_semantics<parallel>], iteration_bounds = array<i64: 1>, scalar_prefetch = 0 : i64, scratch_operands = 1 : i64, tpu.core_type = #tpu.core_type<tc>, window_params = [{transform_indices = @transform_0, window_bounds = array<i64: 2, 32, 128>}, {transform_indices = @transform_1, window_bounds = array<i64: 2, 16, 128>}, {pipeline_mode = #tpu.pipeline_mode<synchronous>, transform_indices = @transform_2, window_bounds = array<i64: 128, 512>}, {pipeline_mode = #tpu.pipeline_mode<synchronous>, transform_indices = @transform_3, window_bounds = array<i64: 128, 1024>}, {pipeline_mode = #tpu.pipeline_mode<synchronous>, transform_indices = @transform_4, window_bounds = array<i64: 512, 128>}, {pipeline_mode = #tpu.pipeline_mode<synchronous>, transform_indices = @transform_5, window_bounds = array<i64: 1, 128>}, {transform_indices = @transform_6, window_bounds = array<i64: 2, 32, 128>}]} {
    %c0 = arith.constant 0 : index
    %c0_0 = arith.constant 0 : index
    %c0_1 = arith.constant 0 : index
    %0 = vector.load %arg2[%c0, %c0_0, %c0_1] : memref<2x16x128xbf16, #tpu.memory_space<vmem>>, vector<2x16x128xbf16>
    %1 = vector.shape_cast %0 : vector<2x16x128xbf16> to vector<32x128xbf16>
    %c0_2 = arith.constant 0 : index
    %c0_3 = arith.constant 0 : index
    %2 = vector.load %arg4[%c0_2, %c0_3] : memref<128x1024xbf16, #tpu.memory_space<vmem>>, vector<128x1024xbf16>
    %cst = arith.constant dense<0.000000e+00> : vector<32x1024xf32>
    %3 = tpu.matmul %1, %2, %cst {dimension_numbers = #tpu.dot_dimension_numbers<[1], [0], [0], [1], [0, 0, 1, 1], [], []>} : vector<32x128xbf16>, vector<128x1024xbf16>, vector<32x1024xf32> -> vector<32x1024xf32>
    %4 = arith.truncf %3 : vector<32x1024xf32> to vector<32x1024xbf16>
    %5 = vector.extract_strided_slice %4 {offsets = [0, 0], sizes = [16, 1024], strides = [1, 1]} : vector<32x1024xbf16> to vector<16x1024xbf16>
    %6 = vector.extract_strided_slice %5 {offsets = [0, 0], sizes = [16, 32], strides = [1, 1]} : vector<16x1024xbf16> to vector<16x32xbf16>
    %7 = vector.extract_strided_slice %5 {offsets = [0, 512], sizes = [16, 32], strides = [1, 1]} : vector<16x1024xbf16> to vector<16x32xbf16>
    %cst_4 = arith.constant dense<0.000000e+00> : vector<32x32xf32>
    %8 = tpu.matmul %6, %7, %cst_4 {dimension_numbers = #tpu.dot_dimension_numbers<[0], [0], [1], [1], [0, 1, 1, 1], [], []>} : vector<16x32xbf16>, vector<16x32xbf16>, vector<32x32xf32> -> vector<32x32xf32>
    %9 = arith.truncf %8 : vector<32x32xf32> to vector<32x32xbf16>
    %c0_5 = arith.constant 0 : index
    %c0_6 = arith.constant 0 : index
    %10 = vector.load %arg5[%c0_5, %c0_6] : memref<512x128xbf16, #tpu.memory_space<vmem>>, vector<32x128xbf16>
    %cst_7 = arith.constant dense<0.000000e+00> : vector<32x128xf32>
    %11 = tpu.matmul %9, %10, %cst_7 {dimension_numbers = #tpu.dot_dimension_numbers<[1], [0], [0], [1], [0, 0, 1, 1], [], []>} : vector<32x32xbf16>, vector<32x128xbf16>, vector<32x128xf32> -> vector<32x128xf32>
    %12 = arith.truncf %11 : vector<32x128xf32> to vector<32x128xbf16>
    %c0_8 = arith.constant 0 : index
    %c0_9 = arith.constant 0 : index
    %c0_10 = arith.constant 0 : index
    %13 = vector.load %arg8[%c0_8, %c0_9, %c0_10] : memref<2x512x128xbf16, #tpu.memory_space<vmem>>, vector<1x32x128xbf16>
    %14 = vector.shape_cast %13 : vector<1x32x128xbf16> to vector<32x128xbf16>
    %15 = vector.shape_cast %12 : vector<32x128xbf16> to vector<1x32x128xbf16>
    tpu.vector_store %arg8[%c0_8, %c0_9, %c0_10], %15 {strides = array<i32>} : memref<2x512x128xbf16, #tpu.memory_space<vmem>>, vector<1x32x128xbf16>,
    %16 = vector.extract_strided_slice %5 {offsets = [0, 32], sizes = [16, 32], strides = [1, 1]} : vector<16x1024xbf16> to vector<16x32xbf16>
    %17 = vector.extract_strided_slice %5 {offsets = [0, 544], sizes = [16, 32], strides = [1, 1]} : vector<16x1024xbf16> to vector<16x32xbf16>
    %cst_11 = arith.constant dense<0.000000e+00> : vector<32x32xf32>
    %18 = tpu.matmul %16, %17, %cst_11 {dimension_numbers = #tpu.dot_dimension_numbers<[0], [0], [1], [1], [0, 1, 1, 1], [], []>} : vector<16x32xbf16>, vector<16x32xbf16>, vector<32x32xf32> -> vector<32x32xf32>
    %19 = arith.truncf %18 : vector<32x32xf32> to vector<32x32xbf16>
    %c32 = arith.constant 32 : index
    %c0_12 = arith.constant 0 : index
    %20 = vector.load %arg5[%c32, %c0_12] : memref<512x128xbf16, #tpu.memory_space<vmem>>, vector<32x128xbf16>
    %cst_13 = arith.constant dense<0.000000e+00> : vector<32x128xf32>
    %21 = tpu.matmul %19, %20, %cst_13 {dimension_numbers = #tpu.dot_dimension_numbers<[1], [0], [0], [1], [0, 0, 1, 1], [], []>} : vector<32x32xbf16>, vector<32x128xbf16>, vector<32x128xf32> -> vector<32x128xf32>
    %22 = arith.truncf %21 : vector<32x128xf32> to vector<32x128xbf16>
    %c0_14 = arith.constant 0 : index
    %c32_15 = arith.constant 32 : index
    %c0_16 = arith.constant 0 : index
    %23 = vector.load %arg8[%c0_14, %c32_15, %c0_16] : memref<2x512x128xbf16, #tpu.memory_space<vmem>>, vector<1x32x128xbf16>
    %24 = vector.shape_cast %23 : vector<1x32x128xbf16> to vector<32x128xbf16>
    %25 = vector.shape_cast %22 : vector<32x128xbf16> to vector<1x32x128xbf16>
    tpu.vector_store %arg8[%c0_14, %c32_15, %c0_16], %25 {strides = array<i32>} : memref<2x512x128xbf16, #tpu.memory_space<vmem>>, vector<1x32x128xbf16>,
    %26 = vector.extract_strided_slice %5 {offsets = [0, 64], sizes = [16, 32], strides = [1, 1]} : vector<16x1024xbf16> to vector<16x32xbf16>
    %27 = vector.extract_strided_slice %5 {offsets = [0, 576], sizes = [16, 32], strides = [1, 1]} : vector<16x1024xbf16> to vector<16x32xbf16>
    %cst_17 = arith.constant dense<0.000000e+00> : vector<32x32xf32>
    %28 = tpu.matmul %26, %27, %cst_17 {dimension_numbers = #tpu.dot_dimension_numbers<[0], [0], [1], [1], [0, 1, 1, 1], [], []>} : vector<16x32xbf16>, vector<16x32xbf16>, vector<32x32xf32> -> vector<32x32xf32>
    %29 = arith.truncf %28 : vector<32x32xf32> to vector<32x32xbf16>
    %c64 = arith.constant 64 : index
    %c0_18 = arith.constant 0 : index
    %30 = vector.load %arg5[%c64, %c0_18] : memref<512x128xbf16, #tpu.memory_space<vmem>>, vector<32x128xbf16>
    %cst_19 = arith.constant dense<0.000000e+00> : vector<32x128xf32>
    %31 = tpu.matmul %29, %30, %cst_19 {dimension_numbers = #tpu.dot_dimension_numbers<[1], [0], [0], [1], [0, 0, 1, 1], [], []>} : vector<32x32xbf16>, vector<32x128xbf16>, vector<32x128xf32> -> vector<32x128xf32>
    %32 = arith.truncf %31 : vector<32x128xf32> to vector<32x128xbf16>
    %c0_20 = arith.constant 0 : index
    %c64_21 = arith.constant 64 : index
    %c0_22 = arith.constant 0 : index
    %33 = vector.load %arg8[%c0_20, %c64_21, %c0_22] : memref<2x512x128xbf16, #tpu.memory_space<vmem>>, vector<1x32x128xbf16>
    %34 = vector.shape_cast %33 : vector<1x32x128xbf16> to vector<32x128xbf16>
    %35 = vector.shape_cast %32 : vector<32x128xbf16> to vector<1x32x128xbf16>
    tpu.vector_store %arg8[%c0_20, %c64_21, %c0_22], %35 {strides = array<i32>} : memref<2x512x128xbf16, #tpu.memory_space<vmem>>, vector<1x32x128xbf16>,
    %36 = vector.extract_strided_slice %5 {offsets = [0, 96], sizes = [16, 32], strides = [1, 1]} : vector<16x1024xbf16> to vector<16x32xbf16>
    %37 = vector.extract_strided_slice %5 {offsets = [0, 608], sizes = [16, 32], strides = [1, 1]} : vector<16x1024xbf16> to vector<16x32xbf16>
    %cst_23 = arith.constant dense<0.000000e+00> : vector<32x32xf32>
    %38 = tpu.matmul %36, %37, %cst_23 {dimension_numbers = #tpu.dot_dimension_numbers<[0], [0], [1], [1], [0, 1, 1, 1], [], []>} : vector<16x32xbf16>, vector<16x32xbf16>, vector<32x32xf32> -> vector<32x32xf32>
    %39 = arith.truncf %38 : vector<32x32xf32> to vector<32x32xbf16>
    %c96 = arith.constant 96 : index
    %c0_24 = arith.constant 0 : index
    %40 = vector.load %arg5[%c96, %c0_24] : memref<512x128xbf16, #tpu.memory_space<vmem>>, vector<32x128xbf16>
    %cst_25 = arith.constant dense<0.000000e+00> : vector<32x128xf32>
    %41 = tpu.matmul %39, %40, %cst_25 {dimension_numbers = #tpu.dot_dimension_numbers<[1], [0], [0], [1], [0, 0, 1, 1], [], []>} : vector<32x32xbf16>, vector<32x128xbf16>, vector<32x128xf32> -> vector<32x128xf32>
    %42 = arith.truncf %41 : vector<32x128xf32> to vector<32x128xbf16>
    %c0_26 = arith.constant 0 : index
    %c96_27 = arith.constant 96 : index
    %c0_28 = arith.constant 0 : index
    %43 = vector.load %arg8[%c0_26, %c96_27, %c0_28] : memref<2x512x128xbf16, #tpu.memory_space<vmem>>, vector<1x32x128xbf16>
    %44 = vector.shape_cast %43 : vector<1x32x128xbf16> to vector<32x128xbf16>
    %45 = vector.shape_cast %42 : vector<32x128xbf16> to vector<1x32x128xbf16>
    tpu.vector_store %arg8[%c0_26, %c96_27, %c0_28], %45 {strides = array<i32>} : memref<2x512x128xbf16, #tpu.memory_space<vmem>>, vector<1x32x128xbf16>,
    %46 = vector.extract_strided_slice %5 {offsets = [0, 128], sizes = [16, 32], strides = [1, 1]} : vector<16x1024xbf16> to vector<16x32xbf16>
    %47 = vector.extract_strided_slice %5 {offsets = [0, 640], sizes = [16, 32], strides = [1, 1]} : vector<16x1024xbf16> to vector<16x32xbf16>
    %cst_29 = arith.constant dense<0.000000e+00> : vector<32x32xf32>
    %48 = tpu.matmul %46, %47, %cst_29 {dimension_numbers = #tpu.dot_dimension_numbers<[0], [0], [1], [1], [0, 1, 1, 1], [], []>} : vector<16x32xbf16>, vector<16x32xbf16>, vector<32x32xf32> -> vector<32x32xf32>
    %49 = arith.truncf %48 : vector<32x32xf32> to vector<32x32xbf16>
    %c128 = arith.constant 128 : index
    %c0_30 = arith.constant 0 : index
    %50 = vector.load %arg5[%c128, %c0_30] : memref<512x128xbf16, #tpu.memory_space<vmem>>, vector<32x128xbf16>
    %cst_31 = arith.constant dense<0.000000e+00> : vector<32x128xf32>
    %51 = tpu.matmul %49, %50, %cst_31 {dimension_numbers = #tpu.dot_dimension_numbers<[1], [0], [0], [1], [0, 0, 1, 1], [], []>} : vector<32x32xbf16>, vector<32x128xbf16>, vector<32x128xf32> -> vector<32x128xf32>
    %52 = arith.truncf %51 : vector<32x128xf32> to vector<32x128xbf16>
    %c0_32 = arith.constant 0 : index
    %c128_33 = arith.constant 128 : index
    %c0_34 = arith.constant 0 : index
    %53 = vector.load %arg8[%c0_32, %c128_33, %c0_34] : memref<2x512x128xbf16, #tpu.memory_space<vmem>>, vector<1x32x128xbf16>
    %54 = vector.shape_cast %53 : vector<1x32x128xbf16> to vector<32x128xbf16>
    %55 = vector.shape_cast %52 : vector<32x128xbf16> to vector<1x32x128xbf16>
    tpu.vector_store %arg8[%c0_32, %c128_33, %c0_34], %55 {strides = array<i32>} : memref<2x512x128xbf16, #tpu.memory_space<vmem>>, vector<1x32x128xbf16>,
    %56 = vector.extract_strided_slice %5 {offsets = [0, 160], sizes = [16, 32], strides = [1, 1]} : vector<16x1024xbf16> to vector<16x32xbf16>
    %57 = vector.extract_strided_slice %5 {offsets = [0, 672], sizes = [16, 32], strides = [1, 1]} : vector<16x1024xbf16> to vector<16x32xbf16>
    %cst_35 = arith.constant dense<0.000000e+00> : vector<32x32xf32>
    %58 = tpu.matmul %56, %57, %cst_35 {dimension_numbers = #tpu.dot_dimension_numbers<[0], [0], [1], [1], [0, 1, 1, 1], [], []>} : vector<16x32xbf16>, vector<16x32xbf16>, vector<32x32xf32> -> vector<32x32xf32>
    %59 = arith.truncf %58 : vector<32x32xf32> to vector<32x32xbf16>
    %c160 = arith.constant 160 : index
    %c0_36 = arith.constant 0 : index
    %60 = vector.load %arg5[%c160, %c0_36] : memref<512x128xbf16, #tpu.memory_space<vmem>>, vector<32x128xbf16>
    %cst_37 = arith.constant dense<0.000000e+00> : vector<32x128xf32>
    %61 = tpu.matmul %59, %60, %cst_37 {dimension_numbers = #tpu.dot_dimension_numbers<[1], [0], [0], [1], [0, 0, 1, 1], [], []>} : vector<32x32xbf16>, vector<32x128xbf16>, vector<32x128xf32> -> vector<32x128xf32>
    %62 = arith.truncf %61 : vector<32x128xf32> to vector<32x128xbf16>
    %c0_38 = arith.constant 0 : index
    %c160_39 = arith.constant 160 : index
    %c0_40 = arith.constant 0 : index
    %63 = vector.load %arg8[%c0_38, %c160_39, %c0_40] : memref<2x512x128xbf16, #tpu.memory_space<vmem>>, vector<1x32x128xbf16>
    %64 = vector.shape_cast %63 : vector<1x32x128xbf16> to vector<32x128xbf16>
    %65 = vector.shape_cast %62 : vector<32x128xbf16> to vector<1x32x128xbf16>
    tpu.vector_store %arg8[%c0_38, %c160_39, %c0_40], %65 {strides = array<i32>} : memref<2x512x128xbf16, #tpu.memory_space<vmem>>, vector<1x32x128xbf16>,
    %66 = vector.extract_strided_slice %5 {offsets = [0, 192], sizes = [16, 32], strides = [1, 1]} : vector<16x1024xbf16> to vector<16x32xbf16>
    %67 = vector.extract_strided_slice %5 {offsets = [0, 704], sizes = [16, 32], strides = [1, 1]} : vector<16x1024xbf16> to vector<16x32xbf16>
    %cst_41 = arith.constant dense<0.000000e+00> : vector<32x32xf32>
    %68 = tpu.matmul %66, %67, %cst_41 {dimension_numbers = #tpu.dot_dimension_numbers<[0], [0], [1], [1], [0, 1, 1, 1], [], []>} : vector<16x32xbf16>, vector<16x32xbf16>, vector<32x32xf32> -> vector<32x32xf32>
    %69 = arith.truncf %68 : vector<32x32xf32> to vector<32x32xbf16>
    %c192 = arith.constant 192 : index
    %c0_42 = arith.constant 0 : index
    %70 = vector.load %arg5[%c192, %c0_42] : memref<512x128xbf16, #tpu.memory_space<vmem>>, vector<32x128xbf16>
    %cst_43 = arith.constant dense<0.000000e+00> : vector<32x128xf32>
    %71 = tpu.matmul %69, %70, %cst_43 {dimension_numbers = #tpu.dot_dimension_numbers<[1], [0], [0], [1], [0, 0, 1, 1], [], []>} : vector<32x32xbf16>, vector<32x128xbf16>, vector<32x128xf32> -> vector<32x128xf32>
    %72 = arith.truncf %71 : vector<32x128xf32> to vector<32x128xbf16>
    %c0_44 = arith.constant 0 : index
    %c192_45 = arith.constant 192 : index
    %c0_46 = arith.constant 0 : index
    %73 = vector.load %arg8[%c0_44, %c192_45, %c0_46] : memref<2x512x128xbf16, #tpu.memory_space<vmem>>, vector<1x32x128xbf16>
    %74 = vector.shape_cast %73 : vector<1x32x128xbf16> to vector<32x128xbf16>
    %75 = vector.shape_cast %72 : vector<32x128xbf16> to vector<1x32x128xbf16>
    tpu.vector_store %arg8[%c0_44, %c192_45, %c0_46], %75 {strides = array<i32>} : memref<2x512x128xbf16, #tpu.memory_space<vmem>>, vector<1x32x128xbf16>,
    %76 = vector.extract_strided_slice %5 {offsets = [0, 224], sizes = [16, 32], strides = [1, 1]} : vector<16x1024xbf16> to vector<16x32xbf16>
    %77 = vector.extract_strided_slice %5 {offsets = [0, 736], sizes = [16, 32], strides = [1, 1]} : vector<16x1024xbf16> to vector<16x32xbf16>
    %cst_47 = arith.constant dense<0.000000e+00> : vector<32x32xf32>
    %78 = tpu.matmul %76, %77, %cst_47 {dimension_numbers = #tpu.dot_dimension_numbers<[0], [0], [1], [1], [0, 1, 1, 1], [], []>} : vector<16x32xbf16>, vector<16x32xbf16>, vector<32x32xf32> -> vector<32x32xf32>
    %79 = arith.truncf %78 : vector<32x32xf32> to vector<32x32xbf16>
    %c224 = arith.constant 224 : index
    %c0_48 = arith.constant 0 : index
    %80 = vector.load %arg5[%c224, %c0_48] : memref<512x128xbf16, #tpu.memory_space<vmem>>, vector<32x128xbf16>
    %cst_49 = arith.constant dense<0.000000e+00> : vector<32x128xf32>
    %81 = tpu.matmul %79, %80, %cst_49 {dimension_numbers = #tpu.dot_dimension_numbers<[1], [0], [0], [1], [0, 0, 1, 1], [], []>} : vector<32x32xbf16>, vector<32x128xbf16>, vector<32x128xf32> -> vector<32x128xf32>
    %82 = arith.truncf %81 : vector<32x128xf32> to vector<32x128xbf16>
    %c0_50 = arith.constant 0 : index
    %c224_51 = arith.constant 224 : index
    %c0_52 = arith.constant 0 : index
    %83 = vector.load %arg8[%c0_50, %c224_51, %c0_52] : memref<2x512x128xbf16, #tpu.memory_space<vmem>>, vector<1x32x128xbf16>
    %84 = vector.shape_cast %83 : vector<1x32x128xbf16> to vector<32x128xbf16>
    %85 = vector.shape_cast %82 : vector<32x128xbf16> to vector<1x32x128xbf16>
    tpu.vector_store %arg8[%c0_50, %c224_51, %c0_52], %85 {strides = array<i32>} : memref<2x512x128xbf16, #tpu.memory_space<vmem>>, vector<1x32x128xbf16>,
    %86 = vector.extract_strided_slice %5 {offsets = [0, 256], sizes = [16, 32], strides = [1, 1]} : vector<16x1024xbf16> to vector<16x32xbf16>
    %87 = vector.extract_strided_slice %5 {offsets = [0, 768], sizes = [16, 32], strides = [1, 1]} : vector<16x1024xbf16> to vector<16x32xbf16>
    %cst_53 = arith.constant dense<0.000000e+00> : vector<32x32xf32>
    %88 = tpu.matmul %86, %87, %cst_53 {dimension_numbers = #tpu.dot_dimension_numbers<[0], [0], [1], [1], [0, 1, 1, 1], [], []>} : vector<16x32xbf16>, vector<16x32xbf16>, vector<32x32xf32> -> vector<32x32xf32>
    %89 = arith.truncf %88 : vector<32x32xf32> to vector<32x32xbf16>
    %c256 = arith.constant 256 : index
    %c0_54 = arith.constant 0 : index
    %90 = vector.load %arg5[%c256, %c0_54] : memref<512x128xbf16, #tpu.memory_space<vmem>>, vector<32x128xbf16>
    %cst_55 = arith.constant dense<0.000000e+00> : vector<32x128xf32>
    %91 = tpu.matmul %89, %90, %cst_55 {dimension_numbers = #tpu.dot_dimension_numbers<[1], [0], [0], [1], [0, 0, 1, 1], [], []>} : vector<32x32xbf16>, vector<32x128xbf16>, vector<32x128xf32> -> vector<32x128xf32>
    %92 = arith.truncf %91 : vector<32x128xf32> to vector<32x128xbf16>
    %c0_56 = arith.constant 0 : index
    %c256_57 = arith.constant 256 : index
    %c0_58 = arith.constant 0 : index
    %93 = vector.load %arg8[%c0_56, %c256_57, %c0_58] : memref<2x512x128xbf16, #tpu.memory_space<vmem>>, vector<1x32x128xbf16>
    %94 = vector.shape_cast %93 : vector<1x32x128xbf16> to vector<32x128xbf16>
    %95 = vector.shape_cast %92 : vector<32x128xbf16> to vector<1x32x128xbf16>
    tpu.vector_store %arg8[%c0_56, %c256_57, %c0_58], %95 {strides = array<i32>} : memref<2x512x128xbf16, #tpu.memory_space<vmem>>, vector<1x32x128xbf16>,
    %96 = vector.extract_strided_slice %5 {offsets = [0, 288], sizes = [16, 32], strides = [1, 1]} : vector<16x1024xbf16> to vector<16x32xbf16>
    %97 = vector.extract_strided_slice %5 {offsets = [0, 800], sizes = [16, 32], strides = [1, 1]} : vector<16x1024xbf16> to vector<16x32xbf16>
    %cst_59 = arith.constant dense<0.000000e+00> : vector<32x32xf32>
    %98 = tpu.matmul %96, %97, %cst_59 {dimension_numbers = #tpu.dot_dimension_numbers<[0], [0], [1], [1], [0, 1, 1, 1], [], []>} : vector<16x32xbf16>, vector<16x32xbf16>, vector<32x32xf32> -> vector<32x32xf32>
    %99 = arith.truncf %98 : vector<32x32xf32> to vector<32x32xbf16>
    %c288 = arith.constant 288 : index
    %c0_60 = arith.constant 0 : index
    %100 = vector.load %arg5[%c288, %c0_60] : memref<512x128xbf16, #tpu.memory_space<vmem>>, vector<32x128xbf16>
    %cst_61 = arith.constant dense<0.000000e+00> : vector<32x128xf32>
    %101 = tpu.matmul %99, %100, %cst_61 {dimension_numbers = #tpu.dot_dimension_numbers<[1], [0], [0], [1], [0, 0, 1, 1], [], []>} : vector<32x32xbf16>, vector<32x128xbf16>, vector<32x128xf32> -> vector<32x128xf32>
    %102 = arith.truncf %101 : vector<32x128xf32> to vector<32x128xbf16>
    %c0_62 = arith.constant 0 : index
    %c288_63 = arith.constant 288 : index
    %c0_64 = arith.constant 0 : index
    %103 = vector.load %arg8[%c0_62, %c288_63, %c0_64] : memref<2x512x128xbf16, #tpu.memory_space<vmem>>, vector<1x32x128xbf16>
    %104 = vector.shape_cast %103 : vector<1x32x128xbf16> to vector<32x128xbf16>
    %105 = vector.shape_cast %102 : vector<32x128xbf16> to vector<1x32x128xbf16>
    tpu.vector_store %arg8[%c0_62, %c288_63, %c0_64], %105 {strides = array<i32>} : memref<2x512x128xbf16, #tpu.memory_space<vmem>>, vector<1x32x128xbf16>,
    %106 = vector.extract_strided_slice %5 {offsets = [0, 320], sizes = [16, 32], strides = [1, 1]} : vector<16x1024xbf16> to vector<16x32xbf16>
    %107 = vector.extract_strided_slice %5 {offsets = [0, 832], sizes = [16, 32], strides = [1, 1]} : vector<16x1024xbf16> to vector<16x32xbf16>
    %cst_65 = arith.constant dense<0.000000e+00> : vector<32x32xf32>
    %108 = tpu.matmul %106, %107, %cst_65 {dimension_numbers = #tpu.dot_dimension_numbers<[0], [0], [1], [1], [0, 1, 1, 1], [], []>} : vector<16x32xbf16>, vector<16x32xbf16>, vector<32x32xf32> -> vector<32x32xf32>
    %109 = arith.truncf %108 : vector<32x32xf32> to vector<32x32xbf16>
    %c320 = arith.constant 320 : index
    %c0_66 = arith.constant 0 : index
    %110 = vector.load %arg5[%c320, %c0_66] : memref<512x128xbf16, #tpu.memory_space<vmem>>, vector<32x128xbf16>
    %cst_67 = arith.constant dense<0.000000e+00> : vector<32x128xf32>
    %111 = tpu.matmul %109, %110, %cst_67 {dimension_numbers = #tpu.dot_dimension_numbers<[1], [0], [0], [1], [0, 0, 1, 1], [], []>} : vector<32x32xbf16>, vector<32x128xbf16>, vector<32x128xf32> -> vector<32x128xf32>
    %112 = arith.truncf %111 : vector<32x128xf32> to vector<32x128xbf16>
    %c0_68 = arith.constant 0 : index
    %c320_69 = arith.constant 320 : index
    %c0_70 = arith.constant 0 : index
    %113 = vector.load %arg8[%c0_68, %c320_69, %c0_70] : memref<2x512x128xbf16, #tpu.memory_space<vmem>>, vector<1x32x128xbf16>
    %114 = vector.shape_cast %113 : vector<1x32x128xbf16> to vector<32x128xbf16>
    %115 = vector.shape_cast %112 : vector<32x128xbf16> to vector<1x32x128xbf16>
    tpu.vector_store %arg8[%c0_68, %c320_69, %c0_70], %115 {strides = array<i32>} : memref<2x512x128xbf16, #tpu.memory_space<vmem>>, vector<1x32x128xbf16>,
    %116 = vector.extract_strided_slice %5 {offsets = [0, 352], sizes = [16, 32], strides = [1, 1]} : vector<16x1024xbf16> to vector<16x32xbf16>
    %117 = vector.extract_strided_slice %5 {offsets = [0, 864], sizes = [16, 32], strides = [1, 1]} : vector<16x1024xbf16> to vector<16x32xbf16>
    %cst_71 = arith.constant dense<0.000000e+00> : vector<32x32xf32>
    %118 = tpu.matmul %116, %117, %cst_71 {dimension_numbers = #tpu.dot_dimension_numbers<[0], [0], [1], [1], [0, 1, 1, 1], [], []>} : vector<16x32xbf16>, vector<16x32xbf16>, vector<32x32xf32> -> vector<32x32xf32>
    %119 = arith.truncf %118 : vector<32x32xf32> to vector<32x32xbf16>
    %c352 = arith.constant 352 : index
    %c0_72 = arith.constant 0 : index
    %120 = vector.load %arg5[%c352, %c0_72] : memref<512x128xbf16, #tpu.memory_space<vmem>>, vector<32x128xbf16>
    %cst_73 = arith.constant dense<0.000000e+00> : vector<32x128xf32>
    %121 = tpu.matmul %119, %120, %cst_73 {dimension_numbers = #tpu.dot_dimension_numbers<[1], [0], [0], [1], [0, 0, 1, 1], [], []>} : vector<32x32xbf16>, vector<32x128xbf16>, vector<32x128xf32> -> vector<32x128xf32>
    %122 = arith.truncf %121 : vector<32x128xf32> to vector<32x128xbf16>
    %c0_74 = arith.constant 0 : index
    %c352_75 = arith.constant 352 : index
    %c0_76 = arith.constant 0 : index
    %123 = vector.load %arg8[%c0_74, %c352_75, %c0_76] : memref<2x512x128xbf16, #tpu.memory_space<vmem>>, vector<1x32x128xbf16>
    %124 = vector.shape_cast %123 : vector<1x32x128xbf16> to vector<32x128xbf16>
    %125 = vector.shape_cast %122 : vector<32x128xbf16> to vector<1x32x128xbf16>
    tpu.vector_store %arg8[%c0_74, %c352_75, %c0_76], %125 {strides = array<i32>} : memref<2x512x128xbf16, #tpu.memory_space<vmem>>, vector<1x32x128xbf16>,
    %126 = vector.extract_strided_slice %5 {offsets = [0, 384], sizes = [16, 32], strides = [1, 1]} : vector<16x1024xbf16> to vector<16x32xbf16>
    %127 = vector.extract_strided_slice %5 {offsets = [0, 896], sizes = [16, 32], strides = [1, 1]} : vector<16x1024xbf16> to vector<16x32xbf16>
    %cst_77 = arith.constant dense<0.000000e+00> : vector<32x32xf32>
    %128 = tpu.matmul %126, %127, %cst_77 {dimension_numbers = #tpu.dot_dimension_numbers<[0], [0], [1], [1], [0, 1, 1, 1], [], []>} : vector<16x32xbf16>, vector<16x32xbf16>, vector<32x32xf32> -> vector<32x32xf32>
    %129 = arith.truncf %128 : vector<32x32xf32> to vector<32x32xbf16>
    %c384 = arith.constant 384 : index
    %c0_78 = arith.constant 0 : index
    %130 = vector.load %arg5[%c384, %c0_78] : memref<512x128xbf16, #tpu.memory_space<vmem>>, vector<32x128xbf16>
    %cst_79 = arith.constant dense<0.000000e+00> : vector<32x128xf32>
    %131 = tpu.matmul %129, %130, %cst_79 {dimension_numbers = #tpu.dot_dimension_numbers<[1], [0], [0], [1], [0, 0, 1, 1], [], []>} : vector<32x32xbf16>, vector<32x128xbf16>, vector<32x128xf32> -> vector<32x128xf32>
    %132 = arith.truncf %131 : vector<32x128xf32> to vector<32x128xbf16>
    %c0_80 = arith.constant 0 : index
    %c384_81 = arith.constant 384 : index
    %c0_82 = arith.constant 0 : index
    %133 = vector.load %arg8[%c0_80, %c384_81, %c0_82] : memref<2x512x128xbf16, #tpu.memory_space<vmem>>, vector<1x32x128xbf16>
    %134 = vector.shape_cast %133 : vector<1x32x128xbf16> to vector<32x128xbf16>
    %135 = vector.shape_cast %132 : vector<32x128xbf16> to vector<1x32x128xbf16>
    tpu.vector_store %arg8[%c0_80, %c384_81, %c0_82], %135 {strides = array<i32>} : memref<2x512x128xbf16, #tpu.memory_space<vmem>>, vector<1x32x128xbf16>,
    %136 = vector.extract_strided_slice %5 {offsets = [0, 416], sizes = [16, 32], strides = [1, 1]} : vector<16x1024xbf16> to vector<16x32xbf16>
    %137 = vector.extract_strided_slice %5 {offsets = [0, 928], sizes = [16, 32], strides = [1, 1]} : vector<16x1024xbf16> to vector<16x32xbf16>
    %cst_83 = arith.constant dense<0.000000e+00> : vector<32x32xf32>
    %138 = tpu.matmul %136, %137, %cst_83 {dimension_numbers = #tpu.dot_dimension_numbers<[0], [0], [1], [1], [0, 1, 1, 1], [], []>} : vector<16x32xbf16>, vector<16x32xbf16>, vector<32x32xf32> -> vector<32x32xf32>
    %139 = arith.truncf %138 : vector<32x32xf32> to vector<32x32xbf16>
    %c416 = arith.constant 416 : index
    %c0_84 = arith.constant 0 : index
    %140 = vector.load %arg5[%c416, %c0_84] : memref<512x128xbf16, #tpu.memory_space<vmem>>, vector<32x128xbf16>
    %cst_85 = arith.constant dense<0.000000e+00> : vector<32x128xf32>
    %141 = tpu.matmul %139, %140, %cst_85 {dimension_numbers = #tpu.dot_dimension_numbers<[1], [0], [0], [1], [0, 0, 1, 1], [], []>} : vector<32x32xbf16>, vector<32x128xbf16>, vector<32x128xf32> -> vector<32x128xf32>
    %142 = arith.truncf %141 : vector<32x128xf32> to vector<32x128xbf16>
    %c0_86 = arith.constant 0 : index
    %c416_87 = arith.constant 416 : index
    %c0_88 = arith.constant 0 : index
    %143 = vector.load %arg8[%c0_86, %c416_87, %c0_88] : memref<2x512x128xbf16, #tpu.memory_space<vmem>>, vector<1x32x128xbf16>
    %144 = vector.shape_cast %143 : vector<1x32x128xbf16> to vector<32x128xbf16>
    %145 = vector.shape_cast %142 : vector<32x128xbf16> to vector<1x32x128xbf16>
    tpu.vector_store %arg8[%c0_86, %c416_87, %c0_88], %145 {strides = array<i32>} : memref<2x512x128xbf16, #tpu.memory_space<vmem>>, vector<1x32x128xbf16>,
    %146 = vector.extract_strided_slice %5 {offsets = [0, 448], sizes = [16, 32], strides = [1, 1]} : vector<16x1024xbf16> to vector<16x32xbf16>
    %147 = vector.extract_strided_slice %5 {offsets = [0, 960], sizes = [16, 32], strides = [1, 1]} : vector<16x1024xbf16> to vector<16x32xbf16>
    %cst_89 = arith.constant dense<0.000000e+00> : vector<32x32xf32>
    %148 = tpu.matmul %146, %147, %cst_89 {dimension_numbers = #tpu.dot_dimension_numbers<[0], [0], [1], [1], [0, 1, 1, 1], [], []>} : vector<16x32xbf16>, vector<16x32xbf16>, vector<32x32xf32> -> vector<32x32xf32>
    %149 = arith.truncf %148 : vector<32x32xf32> to vector<32x32xbf16>
    %c448 = arith.constant 448 : index
    %c0_90 = arith.constant 0 : index
    %150 = vector.load %arg5[%c448, %c0_90] : memref<512x128xbf16, #tpu.memory_space<vmem>>, vector<32x128xbf16>
    %cst_91 = arith.constant dense<0.000000e+00> : vector<32x128xf32>
    %151 = tpu.matmul %149, %150, %cst_91 {dimension_numbers = #tpu.dot_dimension_numbers<[1], [0], [0], [1], [0, 0, 1, 1], [], []>} : vector<32x32xbf16>, vector<32x128xbf16>, vector<32x128xf32> -> vector<32x128xf32>
    %152 = arith.truncf %151 : vector<32x128xf32> to vector<32x128xbf16>
    %c0_92 = arith.constant 0 : index
    %c448_93 = arith.constant 448 : index
    %c0_94 = arith.constant 0 : index
    %153 = vector.load %arg8[%c0_92, %c448_93, %c0_94] : memref<2x512x128xbf16, #tpu.memory_space<vmem>>, vector<1x32x128xbf16>
    %154 = vector.shape_cast %153 : vector<1x32x128xbf16> to vector<32x128xbf16>
    %155 = vector.shape_cast %152 : vector<32x128xbf16> to vector<1x32x128xbf16>
    tpu.vector_store %arg8[%c0_92, %c448_93, %c0_94], %155 {strides = array<i32>} : memref<2x512x128xbf16, #tpu.memory_space<vmem>>, vector<1x32x128xbf16>,
    %156 = vector.extract_strided_slice %5 {offsets = [0, 480], sizes = [16, 32], strides = [1, 1]} : vector<16x1024xbf16> to vector<16x32xbf16>
    %157 = vector.extract_strided_slice %5 {offsets = [0, 992], sizes = [16, 32], strides = [1, 1]} : vector<16x1024xbf16> to vector<16x32xbf16>
    %cst_95 = arith.constant dense<0.000000e+00> : vector<32x32xf32>
    %158 = tpu.matmul %156, %157, %cst_95 {dimension_numbers = #tpu.dot_dimension_numbers<[0], [0], [1], [1], [0, 1, 1, 1], [], []>} : vector<16x32xbf16>, vector<16x32xbf16>, vector<32x32xf32> -> vector<32x32xf32>
    %159 = arith.truncf %158 : vector<32x32xf32> to vector<32x32xbf16>
    %c480 = arith.constant 480 : index
    %c0_96 = arith.constant 0 : index
    %160 = vector.load %arg5[%c480, %c0_96] : memref<512x128xbf16, #tpu.memory_space<vmem>>, vector<32x128xbf16>
    %cst_97 = arith.constant dense<0.000000e+00> : vector<32x128xf32>
    %161 = tpu.matmul %159, %160, %cst_97 {dimension_numbers = #tpu.dot_dimension_numbers<[1], [0], [0], [1], [0, 0, 1, 1], [], []>} : vector<32x32xbf16>, vector<32x128xbf16>, vector<32x128xf32> -> vector<32x128xf32>
    %162 = arith.truncf %161 : vector<32x128xf32> to vector<32x128xbf16>
    %c0_98 = arith.constant 0 : index
    %c480_99 = arith.constant 480 : index
    %c0_100 = arith.constant 0 : index
    %163 = vector.load %arg8[%c0_98, %c480_99, %c0_100] : memref<2x512x128xbf16, #tpu.memory_space<vmem>>, vector<1x32x128xbf16>
    %164 = vector.shape_cast %163 : vector<1x32x128xbf16> to vector<32x128xbf16>
    %165 = vector.shape_cast %162 : vector<32x128xbf16> to vector<1x32x128xbf16>
    tpu.vector_store %arg8[%c0_98, %c480_99, %c0_100], %165 {strides = array<i32>} : memref<2x512x128xbf16, #tpu.memory_space<vmem>>, vector<1x32x128xbf16>,
    %166 = vector.extract_strided_slice %4 {offsets = [16, 0], sizes = [16, 1024], strides = [1, 1]} : vector<32x1024xbf16> to vector<16x1024xbf16>
    %167 = vector.extract_strided_slice %166 {offsets = [0, 0], sizes = [16, 32], strides = [1, 1]} : vector<16x1024xbf16> to vector<16x32xbf16>
    %168 = vector.extract_strided_slice %166 {offsets = [0, 512], sizes = [16, 32], strides = [1, 1]} : vector<16x1024xbf16> to vector<16x32xbf16>
    %cst_101 = arith.constant dense<0.000000e+00> : vector<32x32xf32>
    %169 = tpu.matmul %167, %168, %cst_101 {dimension_numbers = #tpu.dot_dimension_numbers<[0], [0], [1], [1], [0, 1, 1, 1], [], []>} : vector<16x32xbf16>, vector<16x32xbf16>, vector<32x32xf32> -> vector<32x32xf32>
    %170 = arith.truncf %169 : vector<32x32xf32> to vector<32x32xbf16>
    %c0_102 = arith.constant 0 : index
    %c0_103 = arith.constant 0 : index
    %171 = vector.load %arg5[%c0_102, %c0_103] : memref<512x128xbf16, #tpu.memory_space<vmem>>, vector<32x128xbf16>
    %cst_104 = arith.constant dense<0.000000e+00> : vector<32x128xf32>
    %172 = tpu.matmul %170, %171, %cst_104 {dimension_numbers = #tpu.dot_dimension_numbers<[1], [0], [0], [1], [0, 0, 1, 1], [], []>} : vector<32x32xbf16>, vector<32x128xbf16>, vector<32x128xf32> -> vector<32x128xf32>
    %173 = arith.truncf %172 : vector<32x128xf32> to vector<32x128xbf16>
    %c1 = arith.constant 1 : index
    %c0_105 = arith.constant 0 : index
    %c0_106 = arith.constant 0 : index
    %174 = vector.load %arg8[%c1, %c0_105, %c0_106] : memref<2x512x128xbf16, #tpu.memory_space<vmem>>, vector<1x32x128xbf16>
    %175 = vector.shape_cast %174 : vector<1x32x128xbf16> to vector<32x128xbf16>
    %176 = vector.shape_cast %173 : vector<32x128xbf16> to vector<1x32x128xbf16>
    tpu.vector_store %arg8[%c1, %c0_105, %c0_106], %176 {strides = array<i32>} : memref<2x512x128xbf16, #tpu.memory_space<vmem>>, vector<1x32x128xbf16>,
    %177 = vector.extract_strided_slice %166 {offsets = [0, 32], sizes = [16, 32], strides = [1, 1]} : vector<16x1024xbf16> to vector<16x32xbf16>
    %178 = vector.extract_strided_slice %166 {offsets = [0, 544], sizes = [16, 32], strides = [1, 1]} : vector<16x1024xbf16> to vector<16x32xbf16>
    %cst_107 = arith.constant dense<0.000000e+00> : vector<32x32xf32>
    %179 = tpu.matmul %177, %178, %cst_107 {dimension_numbers = #tpu.dot_dimension_numbers<[0], [0], [1], [1], [0, 1, 1, 1], [], []>} : vector<16x32xbf16>, vector<16x32xbf16>, vector<32x32xf32> -> vector<32x32xf32>
    %180 = arith.truncf %179 : vector<32x32xf32> to vector<32x32xbf16>
    %c32_108 = arith.constant 32 : index
    %c0_109 = arith.constant 0 : index
    %181 = vector.load %arg5[%c32_108, %c0_109] : memref<512x128xbf16, #tpu.memory_space<vmem>>, vector<32x128xbf16>
    %cst_110 = arith.constant dense<0.000000e+00> : vector<32x128xf32>
    %182 = tpu.matmul %180, %181, %cst_110 {dimension_numbers = #tpu.dot_dimension_numbers<[1], [0], [0], [1], [0, 0, 1, 1], [], []>} : vector<32x32xbf16>, vector<32x128xbf16>, vector<32x128xf32> -> vector<32x128xf32>
    %183 = arith.truncf %182 : vector<32x128xf32> to vector<32x128xbf16>
    %c1_111 = arith.constant 1 : index
    %c32_112 = arith.constant 32 : index
    %c0_113 = arith.constant 0 : index
    %184 = vector.load %arg8[%c1_111, %c32_112, %c0_113] : memref<2x512x128xbf16, #tpu.memory_space<vmem>>, vector<1x32x128xbf16>
    %185 = vector.shape_cast %184 : vector<1x32x128xbf16> to vector<32x128xbf16>
    %186 = vector.shape_cast %183 : vector<32x128xbf16> to vector<1x32x128xbf16>
    tpu.vector_store %arg8[%c1_111, %c32_112, %c0_113], %186 {strides = array<i32>} : memref<2x512x128xbf16, #tpu.memory_space<vmem>>, vector<1x32x128xbf16>,
    %187 = vector.extract_strided_slice %166 {offsets = [0, 64], sizes = [16, 32], strides = [1, 1]} : vector<16x1024xbf16> to vector<16x32xbf16>
    %188 = vector.extract_strided_slice %166 {offsets = [0, 576], sizes = [16, 32], strides = [1, 1]} : vector<16x1024xbf16> to vector<16x32xbf16>
    %cst_114 = arith.constant dense<0.000000e+00> : vector<32x32xf32>
    %189 = tpu.matmul %187, %188, %cst_114 {dimension_numbers = #tpu.dot_dimension_numbers<[0], [0], [1], [1], [0, 1, 1, 1], [], []>} : vector<16x32xbf16>, vector<16x32xbf16>, vector<32x32xf32> -> vector<32x32xf32>
    %190 = arith.truncf %189 : vector<32x32xf32> to vector<32x32xbf16>
    %c64_115 = arith.constant 64 : index
    %c0_116 = arith.constant 0 : index
    %191 = vector.load %arg5[%c64_115, %c0_116] : memref<512x128xbf16, #tpu.memory_space<vmem>>, vector<32x128xbf16>
    %cst_117 = arith.constant dense<0.000000e+00> : vector<32x128xf32>
    %192 = tpu.matmul %190, %191, %cst_117 {dimension_numbers = #tpu.dot_dimension_numbers<[1], [0], [0], [1], [0, 0, 1, 1], [], []>} : vector<32x32xbf16>, vector<32x128xbf16>, vector<32x128xf32> -> vector<32x128xf32>
    %193 = arith.truncf %192 : vector<32x128xf32> to vector<32x128xbf16>
    %c1_118 = arith.constant 1 : index
    %c64_119 = arith.constant 64 : index
    %c0_120 = arith.constant 0 : index
    %194 = vector.load %arg8[%c1_118, %c64_119, %c0_120] : memref<2x512x128xbf16, #tpu.memory_space<vmem>>, vector<1x32x128xbf16>
    %195 = vector.shape_cast %194 : vector<1x32x128xbf16> to vector<32x128xbf16>
    %196 = vector.shape_cast %193 : vector<32x128xbf16> to vector<1x32x128xbf16>
    tpu.vector_store %arg8[%c1_118, %c64_119, %c0_120], %196 {strides = array<i32>} : memref<2x512x128xbf16, #tpu.memory_space<vmem>>, vector<1x32x128xbf16>,
    %197 = vector.extract_strided_slice %166 {offsets = [0, 96], sizes = [16, 32], strides = [1, 1]} : vector<16x1024xbf16> to vector<16x32xbf16>
    %198 = vector.extract_strided_slice %166 {offsets = [0, 608], sizes = [16, 32], strides = [1, 1]} : vector<16x1024xbf16> to vector<16x32xbf16>
    %cst_121 = arith.constant dense<0.000000e+00> : vector<32x32xf32>
    %199 = tpu.matmul %197, %198, %cst_121 {dimension_numbers = #tpu.dot_dimension_numbers<[0], [0], [1], [1], [0, 1, 1, 1], [], []>} : vector<16x32xbf16>, vector<16x32xbf16>, vector<32x32xf32> -> vector<32x32xf32>
    %200 = arith.truncf %199 : vector<32x32xf32> to vector<32x32xbf16>
    %c96_122 = arith.constant 96 : index
    %c0_123 = arith.constant 0 : index
    %201 = vector.load %arg5[%c96_122, %c0_123] : memref<512x128xbf16, #tpu.memory_space<vmem>>, vector<32x128xbf16>
    %cst_124 = arith.constant dense<0.000000e+00> : vector<32x128xf32>
    %202 = tpu.matmul %200, %201, %cst_124 {dimension_numbers = #tpu.dot_dimension_numbers<[1], [0], [0], [1], [0, 0, 1, 1], [], []>} : vector<32x32xbf16>, vector<32x128xbf16>, vector<32x128xf32> -> vector<32x128xf32>
    %203 = arith.truncf %202 : vector<32x128xf32> to vector<32x128xbf16>
    %c1_125 = arith.constant 1 : index
    %c96_126 = arith.constant 96 : index
    %c0_127 = arith.constant 0 : index
    %204 = vector.load %arg8[%c1_125, %c96_126, %c0_127] : memref<2x512x128xbf16, #tpu.memory_space<vmem>>, vector<1x32x128xbf16>
    %205 = vector.shape_cast %204 : vector<1x32x128xbf16> to vector<32x128xbf16>
    %206 = vector.shape_cast %203 : vector<32x128xbf16> to vector<1x32x128xbf16>
    tpu.vector_store %arg8[%c1_125, %c96_126, %c0_127], %206 {strides = array<i32>} : memref<2x512x128xbf16, #tpu.memory_space<vmem>>, vector<1x32x128xbf16>,
    %207 = vector.extract_strided_slice %166 {offsets = [0, 128], sizes = [16, 32], strides = [1, 1]} : vector<16x1024xbf16> to vector<16x32xbf16>
    %208 = vector.extract_strided_slice %166 {offsets = [0, 640], sizes = [16, 32], strides = [1, 1]} : vector<16x1024xbf16> to vector<16x32xbf16>
    %cst_128 = arith.constant dense<0.000000e+00> : vector<32x32xf32>
    %209 = tpu.matmul %207, %208, %cst_128 {dimension_numbers = #tpu.dot_dimension_numbers<[0], [0], [1], [1], [0, 1, 1, 1], [], []>} : vector<16x32xbf16>, vector<16x32xbf16>, vector<32x32xf32> -> vector<32x32xf32>
    %210 = arith.truncf %209 : vector<32x32xf32> to vector<32x32xbf16>
    %c128_129 = arith.constant 128 : index
    %c0_130 = arith.constant 0 : index
    %211 = vector.load %arg5[%c128_129, %c0_130] : memref<512x128xbf16, #tpu.memory_space<vmem>>, vector<32x128xbf16>
    %cst_131 = arith.constant dense<0.000000e+00> : vector<32x128xf32>
    %212 = tpu.matmul %210, %211, %cst_131 {dimension_numbers = #tpu.dot_dimension_numbers<[1], [0], [0], [1], [0, 0, 1, 1], [], []>} : vector<32x32xbf16>, vector<32x128xbf16>, vector<32x128xf32> -> vector<32x128xf32>
    %213 = arith.truncf %212 : vector<32x128xf32> to vector<32x128xbf16>
    %c1_132 = arith.constant 1 : index
    %c128_133 = arith.constant 128 : index
    %c0_134 = arith.constant 0 : index
    %214 = vector.load %arg8[%c1_132, %c128_133, %c0_134] : memref<2x512x128xbf16, #tpu.memory_space<vmem>>, vector<1x32x128xbf16>
    %215 = vector.shape_cast %214 : vector<1x32x128xbf16> to vector<32x128xbf16>
    %216 = vector.shape_cast %213 : vector<32x128xbf16> to vector<1x32x128xbf16>
    tpu.vector_store %arg8[%c1_132, %c128_133, %c0_134], %216 {strides = array<i32>} : memref<2x512x128xbf16, #tpu.memory_space<vmem>>, vector<1x32x128xbf16>,
    %217 = vector.extract_strided_slice %166 {offsets = [0, 160], sizes = [16, 32], strides = [1, 1]} : vector<16x1024xbf16> to vector<16x32xbf16>
    %218 = vector.extract_strided_slice %166 {offsets = [0, 672], sizes = [16, 32], strides = [1, 1]} : vector<16x1024xbf16> to vector<16x32xbf16>
    %cst_135 = arith.constant dense<0.000000e+00> : vector<32x32xf32>
    %219 = tpu.matmul %217, %218, %cst_135 {dimension_numbers = #tpu.dot_dimension_numbers<[0], [0], [1], [1], [0, 1, 1, 1], [], []>} : vector<16x32xbf16>, vector<16x32xbf16>, vector<32x32xf32> -> vector<32x32xf32>
    %220 = arith.truncf %219 : vector<32x32xf32> to vector<32x32xbf16>
    %c160_136 = arith.constant 160 : index
    %c0_137 = arith.constant 0 : index
    %221 = vector.load %arg5[%c160_136, %c0_137] : memref<512x128xbf16, #tpu.memory_space<vmem>>, vector<32x128xbf16>
    %cst_138 = arith.constant dense<0.000000e+00> : vector<32x128xf32>
    %222 = tpu.matmul %220, %221, %cst_138 {dimension_numbers = #tpu.dot_dimension_numbers<[1], [0], [0], [1], [0, 0, 1, 1], [], []>} : vector<32x32xbf16>, vector<32x128xbf16>, vector<32x128xf32> -> vector<32x128xf32>
    %223 = arith.truncf %222 : vector<32x128xf32> to vector<32x128xbf16>
    %c1_139 = arith.constant 1 : index
    %c160_140 = arith.constant 160 : index
    %c0_141 = arith.constant 0 : index
    %224 = vector.load %arg8[%c1_139, %c160_140, %c0_141] : memref<2x512x128xbf16, #tpu.memory_space<vmem>>, vector<1x32x128xbf16>
    %225 = vector.shape_cast %224 : vector<1x32x128xbf16> to vector<32x128xbf16>
    %226 = vector.shape_cast %223 : vector<32x128xbf16> to vector<1x32x128xbf16>
    tpu.vector_store %arg8[%c1_139, %c160_140, %c0_141], %226 {strides = array<i32>} : memref<2x512x128xbf16, #tpu.memory_space<vmem>>, vector<1x32x128xbf16>,
    %227 = vector.extract_strided_slice %166 {offsets = [0, 192], sizes = [16, 32], strides = [1, 1]} : vector<16x1024xbf16> to vector<16x32xbf16>
    %228 = vector.extract_strided_slice %166 {offsets = [0, 704], sizes = [16, 32], strides = [1, 1]} : vector<16x1024xbf16> to vector<16x32xbf16>
    %cst_142 = arith.constant dense<0.000000e+00> : vector<32x32xf32>
    %229 = tpu.matmul %227, %228, %cst_142 {dimension_numbers = #tpu.dot_dimension_numbers<[0], [0], [1], [1], [0, 1, 1, 1], [], []>} : vector<16x32xbf16>, vector<16x32xbf16>, vector<32x32xf32> -> vector<32x32xf32>
    %230 = arith.truncf %229 : vector<32x32xf32> to vector<32x32xbf16>
    %c192_143 = arith.constant 192 : index
    %c0_144 = arith.constant 0 : index
    %231 = vector.load %arg5[%c192_143, %c0_144] : memref<512x128xbf16, #tpu.memory_space<vmem>>, vector<32x128xbf16>
    %cst_145 = arith.constant dense<0.000000e+00> : vector<32x128xf32>
    %232 = tpu.matmul %230, %231, %cst_145 {dimension_numbers = #tpu.dot_dimension_numbers<[1], [0], [0], [1], [0, 0, 1, 1], [], []>} : vector<32x32xbf16>, vector<32x128xbf16>, vector<32x128xf32> -> vector<32x128xf32>
    %233 = arith.truncf %232 : vector<32x128xf32> to vector<32x128xbf16>
    %c1_146 = arith.constant 1 : index
    %c192_147 = arith.constant 192 : index
    %c0_148 = arith.constant 0 : index
    %234 = vector.load %arg8[%c1_146, %c192_147, %c0_148] : memref<2x512x128xbf16, #tpu.memory_space<vmem>>, vector<1x32x128xbf16>
    %235 = vector.shape_cast %234 : vector<1x32x128xbf16> to vector<32x128xbf16>
    %236 = vector.shape_cast %233 : vector<32x128xbf16> to vector<1x32x128xbf16>
    tpu.vector_store %arg8[%c1_146, %c192_147, %c0_148], %236 {strides = array<i32>} : memref<2x512x128xbf16, #tpu.memory_space<vmem>>, vector<1x32x128xbf16>,
    %237 = vector.extract_strided_slice %166 {offsets = [0, 224], sizes = [16, 32], strides = [1, 1]} : vector<16x1024xbf16> to vector<16x32xbf16>
    %238 = vector.extract_strided_slice %166 {offsets = [0, 736], sizes = [16, 32], strides = [1, 1]} : vector<16x1024xbf16> to vector<16x32xbf16>
    %cst_149 = arith.constant dense<0.000000e+00> : vector<32x32xf32>
    %239 = tpu.matmul %237, %238, %cst_149 {dimension_numbers = #tpu.dot_dimension_numbers<[0], [0], [1], [1], [0, 1, 1, 1], [], []>} : vector<16x32xbf16>, vector<16x32xbf16>, vector<32x32xf32> -> vector<32x32xf32>
    %240 = arith.truncf %239 : vector<32x32xf32> to vector<32x32xbf16>
    %c224_150 = arith.constant 224 : index
    %c0_151 = arith.constant 0 : index
    %241 = vector.load %arg5[%c224_150, %c0_151] : memref<512x128xbf16, #tpu.memory_space<vmem>>, vector<32x128xbf16>
    %cst_152 = arith.constant dense<0.000000e+00> : vector<32x128xf32>
    %242 = tpu.matmul %240, %241, %cst_152 {dimension_numbers = #tpu.dot_dimension_numbers<[1], [0], [0], [1], [0, 0, 1, 1], [], []>} : vector<32x32xbf16>, vector<32x128xbf16>, vector<32x128xf32> -> vector<32x128xf32>
    %243 = arith.truncf %242 : vector<32x128xf32> to vector<32x128xbf16>
    %c1_153 = arith.constant 1 : index
    %c224_154 = arith.constant 224 : index
    %c0_155 = arith.constant 0 : index
    %244 = vector.load %arg8[%c1_153, %c224_154, %c0_155] : memref<2x512x128xbf16, #tpu.memory_space<vmem>>, vector<1x32x128xbf16>
    %245 = vector.shape_cast %244 : vector<1x32x128xbf16> to vector<32x128xbf16>
    %246 = vector.shape_cast %243 : vector<32x128xbf16> to vector<1x32x128xbf16>
    tpu.vector_store %arg8[%c1_153, %c224_154, %c0_155], %246 {strides = array<i32>} : memref<2x512x128xbf16, #tpu.memory_space<vmem>>, vector<1x32x128xbf16>,
    %247 = vector.extract_strided_slice %166 {offsets = [0, 256], sizes = [16, 32], strides = [1, 1]} : vector<16x1024xbf16> to vector<16x32xbf16>
    %248 = vector.extract_strided_slice %166 {offsets = [0, 768], sizes = [16, 32], strides = [1, 1]} : vector<16x1024xbf16> to vector<16x32xbf16>
    %cst_156 = arith.constant dense<0.000000e+00> : vector<32x32xf32>
    %249 = tpu.matmul %247, %248, %cst_156 {dimension_numbers = #tpu.dot_dimension_numbers<[0], [0], [1], [1], [0, 1, 1, 1], [], []>} : vector<16x32xbf16>, vector<16x32xbf16>, vector<32x32xf32> -> vector<32x32xf32>
    %250 = arith.truncf %249 : vector<32x32xf32> to vector<32x32xbf16>
    %c256_157 = arith.constant 256 : index
    %c0_158 = arith.constant 0 : index
    %251 = vector.load %arg5[%c256_157, %c0_158] : memref<512x128xbf16, #tpu.memory_space<vmem>>, vector<32x128xbf16>
    %cst_159 = arith.constant dense<0.000000e+00> : vector<32x128xf32>
    %252 = tpu.matmul %250, %251, %cst_159 {dimension_numbers = #tpu.dot_dimension_numbers<[1], [0], [0], [1], [0, 0, 1, 1], [], []>} : vector<32x32xbf16>, vector<32x128xbf16>, vector<32x128xf32> -> vector<32x128xf32>
    %253 = arith.truncf %252 : vector<32x128xf32> to vector<32x128xbf16>
    %c1_160 = arith.constant 1 : index
    %c256_161 = arith.constant 256 : index
    %c0_162 = arith.constant 0 : index
    %254 = vector.load %arg8[%c1_160, %c256_161, %c0_162] : memref<2x512x128xbf16, #tpu.memory_space<vmem>>, vector<1x32x128xbf16>
    %255 = vector.shape_cast %254 : vector<1x32x128xbf16> to vector<32x128xbf16>
    %256 = vector.shape_cast %253 : vector<32x128xbf16> to vector<1x32x128xbf16>
    tpu.vector_store %arg8[%c1_160, %c256_161, %c0_162], %256 {strides = array<i32>} : memref<2x512x128xbf16, #tpu.memory_space<vmem>>, vector<1x32x128xbf16>,
    %257 = vector.extract_strided_slice %166 {offsets = [0, 288], sizes = [16, 32], strides = [1, 1]} : vector<16x1024xbf16> to vector<16x32xbf16>
    %258 = vector.extract_strided_slice %166 {offsets = [0, 800], sizes = [16, 32], strides = [1, 1]} : vector<16x1024xbf16> to vector<16x32xbf16>
    %cst_163 = arith.constant dense<0.000000e+00> : vector<32x32xf32>
    %259 = tpu.matmul %257, %258, %cst_163 {dimension_numbers = #tpu.dot_dimension_numbers<[0], [0], [1], [1], [0, 1, 1, 1], [], []>} : vector<16x32xbf16>, vector<16x32xbf16>, vector<32x32xf32> -> vector<32x32xf32>
    %260 = arith.truncf %259 : vector<32x32xf32> to vector<32x32xbf16>
    %c288_164 = arith.constant 288 : index
    %c0_165 = arith.constant 0 : index
    %261 = vector.load %arg5[%c288_164, %c0_165] : memref<512x128xbf16, #tpu.memory_space<vmem>>, vector<32x128xbf16>
    %cst_166 = arith.constant dense<0.000000e+00> : vector<32x128xf32>
    %262 = tpu.matmul %260, %261, %cst_166 {dimension_numbers = #tpu.dot_dimension_numbers<[1], [0], [0], [1], [0, 0, 1, 1], [], []>} : vector<32x32xbf16>, vector<32x128xbf16>, vector<32x128xf32> -> vector<32x128xf32>
    %263 = arith.truncf %262 : vector<32x128xf32> to vector<32x128xbf16>
    %c1_167 = arith.constant 1 : index
    %c288_168 = arith.constant 288 : index
    %c0_169 = arith.constant 0 : index
    %264 = vector.load %arg8[%c1_167, %c288_168, %c0_169] : memref<2x512x128xbf16, #tpu.memory_space<vmem>>, vector<1x32x128xbf16>
    %265 = vector.shape_cast %264 : vector<1x32x128xbf16> to vector<32x128xbf16>
    %266 = vector.shape_cast %263 : vector<32x128xbf16> to vector<1x32x128xbf16>
    tpu.vector_store %arg8[%c1_167, %c288_168, %c0_169], %266 {strides = array<i32>} : memref<2x512x128xbf16, #tpu.memory_space<vmem>>, vector<1x32x128xbf16>,
    %267 = vector.extract_strided_slice %166 {offsets = [0, 320], sizes = [16, 32], strides = [1, 1]} : vector<16x1024xbf16> to vector<16x32xbf16>
    %268 = vector.extract_strided_slice %166 {offsets = [0, 832], sizes = [16, 32], strides = [1, 1]} : vector<16x1024xbf16> to vector<16x32xbf16>
    %cst_170 = arith.constant dense<0.000000e+00> : vector<32x32xf32>
    %269 = tpu.matmul %267, %268, %cst_170 {dimension_numbers = #tpu.dot_dimension_numbers<[0], [0], [1], [1], [0, 1, 1, 1], [], []>} : vector<16x32xbf16>, vector<16x32xbf16>, vector<32x32xf32> -> vector<32x32xf32>
    %270 = arith.truncf %269 : vector<32x32xf32> to vector<32x32xbf16>
    %c320_171 = arith.constant 320 : index
    %c0_172 = arith.constant 0 : index
    %271 = vector.load %arg5[%c320_171, %c0_172] : memref<512x128xbf16, #tpu.memory_space<vmem>>, vector<32x128xbf16>
    %cst_173 = arith.constant dense<0.000000e+00> : vector<32x128xf32>
    %272 = tpu.matmul %270, %271, %cst_173 {dimension_numbers = #tpu.dot_dimension_numbers<[1], [0], [0], [1], [0, 0, 1, 1], [], []>} : vector<32x32xbf16>, vector<32x128xbf16>, vector<32x128xf32> -> vector<32x128xf32>
    %273 = arith.truncf %272 : vector<32x128xf32> to vector<32x128xbf16>
    %c1_174 = arith.constant 1 : index
    %c320_175 = arith.constant 320 : index
    %c0_176 = arith.constant 0 : index
    %274 = vector.load %arg8[%c1_174, %c320_175, %c0_176] : memref<2x512x128xbf16, #tpu.memory_space<vmem>>, vector<1x32x128xbf16>
    %275 = vector.shape_cast %274 : vector<1x32x128xbf16> to vector<32x128xbf16>
    %276 = vector.shape_cast %273 : vector<32x128xbf16> to vector<1x32x128xbf16>
    tpu.vector_store %arg8[%c1_174, %c320_175, %c0_176], %276 {strides = array<i32>} : memref<2x512x128xbf16, #tpu.memory_space<vmem>>, vector<1x32x128xbf16>,
    %277 = vector.extract_strided_slice %166 {offsets = [0, 352], sizes = [16, 32], strides = [1, 1]} : vector<16x1024xbf16> to vector<16x32xbf16>
    %278 = vector.extract_strided_slice %166 {offsets = [0, 864], sizes = [16, 32], strides = [1, 1]} : vector<16x1024xbf16> to vector<16x32xbf16>
    %cst_177 = arith.constant dense<0.000000e+00> : vector<32x32xf32>
    %279 = tpu.matmul %277, %278, %cst_177 {dimension_numbers = #tpu.dot_dimension_numbers<[0], [0], [1], [1], [0, 1, 1, 1], [], []>} : vector<16x32xbf16>, vector<16x32xbf16>, vector<32x32xf32> -> vector<32x32xf32>
    %280 = arith.truncf %279 : vector<32x32xf32> to vector<32x32xbf16>
    %c352_178 = arith.constant 352 : index
    %c0_179 = arith.constant 0 : index
    %281 = vector.load %arg5[%c352_178, %c0_179] : memref<512x128xbf16, #tpu.memory_space<vmem>>, vector<32x128xbf16>
    %cst_180 = arith.constant dense<0.000000e+00> : vector<32x128xf32>
    %282 = tpu.matmul %280, %281, %cst_180 {dimension_numbers = #tpu.dot_dimension_numbers<[1], [0], [0], [1], [0, 0, 1, 1], [], []>} : vector<32x32xbf16>, vector<32x128xbf16>, vector<32x128xf32> -> vector<32x128xf32>
    %283 = arith.truncf %282 : vector<32x128xf32> to vector<32x128xbf16>
    %c1_181 = arith.constant 1 : index
    %c352_182 = arith.constant 352 : index
    %c0_183 = arith.constant 0 : index
    %284 = vector.load %arg8[%c1_181, %c352_182, %c0_183] : memref<2x512x128xbf16, #tpu.memory_space<vmem>>, vector<1x32x128xbf16>
    %285 = vector.shape_cast %284 : vector<1x32x128xbf16> to vector<32x128xbf16>
    %286 = vector.shape_cast %283 : vector<32x128xbf16> to vector<1x32x128xbf16>
    tpu.vector_store %arg8[%c1_181, %c352_182, %c0_183], %286 {strides = array<i32>} : memref<2x512x128xbf16, #tpu.memory_space<vmem>>, vector<1x32x128xbf16>,
    %287 = vector.extract_strided_slice %166 {offsets = [0, 384], sizes = [16, 32], strides = [1, 1]} : vector<16x1024xbf16> to vector<16x32xbf16>
    %288 = vector.extract_strided_slice %166 {offsets = [0, 896], sizes = [16, 32], strides = [1, 1]} : vector<16x1024xbf16> to vector<16x32xbf16>
    %cst_184 = arith.constant dense<0.000000e+00> : vector<32x32xf32>
    %289 = tpu.matmul %287, %288, %cst_184 {dimension_numbers = #tpu.dot_dimension_numbers<[0], [0], [1], [1], [0, 1, 1, 1], [], []>} : vector<16x32xbf16>, vector<16x32xbf16>, vector<32x32xf32> -> vector<32x32xf32>
    %290 = arith.truncf %289 : vector<32x32xf32> to vector<32x32xbf16>
    %c384_185 = arith.constant 384 : index
    %c0_186 = arith.constant 0 : index
    %291 = vector.load %arg5[%c384_185, %c0_186] : memref<512x128xbf16, #tpu.memory_space<vmem>>, vector<32x128xbf16>
    %cst_187 = arith.constant dense<0.000000e+00> : vector<32x128xf32>
    %292 = tpu.matmul %290, %291, %cst_187 {dimension_numbers = #tpu.dot_dimension_numbers<[1], [0], [0], [1], [0, 0, 1, 1], [], []>} : vector<32x32xbf16>, vector<32x128xbf16>, vector<32x128xf32> -> vector<32x128xf32>
    %293 = arith.truncf %292 : vector<32x128xf32> to vector<32x128xbf16>
    %c1_188 = arith.constant 1 : index
    %c384_189 = arith.constant 384 : index
    %c0_190 = arith.constant 0 : index
    %294 = vector.load %arg8[%c1_188, %c384_189, %c0_190] : memref<2x512x128xbf16, #tpu.memory_space<vmem>>, vector<1x32x128xbf16>
    %295 = vector.shape_cast %294 : vector<1x32x128xbf16> to vector<32x128xbf16>
    %296 = vector.shape_cast %293 : vector<32x128xbf16> to vector<1x32x128xbf16>
    tpu.vector_store %arg8[%c1_188, %c384_189, %c0_190], %296 {strides = array<i32>} : memref<2x512x128xbf16, #tpu.memory_space<vmem>>, vector<1x32x128xbf16>,
    %297 = vector.extract_strided_slice %166 {offsets = [0, 416], sizes = [16, 32], strides = [1, 1]} : vector<16x1024xbf16> to vector<16x32xbf16>
    %298 = vector.extract_strided_slice %166 {offsets = [0, 928], sizes = [16, 32], strides = [1, 1]} : vector<16x1024xbf16> to vector<16x32xbf16>
    %cst_191 = arith.constant dense<0.000000e+00> : vector<32x32xf32>
    %299 = tpu.matmul %297, %298, %cst_191 {dimension_numbers = #tpu.dot_dimension_numbers<[0], [0], [1], [1], [0, 1, 1, 1], [], []>} : vector<16x32xbf16>, vector<16x32xbf16>, vector<32x32xf32> -> vector<32x32xf32>
    %300 = arith.truncf %299 : vector<32x32xf32> to vector<32x32xbf16>
    %c416_192 = arith.constant 416 : index
    %c0_193 = arith.constant 0 : index
    %301 = vector.load %arg5[%c416_192, %c0_193] : memref<512x128xbf16, #tpu.memory_space<vmem>>, vector<32x128xbf16>
    %cst_194 = arith.constant dense<0.000000e+00> : vector<32x128xf32>
    %302 = tpu.matmul %300, %301, %cst_194 {dimension_numbers = #tpu.dot_dimension_numbers<[1], [0], [0], [1], [0, 0, 1, 1], [], []>} : vector<32x32xbf16>, vector<32x128xbf16>, vector<32x128xf32> -> vector<32x128xf32>
    %303 = arith.truncf %302 : vector<32x128xf32> to vector<32x128xbf16>
    %c1_195 = arith.constant 1 : index
    %c416_196 = arith.constant 416 : index
    %c0_197 = arith.constant 0 : index
    %304 = vector.load %arg8[%c1_195, %c416_196, %c0_197] : memref<2x512x128xbf16, #tpu.memory_space<vmem>>, vector<1x32x128xbf16>
    %305 = vector.shape_cast %304 : vector<1x32x128xbf16> to vector<32x128xbf16>
    %306 = vector.shape_cast %303 : vector<32x128xbf16> to vector<1x32x128xbf16>
    tpu.vector_store %arg8[%c1_195, %c416_196, %c0_197], %306 {strides = array<i32>} : memref<2x512x128xbf16, #tpu.memory_space<vmem>>, vector<1x32x128xbf16>,
    %307 = vector.extract_strided_slice %166 {offsets = [0, 448], sizes = [16, 32], strides = [1, 1]} : vector<16x1024xbf16> to vector<16x32xbf16>
    %308 = vector.extract_strided_slice %166 {offsets = [0, 960], sizes = [16, 32], strides = [1, 1]} : vector<16x1024xbf16> to vector<16x32xbf16>
    %cst_198 = arith.constant dense<0.000000e+00> : vector<32x32xf32>
    %309 = tpu.matmul %307, %308, %cst_198 {dimension_numbers = #tpu.dot_dimension_numbers<[0], [0], [1], [1], [0, 1, 1, 1], [], []>} : vector<16x32xbf16>, vector<16x32xbf16>, vector<32x32xf32> -> vector<32x32xf32>
    %310 = arith.truncf %309 : vector<32x32xf32> to vector<32x32xbf16>
    %c448_199 = arith.constant 448 : index
    %c0_200 = arith.constant 0 : index
    %311 = vector.load %arg5[%c448_199, %c0_200] : memref<512x128xbf16, #tpu.memory_space<vmem>>, vector<32x128xbf16>
    %cst_201 = arith.constant dense<0.000000e+00> : vector<32x128xf32>
    %312 = tpu.matmul %310, %311, %cst_201 {dimension_numbers = #tpu.dot_dimension_numbers<[1], [0], [0], [1], [0, 0, 1, 1], [], []>} : vector<32x32xbf16>, vector<32x128xbf16>, vector<32x128xf32> -> vector<32x128xf32>
    %313 = arith.truncf %312 : vector<32x128xf32> to vector<32x128xbf16>
    %c1_202 = arith.constant 1 : index
    %c448_203 = arith.constant 448 : index
    %c0_204 = arith.constant 0 : index
    %314 = vector.load %arg8[%c1_202, %c448_203, %c0_204] : memref<2x512x128xbf16, #tpu.memory_space<vmem>>, vector<1x32x128xbf16>
    %315 = vector.shape_cast %314 : vector<1x32x128xbf16> to vector<32x128xbf16>
    %316 = vector.shape_cast %313 : vector<32x128xbf16> to vector<1x32x128xbf16>
    tpu.vector_store %arg8[%c1_202, %c448_203, %c0_204], %316 {strides = array<i32>} : memref<2x512x128xbf16, #tpu.memory_space<vmem>>, vector<1x32x128xbf16>,
    %317 = vector.extract_strided_slice %166 {offsets = [0, 480], sizes = [16, 32], strides = [1, 1]} : vector<16x1024xbf16> to vector<16x32xbf16>
    %318 = vector.extract_strided_slice %166 {offsets = [0, 992], sizes = [16, 32], strides = [1, 1]} : vector<16x1024xbf16> to vector<16x32xbf16>
    %cst_205 = arith.constant dense<0.000000e+00> : vector<32x32xf32>
    %319 = tpu.matmul %317, %318, %cst_205 {dimension_numbers = #tpu.dot_dimension_numbers<[0], [0], [1], [1], [0, 1, 1, 1], [], []>} : vector<16x32xbf16>, vector<16x32xbf16>, vector<32x32xf32> -> vector<32x32xf32>
    %320 = arith.truncf %319 : vector<32x32xf32> to vector<32x32xbf16>
    %c480_206 = arith.constant 480 : index
    %c0_207 = arith.constant 0 : index
    %321 = vector.load %arg5[%c480_206, %c0_207] : memref<512x128xbf16, #tpu.memory_space<vmem>>, vector<32x128xbf16>
    %cst_208 = arith.constant dense<0.000000e+00> : vector<32x128xf32>
    %322 = tpu.matmul %320, %321, %cst_208 {dimension_numbers = #tpu.dot_dimension_numbers<[1], [0], [0], [1], [0, 0, 1, 1], [], []>} : vector<32x32xbf16>, vector<32x128xbf16>, vector<32x128xf32> -> vector<32x128xf32>
    %323 = arith.truncf %322 : vector<32x128xf32> to vector<32x128xbf16>
    %c1_209 = arith.constant 1 : index
    %c480_210 = arith.constant 480 : index
    %c0_211 = arith.constant 0 : index
    %324 = vector.load %arg8[%c1_209, %c480_210, %c0_211] : memref<2x512x128xbf16, #tpu.memory_space<vmem>>, vector<1x32x128xbf16>
    %325 = vector.shape_cast %324 : vector<1x32x128xbf16> to vector<32x128xbf16>
    %326 = vector.shape_cast %323 : vector<32x128xbf16> to vector<1x32x128xbf16>
    tpu.vector_store %arg8[%c1_209, %c480_210, %c0_211], %326 {strides = array<i32>} : memref<2x512x128xbf16, #tpu.memory_space<vmem>>, vector<1x32x128xbf16>,
    %c0_212 = arith.constant 0 : index
    %c0_213 = arith.constant 0 : index
    %c0_214 = arith.constant 0 : index
    %327 = vector.load %arg1[%c0_212, %c0_213, %c0_214] : memref<2x32x128xbf16, #tpu.memory_space<vmem>>, vector<2x32x128xbf16>
    %328 = vector.shape_cast %327 : vector<2x32x128xbf16> to vector<64x128xbf16>
    %c0_215 = arith.constant 0 : index
    %c0_216 = arith.constant 0 : index
    %329 = vector.load %arg3[%c0_215, %c0_216] : memref<128x512xbf16, #tpu.memory_space<vmem>>, vector<128x512xbf16>
    %cst_217 = arith.constant dense<0.000000e+00> : vector<64x512xf32>
    %330 = tpu.matmul %328, %329, %cst_217 {dimension_numbers = #tpu.dot_dimension_numbers<[1], [0], [0], [1], [0, 0, 1, 1], [], []>} : vector<64x128xbf16>, vector<128x512xbf16>, vector<64x512xf32> -> vector<64x512xf32>
    %331 = arith.truncf %330 : vector<64x512xf32> to vector<64x512xbf16>
    %c0_218 = arith.constant 0 : index
    %c0_219 = arith.constant 0 : index
    %332 = vector.load %arg6[%c0_218, %c0_219] : memref<1x128xf32, #tpu.memory_space<vmem>>, vector<1x128xf32>
    %333 = vector.extract_strided_slice %331 {offsets = [0, 0], sizes = [32, 512], strides = [1, 1]} : vector<64x512xbf16> to vector<32x512xbf16>
    %c0_220 = arith.constant 0 : index
    %c0_221 = arith.constant 0 : index
    %c0_222 = arith.constant 0 : index
    %334 = vector.load %arg8[%c0_220, %c0_221, %c0_222] : memref<2x512x128xbf16, #tpu.memory_space<vmem>>, vector<1x512x128xbf16>
    %335 = vector.shape_cast %334 : vector<1x512x128xbf16> to vector<512x128xbf16>
    %cst_223 = arith.constant dense<0.000000e+00> : vector<32x128xf32>
    %336 = tpu.matmul %333, %335, %cst_223 {dimension_numbers = #tpu.dot_dimension_numbers<[1], [0], [0], [1], [0, 0, 1, 1], [], []>} : vector<32x512xbf16>, vector<512x128xbf16>, vector<32x128xf32> -> vector<32x128xf32>
    %cst_224 = arith.constant 0.0883883461 : f32
    %337 = vector.broadcast %cst_224 : f32 to vector<32x128xf32>
    %338 = arith.mulf %336, %337 : vector<32x128xf32>
    %339 = vector.broadcast %332 : vector<1x128xf32> to vector<32x128xf32>
    %340 = arith.addf %338, %339 : vector<32x128xf32>
    %c0_225 = arith.constant 0 : index
    %c0_226 = arith.constant 0 : index
    %c0_227 = arith.constant 0 : index
    %341 = vector.load %arg7[%c0_225, %c0_226, %c0_227] : memref<2x32x128xf32, #tpu.memory_space<vmem>>, vector<1x32x128xf32>
    %342 = vector.shape_cast %341 : vector<1x32x128xf32> to vector<32x128xf32>
    %343 = vector.shape_cast %340 : vector<32x128xf32> to vector<1x32x128xf32>
    tpu.vector_store %arg7[%c0_225, %c0_226, %c0_227], %343 {strides = array<i32>} : memref<2x32x128xf32, #tpu.memory_space<vmem>>, vector<1x32x128xf32>,
    %344 = vector.extract_strided_slice %331 {offsets = [32, 0], sizes = [32, 512], strides = [1, 1]} : vector<64x512xbf16> to vector<32x512xbf16>
    %c1_228 = arith.constant 1 : index
    %c0_229 = arith.constant 0 : index
    %c0_230 = arith.constant 0 : index
    %345 = vector.load %arg8[%c1_228, %c0_229, %c0_230] : memref<2x512x128xbf16, #tpu.memory_space<vmem>>, vector<1x512x128xbf16>
    %346 = vector.shape_cast %345 : vector<1x512x128xbf16> to vector<512x128xbf16>
    %cst_231 = arith.constant dense<0.000000e+00> : vector<32x128xf32>
    %347 = tpu.matmul %344, %346, %cst_231 {dimension_numbers = #tpu.dot_dimension_numbers<[1], [0], [0], [1], [0, 0, 1, 1], [], []>} : vector<32x512xbf16>, vector<512x128xbf16>, vector<32x128xf32> -> vector<32x128xf32>
    %cst_232 = arith.constant 0.0883883461 : f32
    %348 = vector.broadcast %cst_232 : f32 to vector<32x128xf32>
    %349 = arith.mulf %347, %348 : vector<32x128xf32>
    %350 = vector.broadcast %332 : vector<1x128xf32> to vector<32x128xf32>
    %351 = arith.addf %349, %350 : vector<32x128xf32>
    %c1_233 = arith.constant 1 : index
    %c0_234 = arith.constant 0 : index
    %c0_235 = arith.constant 0 : index
    %352 = vector.load %arg7[%c1_233, %c0_234, %c0_235] : memref<2x32x128xf32, #tpu.memory_space<vmem>>, vector<1x32x128xf32>
    %353 = vector.shape_cast %352 : vector<1x32x128xf32> to vector<32x128xf32>
    %354 = vector.shape_cast %351 : vector<32x128xf32> to vector<1x32x128xf32>
    tpu.vector_store %arg7[%c1_233, %c0_234, %c0_235], %354 {strides = array<i32>} : memref<2x32x128xf32, #tpu.memory_space<vmem>>, vector<1x32x128xf32>,
    return
  }
  func.func @transform_0(%arg0: i32) -> (i32, i32, i32) {
    %c0_i32 = arith.constant 0 : i32
    %c0_i32_0 = arith.constant 0 : i32
    %c0_i32_1 = arith.constant 0 : i32
    return %arg0, %c0_i32, %c0_i32_0 : i32, i32, i32
  }
  func.func @transform_1(%arg0: i32) -> (i32, i32, i32) {
    %c0_i32 = arith.constant 0 : i32
    %c0_i32_0 = arith.constant 0 : i32
    %c0_i32_1 = arith.constant 0 : i32
    return %arg0, %c0_i32, %c0_i32_0 : i32, i32, i32
  }
  func.func @transform_2(%arg0: i32) -> (i32, i32) {
    %c0_i32 = arith.constant 0 : i32
    %c0_i32_0 = arith.constant 0 : i32
    %c0_i32_1 = arith.constant 0 : i32
    return %c0_i32, %c0_i32_0 : i32, i32
  }
  func.func @transform_3(%arg0: i32) -> (i32, i32) {
    %c0_i32 = arith.constant 0 : i32
    %c0_i32_0 = arith.constant 0 : i32
    %c0_i32_1 = arith.constant 0 : i32
    return %c0_i32, %c0_i32_0 : i32, i32
  }
  func.func @transform_4(%arg0: i32) -> (i32, i32) {
    %c0_i32 = arith.constant 0 : i32
    %c0_i32_0 = arith.constant 0 : i32
    %c0_i32_1 = arith.constant 0 : i32
    return %c0_i32, %c0_i32_0 : i32, i32
  }
  func.func @transform_5(%arg0: i32) -> (i32, i32) {
    %c0_i32 = arith.constant 0 : i32
    %c0_i32_0 = arith.constant 0 : i32
    %c0_i32_1 = arith.constant 0 : i32
    return %c0_i32, %c0_i32_0 : i32, i32
  }
  func.func @transform_6(%arg0: i32) -> (i32, i32, i32) {
    %c0_i32 = arith.constant 0 : i32
    %c0_i32_0 = arith.constant 0 : i32
    %c0_i32_1 = arith.constant 0 : i32
    return %arg0, %c0_i32, %c0_i32_0 : i32, i32, i32
  }
}

</mosaic_0001>

<bundles_post_ra>
// kernel: transformer_decoder_forward.1
= control target key start
LH: loop header
LB: loop body
LE: loop exit
PB: predicated region body
PF: predicated region fallthrough
CT: control target
= control target key end

     0   :  { %s7863_s0 = inlined_call_operand.vmem [shape: bf16[2,32,128], index: 0, kind: input, shape index: {}]   ;;  %s7864_s1 = inlined_call_operand.vmem [shape: bf16[2,16,128], index: 1, kind: input, shape index: {}]   ;;  %s7865_s2 = inlined_call_operand.vmem [shape: bf16[128,512], index: 2, kind: input, shape index: {}]   ;;  %s7866_s3 = inlined_call_operand.vmem [shape: bf16[128,1024], index: 3, kind: input, shape index: {}]   ;;  %s7867_s4 = inlined_call_operand.vmem [shape: bf16[512,128], index: 4, kind: input, shape index: {}]   ;;  %s7868_s5 = inlined_call_operand.vmem [shape: f32[1,128], index: 5, kind: input, shape index: {}]   ;;  %s7869_s6 = inlined_call_operand.hbm [shape: f32[2,32,128], index: 6, kind: output, shape index: {}]  }
   0x1   :  { %v5145_v0 = vld [vmem:[%s7866_s3 + $0x1c0] sm:$0xf]  ;;  %v6017_v2 = vld [vmem:[%s7866_s3 + $0x1c4] sm:$0xf]  ;;  %v5153_v16 = vld [vmem:[%s7866_s3 + $0x1c8] sm:$0xf] }
   0x2   :  { %v6021_v1 = vld [vmem:[%s7866_s3 + $0x1dc] sm:$0xf0]  ;;  %v5147_v4 = vld [vmem:[%s7866_s3 + $0x1e0] sm:$0xf0]  ;;  %v6022_v18 = vld [vmem:[%s7866_s3 + $0x1e4] sm:$0xf0] }
   0x3   :  { %v5146_v3 = vor.u32 %v6021_v1, %v5145_v0  ;;  %v5113_v5 = vld [vmem:[%s7866_s3 + $0x180] sm:$0xf]  ;;  %v5150_v7 = vor.u32 %v6017_v2, %v5147_v4  ;;  %v6009_v8 = vld [vmem:[%s7866_s3 + $0x184] sm:$0xf]  ;;  %v6018_v19 = vld [vmem:[%s7866_s3 + $0x1cc] sm:$0xf]  ;;  %v5154_v25 = vor.u32 %v6022_v18, %v5153_v16 }
   0x4   :  { %v6013_v6 = vld [vmem:[%s7866_s3 + $0x19c] sm:$0xf0]  ;;  %v5115_v9 = vld [vmem:[%s7866_s3 + $0x1a0] sm:$0xf0]  ;;  %v5155_v20 = vld [vmem:[%s7866_s3 + $0x1e8] sm:$0xf0] }
   0x5   :  { %425 = vmatpush.bf16.msra.mxu0 %v5146_v3  ;;  %v5114_v10 = vor.u32 %v6013_v6, %v5113_v5  ;;  %444 = vmatpush.bf16.msra.mxu1 %v5150_v7  ;;  %v5118_v11 = vor.u32 %v6009_v8, %v5115_v9  ;;  %v5081_v12 = vld [vmem:[%s7866_s3 + $0x140] sm:$0xf]  ;;  %v6001_v14 = vld [vmem:[%s7866_s3 + $0x144] sm:$0xf]  ;;  %v5158_v26 = vor.u32 %v6018_v19, %v5155_v20  ;;  %v5121_v28 = vld [vmem:[%s7866_s3 + $0x188] sm:$0xf] }
   0x6   :  { %v6005_v13 = vld [vmem:[%s7866_s3 + $0x15c] sm:$0xf0]  ;;  %v5083_v15 = vld [vmem:[%s7866_s3 + $0x160] sm:$0xf0]  ;;  %v6014_v29 = vld [vmem:[%s7866_s3 + $0x1a4] sm:$0xf0]  ;;  %463 = vmatpush.bf16.msra.mxu2 %v5154_v25 }
   0x7   :  { %v5082_v17 = vor.u32 %v6005_v13, %v5081_v12  ;;  %v5086_v21 = vor.u32 %v6001_v14, %v5083_v15  ;;  %v5049_v22 = vld [vmem:[%s7866_s3 + $0x100] sm:$0xf]  ;;  %v5993_v24 = vld [vmem:[%s7866_s3 + $0x104] sm:$0xf]  ;;  %482 = vmatpush.bf16.msra.mxu3 %v5158_v26  ;;  %v5122_v30 = vor.u32 %v6014_v29, %v5121_v28  ;;  %v6010_v31 = vld [vmem:[%s7866_s3 + $0x18c] sm:$0xf] }
   0x8   :  { %v5997_v23 = vld [vmem:[%s7866_s3 + $0x11c] sm:$0xf0]  ;;  %v5051_v27 = vld [vmem:[%s7866_s3 + $0x120] sm:$0xf0]  ;;  %v5123_v32 = vld [vmem:[%s7866_s3 + $0x1a8] sm:$0xf0] }
   0x9   :  { %426 = vmatpush.bf16.msra.mxu0 %v5114_v10  ;;  %445 = vmatpush.bf16.msra.mxu1 %v5118_v11  ;;  %v5050_v33 = vor.u32 %v5997_v23, %v5049_v22  ;;  %v5017_v34 = vld [vmem:[%s7866_s3 + $0xc0] sm:$0xf]  ;;  %v5126_v36 = vor.u32 %v6010_v31, %v5123_v32  ;;  %v5054_v37 = vor.u32 %v5993_v24, %v5051_v27  ;;  %v5089_v38 = vld [vmem:[%s7866_s3 + $0x148] sm:$0xf]  ;;  %v6002_v40 = vld [vmem:[%s7866_s3 + $0x14c] sm:$0xf] }
   0xa   :  { %v5989_v35 = vld [vmem:[%s7866_s3 + $0xdc] sm:$0xf0]  ;;  %v6006_v39 = vld [vmem:[%s7866_s3 + $0x164] sm:$0xf0]  ;;  %v5985_v41 = vld [vmem:[%s7866_s3 + $0xc4] sm:$0xf]  ;;  %464 = vmatpush.bf16.msra.mxu2 %v5122_v30 }
   0xb   :  { %v5019_v42 = vld [vmem:[%s7866_s3 + $0xe0] sm:$0xf0]  ;;  %v5091_v43 = vld [vmem:[%s7866_s3 + $0x168] sm:$0xf0]  ;;  %483 = vmatpush.bf16.msra.mxu3 %v5126_v36  ;;  %v5090_v44 = vor.u32 %v6006_v39, %v5089_v38  ;;  %v5057_v46 = vld [vmem:[%s7866_s3 + $0x108] sm:$0xf]  ;;  %v5018_v47 = vor.u32 %v5989_v35, %v5017_v34 }
   0xc   :  { %v5094_v45 = vor.u32 %v6002_v40, %v5091_v43  ;;  %v5998_v48 = vld [vmem:[%s7866_s3 + $0x124] sm:$0xf0]  ;;  %v5994_v49 = vld [vmem:[%s7866_s3 + $0x10c] sm:$0xf]  ;;  %v5022_v51 = vor.u32 %v5985_v41, %v5019_v42  ;;  %v4985_v52 = vld [vmem:[%s7866_s3 + $0x80] sm:$0xf] }
   0xd   :  { %427 = vmatpush.bf16.msra.mxu0 %v5082_v17  ;;  %446 = vmatpush.bf16.msra.mxu1 %v5086_v21  ;;  %v5059_v50 = vld [vmem:[%s7866_s3 + $0x128] sm:$0xf0]  ;;  %v5981_v53 = vld [vmem:[%s7866_s3 + $0x9c] sm:$0xf0]  ;;  %v5977_v54 = vld [vmem:[%s7866_s3 + $0x84] sm:$0xf]  ;;  %v5058_v56 = vor.u32 %v5998_v48, %v5057_v46 }
   0xe   :  { %v4987_v55 = vld [vmem:[%s7866_s3 + $0xa0] sm:$0xf0]  ;;  %465 = vmatpush.bf16.msra.mxu2 %v5090_v44  ;;  %v5062_v57 = vor.u32 %v5994_v49, %v5059_v50  ;;  %v5025_v58 = vld [vmem:[%s7866_s3 + $0xc8] sm:$0xf]  ;;  %v4986_v59 = vor.u32 %v5981_v53, %v4985_v52  ;;  %v5986_v61 = vld [vmem:[%s7866_s3 + $0xcc] sm:$0xf] }
   0xf   :  { %484 = vmatpush.bf16.msra.mxu3 %v5094_v45  ;;  %v5990_v60 = vld [vmem:[%s7866_s3 + $0xe4] sm:$0xf0]  ;;  %v5027_v62 = vld [vmem:[%s7866_s3 + $0xe8] sm:$0xf0]  ;;  %v4990_v63 = vor.u32 %v5977_v54, %v4987_v55  ;;  %v4953_v0 = vld [vmem:[%s7866_s3 + $0x40] sm:$0xf] }
  0x10   :  { %v5973_v1 = vld [vmem:[%s7866_s3 + $0x5c] sm:$0xf0]  ;;  %v5969_v2 = vld [vmem:[%s7866_s3 + $0x44] sm:$0xf]  ;;  %v5026_v4 = vor.u32 %v5990_v60, %v5025_v58  ;;  %v5030_v5 = vor.u32 %v5986_v61, %v5027_v62  ;;  %v4993_v6 = vld [vmem:[%s7866_s3 + $0x88] sm:$0xf] }
  0x11   :  { %428 = vmatpush.bf16.msra.mxu0 %v5050_v33  ;;  %447 = vmatpush.bf16.msra.mxu1 %v5054_v37  ;;  %v4955_v3 = vld [vmem:[%s7866_s3 + $0x60] sm:$0xf0]  ;;  %v4954_v7 = vor.u32 %v5973_v1, %v4953_v0  ;;  %v5982_v8 = vld [vmem:[%s7866_s3 + $0xa4] sm:$0xf0]  ;;  %v5978_v9 = vld [vmem:[%s7866_s3 + $0x8c] sm:$0xf] }
  0x12   :  { %466 = vmatpush.bf16.msra.mxu2 %v5058_v56  ;;  %v4995_v10 = vld [vmem:[%s7866_s3 + $0xa8] sm:$0xf0]  ;;  %v4958_v11 = vor.u32 %v5969_v2, %v4955_v3  ;;  %v4921_v12 = vld [vmem:[%s7866_s3] sm:$0xf]  ;;  %v5961_v14 = vld [vmem:[%s7866_s3 + $0x4] sm:$0xf]  ;;  %v4994_v20 = vor.u32 %v5982_v8, %v4993_v6 }
  0x13   :  { %485 = vmatpush.bf16.msra.mxu3 %v5062_v57  ;;  %v5965_v13 = vld [vmem:[%s7866_s3 + $0x1c] sm:$0xf0]  ;;  %v4923_v15 = vld [vmem:[%s7866_s3 + $0x20] sm:$0xf0]  ;;  %v5161_v16 = vld [vmem:[%s7866_s3 + $0x1d0] sm:$0xf]  ;;  %v4998_v21 = vor.u32 %v5978_v9, %v4995_v10 }
  0x14   :  { %v6023_v17 = vld [vmem:[%s7866_s3 + $0x1ec] sm:$0xf0]  ;;  %v6019_v18 = vld [vmem:[%s7866_s3 + $0x1d4] sm:$0xf]  ;;  %v4922_v22 = vor.u32 %v5965_v13, %v4921_v12  ;;  %v4961_v23 = vld [vmem:[%s7866_s3 + $0x48] sm:$0xf]  ;;  %v4926_v25 = vor.u32 %v5961_v14, %v4923_v15 }
  0x15   :  { %429 = vmatpush.bf16.msra.mxu0 %v5018_v47  ;;  %448 = vmatpush.bf16.msra.mxu1 %v5022_v51  ;;  %v5163_v19 = vld [vmem:[%s7866_s3 + $0x1f0] sm:$0xf0]  ;;  %v5974_v24 = vld [vmem:[%s7866_s3 + $0x64] sm:$0xf0]  ;;  %v5162_v26 = vor.u32 %v6023_v17, %v5161_v16  ;;  %v5970_v27 = vld [vmem:[%s7866_s3 + $0x4c] sm:$0xf] }
  0x16   :  { %467 = vmatpush.bf16.msra.mxu2 %v5026_v4  ;;  %v4963_v28 = vld [vmem:[%s7866_s3 + $0x68] sm:$0xf0]  ;;  %v5166_v29 = vor.u32 %v6019_v18, %v5163_v19  ;;  %v5129_v30 = vld [vmem:[%s7866_s3 + $0x190] sm:$0xf]  ;;  %v6892_v32 = vld [vmem:[%s7864_s1] sm:$0xff]  ;;  %v4962_v35 = vor.u32 %v5974_v24, %v4961_v23 }
  0x17   :  { %486 = vmatpush.bf16.msra.mxu3 %v5030_v5  ;;  %v6015_v31 = vld [vmem:[%s7866_s3 + $0x1ac] sm:$0xf0]  ;;  %v6011_v33 = vld [vmem:[%s7866_s3 + $0x194] sm:$0xf]  ;;  %v4966_v37 = vor.u32 %v5970_v27, %v4963_v28  ;;  %v4929_v38 = vld [vmem:[%s7866_s3 + $0x8] sm:$0xf] }
  0x18   :  { %v5131_v34 = vld [vmem:[%s7866_s3 + $0x1b0] sm:$0xf0]  ;;  %v5097_v36 = vld [vmem:[%s7866_s3 + $0x150] sm:$0xf]  ;;  %v5966_v39 = vld [vmem:[%s7866_s3 + $0x24] sm:$0xf0]  ;;  %v5130_v41 = vor.u32 %v6015_v31, %v5129_v30 }
  0x19   :  { %430 = vmatpush.bf16.msra.mxu0 %v4986_v59  ;;  %449 = vmatpush.bf16.msra.mxu1 %v4990_v63  ;;  %v5962_v40 = vld [vmem:[%s7866_s3 + $0xc] sm:$0xf]  ;;  %v5169_v43 = vld [vmem:[%s7866_s3 + $0x1d8] sm:$0xf]  ;;  %v5134_v45 = vor.u32 %v6011_v33, %v5131_v34  ;;  %v6007_v46 = vld [vmem:[%s7866_s3 + $0x16c] sm:$0xf0]  ;;  %v4930_v51 = vor.u32 %v5966_v39, %v4929_v38 }
  0x1a   :  { %468 = vmatpush.bf16.msra.mxu2 %v4994_v20  ;;  %v4931_v42 = vld [vmem:[%s7866_s3 + $0x28] sm:$0xf0]  ;;  %v6024_v44 = vld [vmem:[%s7866_s3 + $0x1f4] sm:$0xf0]  ;;  %v6020_v47 = vld [vmem:[%s7866_s3 + $0x1dc] sm:$0xf]  ;;  %v5098_v54 = vor.u32 %v6007_v46, %v5097_v36 }
  0x1b   :  { %487 = vmatpush.bf16.msra.mxu3 %v4998_v21  ;;  %v5171_v48 = vld [vmem:[%s7866_s3 + $0x1f8] sm:$0xf0]  ;;  %v6003_v49 = vld [vmem:[%s7866_s3 + $0x154] sm:$0xf]  ;;  %v4934_v52 = vor.u32 %v5962_v40, %v4931_v42  ;;  %v5170_v53 = vor.u32 %v6024_v44, %v5169_v43  ;;  %v5065_v55 = vld [vmem:[%s7866_s3 + $0x110] sm:$0xf] }
  0x1c   :  { %v5099_v50 = vld [vmem:[%s7866_s3 + $0x170] sm:$0xf0]  ;;  %v5174_v56 = vor.u32 %v6020_v47, %v5171_v48  ;;  %v5137_v57 = vld [vmem:[%s7866_s3 + $0x198] sm:$0xf]  ;;  %v5999_v60 = vld [vmem:[%s7866_s3 + $0x12c] sm:$0xf0] }
  0x1d   :  { %431 = vmatpush.bf16.msra.mxu0 %v4954_v7  ;;  %450 = vmatpush.bf16.msra.mxu1 %v4958_v11  ;;  %v6016_v58 = vld [vmem:[%s7866_s3 + $0x1b4] sm:$0xf0]  ;;  %v5102_v59 = vor.u32 %v6003_v49, %v5099_v50  ;;  %v6012_v61 = vld [vmem:[%s7866_s3 + $0x19c] sm:$0xf]  ;;  %v5995_v63 = vld [vmem:[%s7866_s3 + $0x114] sm:$0xf]  ;;  %v5066_v2 = vor.u32 %v5999_v60, %v5065_v55 }
  0x1e   :  { %469 = vmatpush.bf16.msra.mxu2 %v4962_v35  ;;  %v5139_v62 = vld [vmem:[%s7866_s3 + $0x1b8] sm:$0xf0]  ;;  %v5067_v0 = vld [vmem:[%s7866_s3 + $0x130] sm:$0xf0]  ;;  %v5138_v1 = vor.u32 %v6016_v58, %v5137_v57  ;;  %v5033_v3 = vld [vmem:[%s7866_s3 + $0xd0] sm:$0xf] }
  0x1f   :  { %488 = vmatpush.bf16.msra.mxu3 %v4966_v37  ;;  %v5142_v4 = vor.u32 %v6012_v61, %v5139_v62  ;;  %v5105_v5 = vld [vmem:[%s7866_s3 + $0x158] sm:$0xf]  ;;  %v5070_v7 = vor.u32 %v5995_v63, %v5067_v0  ;;  %v5991_v8 = vld [vmem:[%s7866_s3 + $0xec] sm:$0xf0]  ;;  %v6004_v9 = vld [vmem:[%s7866_s3 + $0x15c] sm:$0xf] }
  0x20   :  { %v6008_v6 = vld [vmem:[%s7866_s3 + $0x174] sm:$0xf0]  ;;  %v5107_v10 = vld [vmem:[%s7866_s3 + $0x178] sm:$0xf0]  ;;  %v5987_v11 = vld [vmem:[%s7866_s3 + $0xd4] sm:$0xf] }
  0x21   :  { %432 = vmatpush.bf16.msra.mxu0 %v4922_v22  ;;  %451 = vmatpush.bf16.msra.mxu1 %v4926_v25  ;;  %v5035_v12 = vld [vmem:[%s7866_s3 + $0xf0] sm:$0xf0]  ;;  %v5106_v13 = vor.u32 %v6008_v6, %v5105_v5 }
  0x22   :  { %470 = vmatpush.bf16.msra.mxu2 %v4930_v51 }
  0x23   :  { %489 = vmatpush.bf16.msra.mxu3 %v4934_v52 }
  0x24   :  { %433 = vmatmul.bf16.vlgmr.msra.gmra.mxu0 %v6892_v32  ;;  %452 = vmatmul.bf16.vlgmr.msra.gmra.mxu1 %v6892_v32 }
  0x25   :  { %501 = vmatpush.bf16.msrb.mxu0 %v5162_v26  ;;  %520 = vmatpush.bf16.msrb.mxu1 %v5166_v29 }
  0x26   :  { %539 = vmatpush.bf16.msrb.mxu2 %v5170_v53  ;;  %490 = vmatmul.bf16.vlgmr.msra.gmra.mxu3 %v6892_v32 }
  0x27   :  { %558 = vmatpush.bf16.msrb.mxu3 %v5174_v56  ;;  %471 = vmatmul.bf16.vlgmr.msra.gmra.mxu2 %v6892_v32 }
  0x29   :  { %502 = vmatpush.bf16.msrb.mxu0 %v5130_v41  ;;  %521 = vmatpush.bf16.msrb.mxu1 %v5134_v45 }
  0x2a   :  { %540 = vmatpush.bf16.msrb.mxu2 %v5138_v1 }
  0x2d   :  { %503 = vmatpush.bf16.msrb.mxu0 %v5098_v54  ;;  %522 = vmatpush.bf16.msrb.mxu1 %v5102_v59 }
  0x2e   :  { %11 = vsyncpa [#allocation4], 0  ;;  %v5034_v14 = vor.u32 %v5991_v8, %v5033_v3  ;;  %v5001_v15 = vld [vmem:[%s7866_s3 + $0x90] sm:$0xf]  ;;  %559 = vmatpush.bf16.msrb.mxu3 %v5142_v4  ;;  %v5110_v16 = vor.u32 %v6004_v9, %v5107_v10  ;;  %v5073_v17 = vld [vmem:[%s7866_s3 + $0x118] sm:$0xf]  ;;  %v5038_v19 = vor.u32 %v5987_v11, %v5035_v12  ;;  %541 = vmatpush.bf16.msrb.mxu2 %v5106_v13 }
  0x2f   :  { %v6000_v18 = vld [vmem:[%s7866_s3 + $0x134] sm:$0xf0]  ;;  %v5983_v20 = vld [vmem:[%s7866_s3 + $0xac] sm:$0xf0]  ;;  %v5996_v21 = vld [vmem:[%s7866_s3 + $0x11c] sm:$0xf] }
  0x30   :  { %v5075_v22 = vld [vmem:[%s7866_s3 + $0x138] sm:$0xf0]  ;;  %v7009_v23 = vld [vmem:[%s7864_s1 + $0x8] sm:$0xff]  ;;  %v5979_v24 = vld [vmem:[%s7866_s3 + $0x94] sm:$0xf]  ;;  %v5074_v26 = vor.u32 %v6000_v18, %v5073_v17  ;;  %v5002_v27 = vor.u32 %v5983_v20, %v5001_v15  ;;  %s6651_s15 = smov 64  }
  0x31   :  { %504 = vmatpush.bf16.msrb.mxu0 %v5066_v2  ;;  %523 = vmatpush.bf16.msrb.mxu1 %v5070_v7  ;;  %v5003_v25 = vld [vmem:[%s7866_s3 + $0xb0] sm:$0xf0]  ;;  %v4969_v28 = vld [vmem:[%s7866_s3 + $0x50] sm:$0xf]  ;;  %v5078_v29 = vor.u32 %v5996_v21, %v5075_v22  ;;  %v5041_v30 = vld [vmem:[%s7866_s3 + $0xd8] sm:$0xf] }
  0x32   :  { %560 = vmatpush.bf16.msrb.mxu3 %v5110_v16  ;;  %v5992_v31 = vld [vmem:[%s7866_s3 + $0xf4] sm:$0xf0]  ;;  %v5006_v33 = vor.u32 %v5979_v24, %v5003_v25  ;;  %v5975_v34 = vld [vmem:[%s7866_s3 + $0x6c] sm:$0xf0]  ;;  %v5988_v35 = vld [vmem:[%s7866_s3 + $0xdc] sm:$0xf]  ;;  %542 = vmatpush.bf16.msrb.mxu2 %v5074_v26 }
  0x33   :  { %v5043_v36 = vld [vmem:[%s7866_s3 + $0xf8] sm:$0xf0]  ;;  %v5971_v37 = vld [vmem:[%s7866_s3 + $0x54] sm:$0xf]  ;;  %v5042_v39 = vor.u32 %v5992_v31, %v5041_v30  ;;  %v4970_v40 = vor.u32 %v5975_v34, %v4969_v28  ;;  %v4937_v41 = vld [vmem:[%s7866_s3 + $0x10] sm:$0xf] }
  0x34   :  { %438 = vmatmul.bf16.gmra.mxu0 %v7009_v23  ;;  %v4971_v38 = vld [vmem:[%s7866_s3 + $0x70] sm:$0xf0]  ;;  %457 = vmatmul.bf16.gmra.mxu1 %v7009_v23  ;;  %v5046_v42 = vor.u32 %v5988_v35, %v5043_v36  ;;  %v5009_v43 = vld [vmem:[%s7866_s3 + $0x98] sm:$0xf]  ;;  %v5967_v46 = vld [vmem:[%s7866_s3 + $0x2c] sm:$0xf0] }
  0x35   :  { %505 = vmatpush.bf16.msrb.mxu0 %v5034_v14  ;;  %524 = vmatpush.bf16.msrb.mxu1 %v5038_v19  ;;  %v5984_v44 = vld [vmem:[%s7866_s3 + $0xb4] sm:$0xf0]  ;;  %v4974_v45 = vor.u32 %v5971_v37, %v4971_v38  ;;  %v5980_v47 = vld [vmem:[%s7866_s3 + $0x9c] sm:$0xf]  ;;  %v5963_v49 = vld [vmem:[%s7866_s3 + $0x14] sm:$0xf]  ;;  %v4938_v52 = vor.u32 %v5967_v46, %v4937_v41 }
  0x36   :  { %561 = vmatpush.bf16.msrb.mxu3 %v5078_v29  ;;  %v5011_v48 = vld [vmem:[%s7866_s3 + $0xb8] sm:$0xf0]  ;;  %v4939_v50 = vld [vmem:[%s7866_s3 + $0x30] sm:$0xf0]  ;;  %543 = vmatpush.bf16.msrb.mxu2 %v5042_v39  ;;  %v5010_v51 = vor.u32 %v5984_v44, %v5009_v43  ;;  %v4977_v54 = vld [vmem:[%s7866_s3 + $0x58] sm:$0xf] }
  0x37   :  { %v5014_v53 = vor.u32 %v5980_v47, %v5011_v48  ;;  %v5976_v55 = vld [vmem:[%s7866_s3 + $0x74] sm:$0xf0]  ;;  %v4942_v56 = vor.u32 %v5963_v49, %v4939_v50  ;;  %476 = vmatmul.bf16.gmra.mxu2 %v7009_v23  ;;  %v5972_v57 = vld [vmem:[%s7866_s3 + $0x5c] sm:$0xf]  ;;  %495 = vmatmul.bf16.gmra.mxu3 %v7009_v23  ;;  %s6652_s16 = smov 96   ;;  %vm621_vm0 = vcmask 130048  }
  0x38   :  { %v4979_v58 = vld [vmem:[%s7866_s3 + $0x78] sm:$0xf0]  ;;  %v4978_v59 = vor.u32 %v5976_v55, %v4977_v54  ;;  %v4945_v61 = vld [vmem:[%s7866_s3 + $0x18] sm:$0xf]  ;;  %vm665_vm1 = vcmask 261120   ;;  %s4899_s27 = sshll.u32 %s7869_s6, 4  ;;  %s4900_s27 = int_to_ptr.hbm [resolvable:$true] %s4899_s27 }
  0x39   :  { %506 = vmatpush.bf16.msrb.mxu0 %v5002_v27  ;;  %525 = vmatpush.bf16.msrb.mxu1 %v5006_v33  ;;  %v4982_v60 = vor.u32 %v5972_v57, %v4979_v58  ;;  %v5968_v62 = vld [vmem:[%s7866_s3 + $0x34] sm:$0xf0]  ;;  %v5964_v63 = vld [vmem:[%s7866_s3 + $0x1c] sm:$0xf]  ;;  %s6654_s28 = smov 128   ;;  %s6655_s29 = smov 8  }
  0x3a   :  { %562 = vmatpush.bf16.msrb.mxu3 %v5046_v42  ;;  %544 = vmatpush.bf16.msrb.mxu2 %v5010_v51  ;;  %v4947_v0 = vld [vmem:[%s7866_s3 + $0x38] sm:$0xf0]  ;;  %v4946_v1 = vor.u32 %v5968_v62, %v4945_v61  ;;  %s6650_s3 = smov 32  }
  0x3b   :  { %v4950_v2 = vor.u32 %v5964_v63, %v4947_v0 }
  0x3d   :  { %507 = vmatpush.bf16.msrb.mxu0 %v4970_v40  ;;  %526 = vmatpush.bf16.msrb.mxu1 %v4974_v45 }
  0x3e   :  { %563 = vmatpush.bf16.msrb.mxu3 %v5014_v53  ;;  %545 = vmatpush.bf16.msrb.mxu2 %v4978_v59 }
  0x41   :  { %508 = vmatpush.bf16.msrb.mxu0 %v4938_v52  ;;  %527 = vmatpush.bf16.msrb.mxu1 %v4942_v56 }
  0x42   :  { %564 = vmatpush.bf16.msrb.mxu3 %v4982_v60  ;;  %546 = vmatpush.bf16.msrb.mxu2 %v4946_v1 }
  0x44   :  { %509 = vmatmul.bf16.vlgmr.msrb.gmra.mxu0 %v6892_v32  ;;  %528 = vmatmul.bf16.vlgmr.msrb.gmra.mxu1 %v6892_v32 }
  0x46   :  { %565 = vmatpush.bf16.msrb.mxu3 %v4950_v2 }
  0x47   :  { %547 = vmatmul.bf16.vlgmr.msrb.gmra.mxu2 %v6892_v32 }
  0x49   :  { %566 = vmatmul.bf16.vlgmr.msrb.gmra.mxu3 %v6892_v32 }
  0x54   :  { %514 = vmatmul.bf16.gmra.mxu0 %v7009_v23  ;;  %533 = vmatmul.bf16.gmra.mxu1 %v7009_v23 }
  0x57   :  { %552 = vmatmul.bf16.gmra.mxu2 %v7009_v23 }
  0x59   :  { %571 = vmatmul.bf16.gmra.mxu3 %v7009_v23 }
  0xa1   :  { %v434_v3 = vpop.f32.mrf.mxu0  ;;  %v453_v4 = vpop.f32.mrf.mxu1 }
  0xa2   :  { %v577_v5 = vpack.c.bf16 %v453_v4, %v434_v3 }
  0xa4   :  { %v595_v9 = vunpack.c.l.b16 %v577_v5  ;;  %v993_v17 = vunpack.c.h.b16 %v577_v5 }
  0xa9   :  { %v436_v6 = vpop.f32.mrf.mxu0  ;;  %v455_v7 = vpop.f32.mrf.mxu1 }
  0xaa   :  { %v581_v8 = vpack.c.bf16 %v455_v7, %v436_v6  ;;  %v472_v11 = vpop.f32.mrf.mxu2  ;;  %v491_v32 = vpop.f32.mrf.mxu3 }
  0xab   :  { %v578_v56 = vpack.c.bf16 %v491_v32, %v472_v11 }
  0xac   :  { %v596_v10 = vunpack.c.l.b16 %v581_v8  ;;  %v994_v16 = vunpack.c.h.b16 %v581_v8 }
  0xad   :  { %v1389_v59 = vunpack.c.l.b16 %v578_v56  ;;  %v1785_v61 = vunpack.c.h.b16 %v578_v56 }
  0xae   :  { %v7101_v12 = vpack.c.b16 %v596_v10, %v595_v9  ;;  %v7111_v20 = vpack.c.b16 %v994_v16, %v993_v17 }
  0xb0   :  { %895 = vrot.lane.b32.xlu1 %v7101_v12, %s6650_s3  ;;  %797 = vrot.lane.b32.xlu2 %v7101_v12, %s6651_s15 }
  0xb1   :  { %v439_v13 = vpop.f32.mrf.mxu0  ;;  %699 = vrot.lane.b32.xlu0 %v7101_v12, %s6652_s16  ;;  %v458_v14 = vpop.f32.mrf.mxu1 }
  0xb2   :  { %v7109_v15 = vpack.c.bf16 %v458_v14, %v439_v13  ;;  %v474_v18 = vpop.f32.mrf.mxu2  ;;  %v493_v19 = vpop.f32.mrf.mxu3 }
  0xb3   :  { %v582_v57 = vpack.c.bf16 %v493_v19, %v474_v18 }
  0xb5   :  { %v1390_v60 = vunpack.c.l.b16 %v582_v57  ;;  %v1786_v62 = vunpack.c.h.b16 %v582_v57 }
  0xb7   :  { %v7141_v63 = vpack.c.b16 %v1390_v60, %v1389_v59  ;;  %v7143_v0 = vpack.c.b16 %v1786_v62, %v1785_v61 }
  0xb9   :  { %v7113_v21 = vpop.f32.mrf.mxu0  ;;  %1093 = vrot.lane.b32.xlu0 %v7111_v20, %s6652_s16  ;;  %v7117_v22 = vpop.f32.mrf.mxu1 }
  0xba   :  { %v477_v23 = vpop.f32.mrf.mxu2  ;;  %v496_v24 = vpop.f32.mrf.mxu3 }
  0xbb   :  { %v7119_v25 = vpack.c.bf16 %v496_v24, %v477_v23 }
  0xbd   :  { %v3370_v30 = vunpack.c.h.b16 %v7119_v25  ;;  %v2974_v57 = vunpack.c.l.b16 %v7119_v25 }
  0xc1   :  { %v510_v26 = vpop.f32.mrf.mxu0  ;;  %v529_v27 = vpop.f32.mrf.mxu1 }
  0xc2   :  { %v479_v28 = vpop.f32.mrf.mxu2  ;;  %v498_v29 = vpop.f32.mrf.mxu3  ;;  %v579_v33 = vpack.c.bf16 %v529_v27, %v510_v26 }
  0xc3   :  { %v7122_v31 = vpack.c.bf16 %v498_v29, %v479_v28  ;;  %v589_v28 = vpack.c.bf16 %v7117_v22, %v7113_v21 }
  0xc4   :  { %v617_v39 = vunpack.c.l.b16 %v579_v33  ;;  %v1013_v45 = vunpack.c.h.b16 %v579_v33 }
  0xc5   :  { %v3371_v36 = vunpack.c.h.b16 %v7122_v31  ;;  %v2182_v33 = vunpack.c.l.b16 %v589_v28 }
  0xc7   :  { %v7125_v38 = vpack.c.b16 %v3371_v36, %v3370_v30 }
  0xc9   :  { %v512_v34 = vpop.f32.mrf.mxu0  ;;  %v531_v35 = vpop.f32.mrf.mxu1 }
  0xca   :  { %v583_v37 = vpack.c.bf16 %v531_v35, %v512_v34  ;;  %v548_v41 = vpop.f32.mrf.mxu2  ;;  %v2181_v34 = vunpack.c.l.b16 %v7109_v15 }
  0xcc   :  { %v618_v40 = vunpack.c.l.b16 %v583_v37  ;;  %v567_v43 = vpop.f32.mrf.mxu3  ;;  %v1014_v44 = vunpack.c.h.b16 %v583_v37 }
  0xcd   :  { %v580_v46 = vpack.c.bf16 %v567_v43, %v548_v41 }
  0xce   :  { %v619_v42 = vpack.c.b16 %v618_v40, %v617_v39  ;;  %v1015_v48 = vpack.c.b16 %v1014_v44, %v1013_v45  ;;  %v7182_v40 = vpack.c.b16 %v2182_v33, %v2181_v34 }
  0xcf   :  { %v1805_v50 = vunpack.c.h.b16 %v580_v46  ;;  %v1411_v52 = vunpack.c.l.b16 %v580_v46 }
  0xd0   :  { %914 = vrot.lane.b32.xlu0 %v619_v42, %s6650_s3  ;;  %816 = vrot.lane.b32.xlu2 %v619_v42, %s6651_s15 }
  0xd1   :  { %718 = vrot.lane.b32.xlu1 %v619_v42, %s6652_s16  ;;  %635 = vmatpush.bf16.msra.mxu0 %v619_v42  ;;  %v515_v19 = vpop.f32.mrf.mxu0 }
  0xd2   :  { %v550_v47 = vpop.f32.mrf.mxu2 }
  0xd4   :  { %v569_v49 = vpop.f32.mrf.mxu3 }
  0xd5   :  { %v584_v51 = vpack.c.bf16 %v569_v49, %v550_v47 }
  0xd7   :  { %v1412_v53 = vunpack.c.l.b16 %v584_v51  ;;  %v1806_v54 = vunpack.c.h.b16 %v584_v51 }
  0xd8   :  { %1210 = vrot.lane.b32.xlu0 %v1015_v48, %s6651_s15  ;;  %1112 = vrot.lane.b32.xlu2 %v1015_v48, %s6652_s16 }
  0xd9   :  { %1191 = vrot.lane.b32.xlu1 %v7111_v20, %s6651_s15  ;;  %v7134_v55 = vpack.c.b16 %v1806_v54, %v1805_v50  ;;  %v7136_v58 = vpack.c.b16 %v1412_v53, %v1411_v52  ;;  %v517_v26 = vpop.f32.mrf.mxu0  ;;  %v2579_v53 = vunpack.c.h.b16 %v589_v28  ;;  %v2578_v54 = vunpack.c.h.b16 %v7109_v15  ;;  %v6033_v28 = vld [vmem:[%s7867_s4 + $0x40] sm:$0xff] }
  0xda   :  { %v553_v37 = vpop.f32.mrf.mxu2 }
  0xdb   :  { %v7207_v56 = vpack.c.b16 %v2579_v53, %v2578_v54 }
  0xdc   :  { %v572_v39 = vpop.f32.mrf.mxu3 }
  0xdd   :  { %v588_v41 = vpack.c.bf16 %v572_v39, %v553_v37  ;;  %v6038_v37 = vld [vmem:[%s7867_s4 + $0x68] sm:$0xff] }
  0xdf   :  { %v3390_v44 = vunpack.c.h.b16 %v588_v41  ;;  %v2996_v25 = vunpack.c.l.b16 %v588_v41 }
  0xe0   :  { %1308 = vrot.lane.b32.xlu0 %v1015_v48, %s6650_s3 }
  0xe1   :  { %1510 = vrot.lane.b32.xlu1 %v7136_v58, %s6652_s16 }
  0xe2   :  { %v555_v42 = vpop.f32.mrf.mxu2 }
  0xe4   :  { %v574_v43 = vpop.f32.mrf.mxu3 }
  0xe5   :  { %v592_v45 = vpack.c.bf16 %v574_v43, %v555_v42 }
  0xe7   :  { %v3391_v47 = vunpack.c.h.b16 %v592_v45 }
  0xe8   :  { %1491 = vrot.lane.b32.xlu0 %v7141_v63, %s6652_s16 }
  0xe9   :  { %1885 = vrot.lane.b32.xlu1 %v7143_v0, %s6652_s16  ;;  %v7195_v50 = vpack.c.b16 %v3391_v47, %v3390_v44 }
 0x10a   :  { %v798_v1 = vpop.permute.xlu2 %797  ;;  %599 = vxpose.xlu0.c.b16.start.end [1/1] (short) (narrow) %v7101_v12, 32 }
 0x10b   :  { %800 = vxpose.xlu2.c.b16.start.end [1/1] (short) (narrow) %v798_v1, 32  ;;  %v6026_v1 = vld [vmem:[%s7867_s4 + $0x8] sm:$0xff] }
 0x10c   :  { %678 = vmatpush.bf16.msra.mxu1 %v6026_v1 }
 0x122   :  { %v896_v5 = vpop.permute.xlu1 %895 }
 0x123   :  { %v700_v2 = vpop.permute.xlu0 %699 }
 0x124   :  { %702 = vxpose.xlu1.c.b16.start.end [1/1] (short) (narrow) %v700_v2, 32 }
 0x12a   :  { %v817_v3 = vpop.permute.xlu2 %816 }
 0x12b   :  { %v1094_v4 = vpop.permute.xlu0 %1093  ;;  %832 = vmatpush.bf16.msrb.mxu0 %v817_v3  ;;  %v6025_v3 = vld [vmem:[%s7867_s4] sm:$0xff] }
 0x12c   :  { %1096 = vxpose.xlu0.c.b16.start.end [1/1] (short) (narrow) %v1094_v4, 32  ;;  %679 = vmatpush.bf16.msra.mxu1 %v6025_v3 }
 0x132   :  { %v1113_v16 = vpop.permute.xlu2 %1112 }
 0x142   :  { %v915_v6 = vpop.permute.xlu0 %914 }
 0x143   :  { %v719_v7 = vpop.permute.xlu1 %718 }
 0x144   :  { %6578 = vxpose.binary.xlu1.c.b16.start.end [1/2] (short) (narrow) %v7111_v20, %v896_v5, 32 }
 0x145   :  { %734 = vmatpush.bf16.msra.mxu2 %v719_v7 }
 0x149   :  { %930 = vmatpush.bf16.msrb.mxu2 %v915_v6 }
 0x14a   :  { %v1211_v8 = vpop.permute.xlu0 %1210 }
 0x14b   :  { %v1192_v9 = vpop.permute.xlu1 %1191 }
 0x14c   :  { %1194 = vxpose.xlu2.c.b16.start.end [1/1] (short) (narrow) %v1192_v9, 32  ;;  %v6030_v9 = vld [vmem:[%s7867_s4 + $0x28] sm:$0xff] }
 0x14d   :  { %874 = vmatpush.bf16.msrb.mxu1 %v6030_v9 }
 0x152   :  { %v1309_v10 = vpop.permute.xlu0 %1308 }
 0x153   :  { %v7152_v32 = vpop.permute.xlu1 %1510 }
 0x15a   :  { %v1492_v11 = vpop.permute.xlu0 %1491 }
 0x15b   :  { %1494 = vxpose.xlu0.c.b16.start.end [1/1] (short) (narrow) %v1492_v11, 32  ;;  %v7156_v14 = vpop.permute.xlu1 %1885 }
 0x1ac   :  { %v808_v18 = vpop.trf.xlu2 }
 0x1b6   :  { %v607_v12 = vpop.trf.xlu0 }
 0x1b7   :  { %5175 = vmatmul.msk.bf16.vlgmr.msra.gmra.mxu0 %vm621_vm0, %v607_v12 }
 0x1b8   :  { %1030 = vmatpush.bf16.msra.mxu0 %v1015_v48 }
 0x1bc   :  { %v809_v24 = vpop.trf.xlu2 }
 0x1c5   :  { %1289 = vrot.lane.b32.xlu2 %v7111_v20, %s6650_s3  ;;  %v534_v20 = vpop.f32.mrf.mxu1 }
 0x1c6   :  { %v608_v13 = vpop.trf.xlu0  ;;  %v587_v29 = vpack.c.bf16 %v534_v20, %v515_v19 }
 0x1c7   :  { %5176 = vmatmul.msk.bf16.gmra.mxu0 %vm621_vm0, %v608_v13 }
 0x1c8   :  { %v2203_v35 = vunpack.c.l.b16 %v587_v29  ;;  %v2598_v48 = vunpack.c.h.b16 %v587_v29 }
 0x1cd   :  { %1589 = vrot.lane.b32.xlu2 %v7141_v63, %s6651_s15  ;;  %v536_v27 = vpop.f32.mrf.mxu1 }
 0x1ce   :  { %v591_v30 = vpack.c.bf16 %v536_v27, %v517_v26 }
 0x1d0   :  { %v710_v17 = vpop.trf.xlu1  ;;  %v2204_v36 = vunpack.c.l.b16 %v591_v30  ;;  %v2599_v49 = vunpack.c.h.b16 %v591_v30 }
 0x1d1   :  { %5187 = vmatmul.msk.bf16.vlgmr.msra.gmra.mxu2 %vm621_vm0, %v710_v17 }
 0x1d2   :  { %1128 = vmatpush.bf16.msra.mxu2 %v1113_v16  ;;  %v7184_v22 = vpack.c.b16 %v2204_v36, %v2203_v35  ;;  %v7197_v51 = vpack.c.b16 %v2599_v49, %v2598_v48 }
 0x1d5   :  { %1687 = vrot.lane.b32.xlu2 %v7141_v63, %s6650_s3 }
 0x1d7   :  { %5199 = vmatmul.msk.bf16.vlgmr.msrb.gmra.mxu0 %vm621_vm0, %v808_v18 }
 0x1d8   :  { %1226 = vmatpush.bf16.msrb.mxu0 %v1211_v8  ;;  %v1104_v15 = vpop.trf.xlu0 }
 0x1d9   :  { %1608 = vrot.lane.b32.xlu0 %v7136_v58, %s6651_s15 }
 0x1dd   :  { %1904 = vrot.lane.b32.xlu2 %v7134_v55, %s6652_s16 }
 0x1e0   :  { %v711_v23 = vpop.trf.xlu1 }
 0x1e1   :  { %5188 = vmatmul.msk.bf16.gmra.mxu2 %vm621_vm0, %v711_v23  ;;  %1706 = vrot.lane.b32.xlu0 %v7136_v58, %s6650_s3 }
 0x1e5   :  { %1983 = vrot.lane.b32.xlu2 %v7143_v0, %s6651_s15 }
 0x1e7   :  { %5200 = vmatmul.msk.bf16.gmra.mxu0 %vm621_vm0, %v809_v24 }
 0x1e8   :  { %v1105_v5 = vpop.trf.xlu0 }
 0x1e9   :  { %2002 = vrot.lane.b32.xlu0 %v7134_v55, %s6651_s15 }
 0x1ed   :  { %2081 = vrot.lane.b32.xlu2 %v7143_v0, %s6650_s3  ;;  %v1202_v61 = vpop.trf.xlu2 }
 0x1f0   :  { %v6579_v21 = vpop.trf.xlu1 }
 0x1f1   :  { %5211 = vmatmul.msk.bf16.vlgmr.msrb.gmra.mxu2 %vm621_vm0, %v6579_v21  ;;  %2284 = vrot.lane.b32.xlu0 %v7182_v40, %s6652_s16 }
 0x1f2   :  { %1324 = vmatpush.bf16.msrb.mxu2 %v1309_v10 }
 0x1f5   :  { %2303 = vrot.lane.b32.xlu2 %v7184_v22, %s6652_s16 }
 0x1f8   :  { %v6580_v46 = vpop.trf.xlu1 }
 0x1f9   :  { %5223 = vmatmul.msk.bf16.vlgmr.msra.gmra.mxu0 %vm621_vm0, %v6580_v46  ;;  %2480 = vrot.lane.b32.xlu0 %v7182_v40, %s6650_s3 }
 0x1fa   :  { %1428 = vmatpush.bf16.msra.mxu0 %v7136_v58  ;;  %v2975_v58 = vunpack.c.l.b16 %v7122_v31  ;;  %v2997_v31 = vunpack.c.l.b16 %v592_v45 }
 0x1fc   :  { %v7214_v60 = vpack.c.b16 %v2975_v58, %v2974_v57  ;;  %v7227_v2 = vpack.c.b16 %v2997_v31, %v2996_v25 }
 0x1fd   :  { %2382 = vrot.lane.b32.xlu2 %v7182_v40, %s6651_s15  ;;  %v1203_v62 = vpop.trf.xlu2 }
 0x200   :  { %v6581_v52 = vpop.trf.xlu1 }
 0x201   :  { %5212 = vmatmul.msk.bf16.gmra.mxu2 %vm621_vm0, %v6581_v52  ;;  %2697 = vrot.lane.b32.xlu0 %v7197_v51, %s6652_s16 }
 0x205   :  { %2499 = vrot.lane.b32.xlu2 %v7184_v22, %s6650_s3 }
 0x207   :  { %v7239_v8 = vpop.trf.xlu0 }
 0x208   :  { %v6582_v59 = vpop.trf.xlu1 }
 0x209   :  { %5224 = vmatmul.msk.bf16.gmra.mxu0 %vm621_vm0, %v6582_v59  ;;  %2776 = vrot.lane.b32.xlu0 %v7207_v56, %s6651_s15 }
 0x20d   :  { %3076 = vrot.lane.b32.xlu2 %v7214_v60, %s6652_s16 }
 0x211   :  { %5235 = vmatmul.msk.bf16.vlgmr.msra.gmra.mxu2 %vm621_vm0, %v1104_v15  ;;  %2893 = vrot.lane.b32.xlu0 %v7197_v51, %s6650_s3 }
 0x212   :  { %1526 = vmatpush.bf16.msra.mxu2 %v7152_v32 }
 0x215   :  { %2795 = vrot.lane.b32.xlu2 %v7197_v51, %s6651_s15 }
 0x217   :  { %v7249_v32 = vpop.trf.xlu0 }
 0x219   :  { %5247 = vmatmul.msk.bf16.vlgmr.msrb.gmra.mxu0 %vm621_vm0, %v1202_v61 }
 0x21d   :  { %3095 = vrot.lane.b32.xlu2 %v7227_v2, %s6652_s16 }
 0x21f   :  { %v1290_v4 = vpop.permute.xlu2 %1289 }
 0x220   :  { %6583 = vxpose.binary.xlu1.c.b16.start.end [1/2] (short) (narrow) %v7141_v63, %v1290_v4, 32  ;;  %v6029_v63 = vld [vmem:[%s7867_s4 + $0x20] sm:$0xff]  ;;  %v6028_v4 = vld [vmem:[%s7867_s4 + $0x18] sm:$0xff] }
 0x221   :  { %5236 = vmatmul.msk.bf16.gmra.mxu2 %vm621_vm0, %v1105_v5  ;;  %875 = vmatpush.bf16.msrb.mxu1 %v6029_v63 }
 0x222   :  { %776 = vmatpush.bf16.msra.mxu3 %v6028_v4 }
 0x227   :  { %v1590_v7 = vpop.permute.xlu2 %1589 }
 0x229   :  { %5248 = vmatmul.msk.bf16.gmra.mxu0 %vm621_vm0, %v1203_v62 }
 0x22f   :  { %v1688_v12 = vpop.permute.xlu2 %1687 }
 0x233   :  { %1888 = vxpose.xlu0.c.b16.start.end [1/1] (short) (narrow) %v7156_v14, 32 }
 0x234   :  { %v637_v6 = vpop.f32.mrf.mxu0 }
 0x237   :  { %v7251_v14 = vpop.permute.xlu2 %1904 }
 0x23c   :  { %v639_v10 = vpop.f32.mrf.mxu0 }
 0x23d   :  { %v647_v11 = vpack.c.bf16 %v639_v10, %v637_v6  ;;  %v6027_v10 = vld [vmem:[%s7867_s4 + $0x10] sm:$0xff] }
 0x23e   :  { %777 = vmatpush.bf16.msra.mxu3 %v6027_v10 }
 0x23f   :  { %5185 = vmatmul.msk.bf16.vlgmr.msra.gmra.mxu1 %vm665_vm1, %v647_v11  ;;  %v1984_v23 = vpop.permute.xlu2 %1983 }
 0x240   :  { %6588 = vxpose.binary.xlu1.c.b16.start.end [1/2] (short) (narrow) %v7143_v0, %v1688_v12, 32  ;;  %v6034_v0 = vld [vmem:[%s7867_s4 + $0x48] sm:$0xff] }
 0x241   :  { %1072 = vmatpush.bf16.msra.mxu1 %v6034_v0 }
 0x243   :  { %1592 = vxpose.xlu2.c.b16.start.end [1/1] (short) (narrow) %v1590_v7, 32 }
 0x244   :  { %v642_v13 = vpop.f32.mrf.mxu0 }
 0x245   :  { %1073 = vmatpush.bf16.msra.mxu1 %v6033_v28 }
 0x247   :  { %v2082_v29 = vpop.permute.xlu2 %2081 }
 0x24b   :  { %v1609_v16 = vpop.permute.xlu0 %1608 }
 0x24c   :  { %1624 = vmatpush.bf16.msrb.mxu0 %v1609_v16  ;;  %v644_v17 = vpop.f32.mrf.mxu0 }
 0x24d   :  { %v648_v18 = vpack.c.bf16 %v644_v17, %v642_v13 }
 0x24f   :  { %5186 = vmatmul.msk.bf16.gmra.mxu1 %vm665_vm1, %v648_v18  ;;  %v7268_v39 = vpop.permute.xlu2 %2303 }
 0x253   :  { %v1707_v19 = vpop.permute.xlu0 %1706 }
 0x254   :  { %v834_v20 = vpop.f32.mrf.mxu0  ;;  %v736_v3 = vpop.f32.mrf.mxu2 }
 0x257   :  { %v2383_v42 = vpop.permute.xlu2 %2382 }
 0x25b   :  { %v7257_v24 = vpop.permute.xlu0 %2002 }
 0x25c   :  { %v836_v26 = vpop.f32.mrf.mxu0  ;;  %v738_v9 = vpop.f32.mrf.mxu2 }
 0x25d   :  { %v844_v27 = vpack.c.bf16 %v836_v26, %v834_v20  ;;  %v746_v11 = vpack.c.bf16 %v738_v9, %v736_v3 }
 0x25f   :  { %5209 = vmatmul.msk.bf16.vlgmr.msrb.gmra.mxu1 %vm665_vm1, %v844_v27  ;;  %v7277_v48 = vpop.permute.xlu2 %2499  ;;  %5197 = vmatmul.msk.bf16.vlgmr.msra.gmra.mxu3 %vm665_vm1, %v746_v11  ;;  %v6032_v27 = vld [vmem:[%s7867_s4 + $0x38] sm:$0xff] }
 0x260   :  { %6593 = vxpose.binary.xlu1.c.b16.start.end [1/2] (short) (narrow) %v7182_v40, %v2082_v29, 32  ;;  %v6037_v40 = vld [vmem:[%s7867_s4 + $0x60] sm:$0xff]  ;;  %v6040_v11 = vld [vmem:[%s7867_s4 + $0x78] sm:$0xff] }
 0x261   :  { %1268 = vmatpush.bf16.msrb.mxu1 %v6038_v37  ;;  %972 = vmatpush.bf16.msrb.mxu3 %v6032_v27 }
 0x263   :  { %1986 = vxpose.xlu2.c.b16.start.end [1/1] (short) (narrow) %v1984_v23, 32  ;;  %v2285_v30 = vpop.permute.xlu0 %2284 }
 0x264   :  { %2287 = vxpose.xlu0.c.b16.start.end [1/1] (short) (narrow) %v2285_v30, 32  ;;  %v839_v33 = vpop.f32.mrf.mxu0 }
 0x265   :  { %1269 = vmatpush.bf16.msrb.mxu1 %v6037_v40 }
 0x267   :  { %v3077_v54 = vpop.permute.xlu2 %3076 }
 0x26b   :  { %v7274_v44 = vpop.permute.xlu0 %2480 }
 0x26c   :  { %v841_v34 = vpop.f32.mrf.mxu0 }
 0x26d   :  { %v845_v35 = vpack.c.bf16 %v841_v34, %v839_v33 }
 0x26f   :  { %5210 = vmatmul.msk.bf16.gmra.mxu1 %vm665_vm1, %v845_v35  ;;  %v7300_v13 = vpop.permute.xlu2 %2795 }
 0x273   :  { %v7279_v49 = vpop.permute.xlu0 %2697 }
 0x276   :  { %v1032_v36 = vpop.f32.mrf.mxu0 }
 0x27b   :  { %v2777_v57 = vpop.permute.xlu0 %2776 }
 0x27e   :  { %v1034_v21 = vpop.f32.mrf.mxu0 }
 0x27f   :  { %v1042_v41 = vpack.c.bf16 %v1034_v21, %v1032_v36 }
 0x281   :  { %5233 = vmatmul.msk.bf16.vlgmr.msra.gmra.mxu1 %vm665_vm1, %v1042_v41 }
 0x283   :  { %2385 = vxpose.xlu2.c.b16.start.end [1/1] (short) (narrow) %v2383_v42, 32 }
 0x286   :  { %v1037_v43 = vpop.f32.mrf.mxu0 }
 0x28e   :  { %v1039_v45 = vpop.f32.mrf.mxu0 }
 0x28f   :  { %v1043_v46 = vpack.c.bf16 %v1039_v45, %v1037_v43 }
 0x291   :  { %5234 = vmatmul.msk.bf16.gmra.mxu1 %vm665_vm1, %v1043_v46 }
 0x296   :  { %v1228_v47 = vpop.f32.mrf.mxu0 }
 0x29e   :  { %v1230_v52 = vpop.f32.mrf.mxu0 }
 0x29f   :  { %v1238_v53 = vpack.c.bf16 %v1230_v52, %v1228_v47 }
 0x2a1   :  { %5257 = vmatmul.msk.bf16.vlgmr.msrb.gmra.mxu1 %vm665_vm1, %v1238_v53 }
 0x2a3   :  { %6603 = vxpose.binary.xlu2.c.b16.start.end [1/2] (short) (narrow) %v3077_v54, %v2777_v57, 32  ;;  %v6035_v57 = vld [vmem:[%s7867_s4 + $0x50] sm:$0xff] }
 0x2a6   :  { %v1233_v58 = vpop.f32.mrf.mxu0 }
 0x2ae   :  { %v1235_v59 = vpop.f32.mrf.mxu0 }
 0x2af   :  { %v1239_v61 = vpack.c.bf16 %v1235_v59, %v1233_v58 }
 0x2b1   :  { %5258 = vmatmul.msk.bf16.gmra.mxu1 %vm665_vm1, %v1239_v61 }
 0x2bc   :  { %v681_v15 = vpop.f32.mrf.mxu1 }
 0x2c4   :  { %v683_v25 = vpop.f32.mrf.mxu1 }
 0x2c5   :  { %v6192_v31 = vpack.c.bf16 %v683_v25, %v681_v15 }
 0x2c7   :  { %6193 = vst [vmem:[#allocation2 + $0xb0] sm:$0xff] %v6192_v31  }
 0x2ca   :  { %2100 = vrot.lane.b32.xlu1 %v7134_v55, %s6650_s3 }
 0x2cc   :  { %v6584_v62 = vpop.trf.xlu1  ;;  %v686_v1 = vpop.f32.mrf.mxu1 }
 0x2cd   :  { %5259 = vmatmul.msk.bf16.vlgmr.msrb.gmra.mxu2 %vm621_vm0, %v6584_v62 }
 0x2ce   :  { %1722 = vmatpush.bf16.msrb.mxu2 %v1707_v19  ;;  %v7305_v19 = vpop.permute.xlu2 %3095 }
 0x2d2   :  { %2678 = vrot.lane.b32.xlu1 %v7207_v56, %s6652_s16 }
 0x2d4   :  { %v6585_v5 = vpop.trf.xlu1  ;;  %v688_v6 = vpop.f32.mrf.mxu1 }
 0x2d5   :  { %5271 = vmatmul.msk.bf16.vlgmr.msra.gmra.mxu0 %vm621_vm0, %v6585_v5  ;;  %v6197_v7 = vpack.c.bf16 %v688_v6, %v686_v1 }
 0x2d6   :  { %1822 = vmatpush.bf16.msra.mxu0 %v7134_v55  ;;  %v741_v55 = vpop.f32.mrf.mxu2 }
 0x2d7   :  { %6509 = vst [vmem:[#allocation2 + $0x1b0] sm:$0xff] %v6197_v7  }
 0x2da   :  { %2401 = vrot.lane.b32.xlu1 %v7184_v22, %s6651_s15 }
 0x2dc   :  { %v6586_v63 = vpop.trf.xlu1  ;;  %v877_v12 = vpop.f32.mrf.mxu1 }
 0x2dd   :  { %5260 = vmatmul.msk.bf16.gmra.mxu2 %vm621_vm0, %v6586_v63 }
 0x2de   :  { %v743_v20 = vpop.f32.mrf.mxu2 }
 0x2df   :  { %v747_v23 = vpack.c.bf16 %v743_v20, %v741_v55  ;;  %v6041_v20 = vld [vmem:[%s7867_s4 + $0x80] sm:$0xff] }
 0x2e1   :  { %5198 = vmatmul.msk.bf16.gmra.mxu3 %vm665_vm1, %v747_v23 }
 0x2e2   :  { %2874 = vrot.lane.b32.xlu1 %v7207_v56, %s6650_s3 }
 0x2e4   :  { %v6587_v16 = vpop.trf.xlu1  ;;  %v879_v17 = vpop.f32.mrf.mxu1 }
 0x2e5   :  { %5272 = vmatmul.msk.bf16.gmra.mxu0 %vm621_vm0, %v6587_v16  ;;  %v6212_v18 = vpack.c.bf16 %v879_v17, %v877_v12  ;;  %v1600_v29 = vpop.trf.xlu2  ;;  %v6042_v12 = vld [vmem:[%s7867_s4 + $0x88] sm:$0xff]  ;;  %v6039_v16 = vld [vmem:[%s7867_s4 + $0x70] sm:$0xff] }
 0x2e6   :  { %v932_v28 = vpop.f32.mrf.mxu2  ;;  %1470 = vmatpush.bf16.msra.mxu1 %v6042_v12 }
 0x2e7   :  { %6512 = vst [vmem:[#allocation2 + $0x50] sm:$0xff] %v6212_v18  }
 0x2ea   :  { %3291 = vrot.lane.b32.xlu1 %v7227_v2, %s6650_s3  ;;  %1471 = vmatpush.bf16.msra.mxu1 %v6041_v20  ;;  %v6054_v20 = vld [vmem:[%s7867_s4 + $0xe8] sm:$0xff] }
 0x2ec   :  { %v882_v0 = vpop.f32.mrf.mxu1  ;;  %v6589_v26 = vpop.trf.xlu1 }
 0x2ed   :  { %5283 = vmatmul.msk.bf16.vlgmr.msra.gmra.mxu2 %vm621_vm0, %v7239_v8  ;;  %v6031_v8 = vld [vmem:[%s7867_s4 + $0x30] sm:$0xff] }
 0x2ee   :  { %1920 = vmatpush.bf16.msra.mxu2 %v7251_v14  ;;  %v934_v14 = vpop.f32.mrf.mxu2  ;;  %973 = vmatpush.bf16.msrb.mxu3 %v6031_v8  ;;  %v6043_v8 = vld [vmem:[%s7867_s4 + $0x90] sm:$0xff] }
 0x2ef   :  { %v942_v35 = vpack.c.bf16 %v934_v14, %v932_v28 }
 0x2f1   :  { %5221 = vmatmul.msk.bf16.vlgmr.msrb.gmra.mxu3 %vm665_vm1, %v942_v35 }
 0x2f4   :  { %v884_v30 = vpop.f32.mrf.mxu1  ;;  %v6590_v34 = vpop.trf.xlu1 }
 0x2f5   :  { %5295 = vmatmul.msk.bf16.vlgmr.msrb.gmra.mxu0 %vm621_vm0, %v1600_v29  ;;  %v6217_v33 = vpack.c.bf16 %v884_v30, %v882_v0  ;;  %v1601_v21 = vpop.trf.xlu2 }
 0x2f6   :  { %2018 = vmatpush.bf16.msrb.mxu0 %v7257_v24  ;;  %v937_v40 = vpop.f32.mrf.mxu2 }
 0x2f7   :  { %6513 = vst [vmem:[#allocation2 + $0x168] sm:$0xff] %v6217_v33  }
 0x2fc   :  { %v6591_v37 = vpop.trf.xlu1 }
 0x2fd   :  { %5284 = vmatmul.msk.bf16.gmra.mxu2 %vm621_vm0, %v7249_v32  ;;  %v6036_v32 = vld [vmem:[%s7867_s4 + $0x58] sm:$0xff] }
 0x2fe   :  { %v1075_v36 = vpop.f32.mrf.mxu1  ;;  %v939_v42 = vpop.f32.mrf.mxu2  ;;  %1170 = vmatpush.bf16.msra.mxu3 %v6036_v32 }
 0x2ff   :  { %v943_v45 = vpack.c.bf16 %v939_v42, %v937_v40 }
 0x301   :  { %5222 = vmatmul.msk.bf16.gmra.mxu3 %vm665_vm1, %v943_v45 }
 0x302   :  { %1171 = vmatpush.bf16.msra.mxu3 %v6035_v57  ;;  %v6048_v57 = vld [vmem:[%s7867_s4 + $0xb8] sm:$0xff] }
 0x304   :  { %v6592_v43 = vpop.trf.xlu1  ;;  %v1994_v3 = vpop.trf.xlu2 }
 0x305   :  { %5296 = vmatmul.msk.bf16.gmra.mxu0 %vm621_vm0, %v1601_v21 }
 0x306   :  { %v1077_v24 = vpop.f32.mrf.mxu1  ;;  %v1130_v47 = vpop.f32.mrf.mxu2  ;;  %1366 = vmatpush.bf16.msrb.mxu3 %v6040_v11 }
 0x307   :  { %v6232_v41 = vpack.c.bf16 %v1077_v24, %v1075_v36 }
 0x309   :  { %6516 = vst [vmem:[#allocation2 + $0x180] sm:$0xff] %v6232_v41  }
 0x30a   :  { %1367 = vmatpush.bf16.msrb.mxu3 %v6039_v16 }
 0x30c   :  { %v6594_v52 = vpop.trf.xlu1 }
 0x30d   :  { %5307 = vmatmul.msk.bf16.vlgmr.msrb.gmra.mxu2 %vm621_vm0, %v6589_v26 }
 0x30e   :  { %v1080_v46 = vpop.f32.mrf.mxu1  ;;  %v1132_v58 = vpop.f32.mrf.mxu2 }
 0x30f   :  { %v1140_v59 = vpack.c.bf16 %v1132_v58, %v1130_v47  ;;  %v6050_v58 = vld [vmem:[%s7867_s4 + $0xc8] sm:$0xff] }
 0x311   :  { %5245 = vmatmul.msk.bf16.vlgmr.msra.gmra.mxu3 %vm665_vm1, %v1140_v59 }
 0x314   :  { %v6595_v15 = vpop.trf.xlu1  ;;  %v1995_v9 = vpop.trf.xlu2 }
 0x315   :  { %5319 = vmatmul.msk.bf16.vlgmr.msra.gmra.mxu0 %vm621_vm0, %v6590_v34 }
 0x316   :  { %2220 = vmatpush.bf16.msra.mxu0 %v7184_v22  ;;  %v1082_v53 = vpop.f32.mrf.mxu1  ;;  %v7339_v22 = vpop.permute.xlu0 %2893 }
 0x317   :  { %v6237_v54 = vpack.c.bf16 %v1082_v53, %v1080_v46  ;;  %v1135_v25 = vpop.f32.mrf.mxu2 }
 0x319   :  { %6517 = vst [vmem:[#allocation2 + $0x110] sm:$0xff] %v6237_v54  }
 0x31c   :  { %3174 = vrot.lane.b32.xlu2 %v7214_v60, %s6651_s15  ;;  %v6596_v1 = vpop.trf.xlu1 }
 0x31d   :  { %5308 = vmatmul.msk.bf16.gmra.mxu2 %vm621_vm0, %v6591_v37 }
 0x31e   :  { %v1271_v61 = vpop.f32.mrf.mxu1  ;;  %v1896_v5 = vpop.trf.xlu0 }
 0x31f   :  { %v1137_v4 = vpop.f32.mrf.mxu2 }
 0x320   :  { %v1141_v6 = vpack.c.bf16 %v1137_v4, %v1135_v25  ;;  %v6047_v25 = vld [vmem:[%s7867_s4 + $0xb0] sm:$0xff] }
 0x322   :  { %5246 = vmatmul.msk.bf16.gmra.mxu3 %vm665_vm1, %v1141_v6 }
 0x324   :  { %3666 = vrot.lane.b32.xlu2 %v7125_v38, %s6650_s3  ;;  %v6597_v10 = vpop.trf.xlu1  ;;  %v7360_v18 = vpop.trf.xlu2 }
 0x325   :  { %5320 = vmatmul.msk.bf16.gmra.mxu0 %vm621_vm0, %v6592_v43 }
 0x326   :  { %v1273_v31 = vpop.f32.mrf.mxu1  ;;  %v1897_v17 = vpop.trf.xlu0 }
 0x327   :  { %v6252_v62 = vpack.c.bf16 %v1273_v31, %v1271_v61 }
 0x329   :  { %6520 = vst [vmem:[#allocation2 + $0x120] sm:$0xff] %v6252_v62  }
 0x32c   :  { %3568 = vrot.lane.b32.xlu2 %v7125_v38, %s6651_s15 }
 0x32d   :  { %5331 = vmatmul.msk.bf16.vlgmr.msra.gmra.mxu2 %vm621_vm0, %v1896_v5 }
 0x32e   :  { %v1276_v7 = vpop.f32.mrf.mxu1  ;;  %v2295_v46 = vpop.trf.xlu0 }
 0x334   :  { %3685 = vrot.lane.b32.xlu2 %v7195_v50, %s6650_s3  ;;  %v7369_v26 = vpop.trf.xlu2 }
 0x335   :  { %5343 = vmatmul.msk.bf16.vlgmr.msrb.gmra.mxu0 %vm621_vm0, %v1994_v3 }
 0x336   :  { %v1278_v63 = vpop.f32.mrf.mxu1 }
 0x337   :  { %v6257_v55 = vpack.c.bf16 %v1278_v63, %v1276_v7 }
 0x339   :  { %6521 = vst [vmem:[#allocation2 + $0x150] sm:$0xff] %v6257_v55  }
 0x33c   :  { %v2101_v23 = vpop.permute.xlu1 %2100  ;;  %3587 = vrot.lane.b32.xlu2 %v7195_v50, %s6651_s15 }
 0x33d   :  { %5332 = vmatmul.msk.bf16.gmra.mxu2 %vm621_vm0, %v1897_v17 }
 0x33e   :  { %2116 = vmatpush.bf16.msrb.mxu2 %v2101_v23 }
 0x342   :  { %2319 = vmatpush.bf16.msra.mxu2 %v7268_v39  ;;  %v6044_v39 = vld [vmem:[%s7867_s4 + $0x98] sm:$0xff] }
 0x343   :  { %1568 = vmatpush.bf16.msra.mxu3 %v6044_v39  ;;  %v6053_v39 = vld [vmem:[%s7867_s4 + $0xe0] sm:$0xff] }
 0x344   :  { %v2679_v0 = vpop.permute.xlu1 %2678  ;;  %v7375_v28 = vpop.trf.xlu2 }
 0x345   :  { %6608 = vxpose.binary.xlu1.c.b16.start.end [1/2] (short) (narrow) %v2679_v0, %v7274_v44, 32  ;;  %v6046_v44 = vld [vmem:[%s7867_s4 + $0xa8] sm:$0xff] }
 0x346   :  { %5344 = vmatmul.msk.bf16.gmra.mxu0 %vm621_vm0, %v1995_v9  ;;  %1666 = vmatpush.bf16.msrb.mxu1 %v6046_v44 }
 0x347   :  { %1569 = vmatpush.bf16.msra.mxu3 %v6043_v8 }
 0x34c   :  { %v2402_v27 = vpop.permute.xlu1 %2401  ;;  %v7386_v34 = vpop.trf.xlu2 }
 0x34d   :  { %5355 = vmatmul.msk.bf16.vlgmr.msrb.gmra.mxu2 %vm621_vm0, %v6594_v52  ;;  %2417 = vmatpush.bf16.msrb.mxu0 %v2402_v27  ;;  %v6051_v27 = vld [vmem:[%s7867_s4 + $0xd0] sm:$0xff] }
 0x34e   :  { %2515 = vmatpush.bf16.msrb.mxu2 %v7277_v48 }
 0x350   :  { %v1326_v29 = vpop.f32.mrf.mxu2 }
 0x352   :  { %v1430_v30 = vpop.f32.mrf.mxu0 }
 0x354   :  { %v2875_v33 = vpop.permute.xlu1 %2874  ;;  %v7397_v21 = vpop.trf.xlu2 }
 0x355   :  { %6598 = vxpose.binary.xlu0.c.b16.start.end [1/2] (short) (narrow) %v2875_v33, %v7207_v56, 32  ;;  %v6045_v56 = vld [vmem:[%s7867_s4 + $0xa0] sm:$0xff] }
 0x356   :  { %5367 = vmatmul.msk.bf16.vlgmr.msra.gmra.mxu0 %vm621_vm0, %v6595_v15  ;;  %1667 = vmatpush.bf16.msrb.mxu1 %v6045_v56 }
 0x357   :  { %2615 = vmatpush.bf16.msra.mxu0 %v7197_v51  ;;  %v779_v51 = vpop.f32.mrf.mxu3 }
 0x358   :  { %v1328_v48 = vpop.f32.mrf.mxu2 }
 0x359   :  { %v1336_v14 = vpack.c.bf16 %v1328_v48, %v1326_v29 }
 0x35a   :  { %v1432_v35 = vpop.f32.mrf.mxu0 }
 0x35b   :  { %v1440_v36 = vpack.c.bf16 %v1432_v35, %v1430_v30  ;;  %5269 = vmatmul.msk.bf16.vlgmr.msrb.gmra.mxu3 %vm665_vm1, %v1336_v14 }
 0x35c   :  { %v7401_v47 = vpop.trf.xlu2  ;;  %1764 = vmatpush.bf16.msrb.mxu3 %v6048_v57  ;;  %v6057_v57 = vld [vmem:[%s7867_s4] sm:$0xff] }
 0x35d   :  { %5281 = vmatmul.msk.bf16.vlgmr.msra.gmra.mxu1 %vm665_vm1, %v1440_v36  ;;  %5356 = vmatmul.msk.bf16.gmra.mxu2 %vm621_vm0, %v6596_v1  ;;  %v6049_v1 = vld [vmem:[%s7867_s4 + $0xc0] sm:$0xff] }
 0x35e   :  { %1864 = vmatpush.bf16.msra.mxu1 %v6050_v58 }
 0x35f   :  { %v781_v24 = vpop.f32.mrf.mxu3 }
 0x360   :  { %v1331_v37 = vpop.f32.mrf.mxu2  ;;  %v6202_v42 = vpack.c.bf16 %v781_v24, %v779_v51  ;;  %1765 = vmatpush.bf16.msrb.mxu3 %v6047_v25 }
 0x362   :  { %v1435_v40 = vpop.f32.mrf.mxu0  ;;  %6510 = vst [vmem:[#allocation2 + $0xd8] sm:$0xff] %v6202_v42   ;;  %1865 = vmatpush.bf16.msra.mxu1 %v6049_v1  ;;  %v6056_v42 = vld [vmem:[%s7867_s4 + $0xf8] sm:$0xff] }
 0x366   :  { %5368 = vmatmul.msk.bf16.gmra.mxu0 %vm621_vm0, %v6597_v10 }
 0x367   :  { %v784_v52 = vpop.f32.mrf.mxu3 }
 0x368   :  { %v1333_v41 = vpop.f32.mrf.mxu2 }
 0x369   :  { %v1337_v43 = vpack.c.bf16 %v1333_v41, %v1331_v37 }
 0x36a   :  { %v1437_v45 = vpop.f32.mrf.mxu0 }
 0x36b   :  { %v1441_v32 = vpack.c.bf16 %v1437_v45, %v1435_v40  ;;  %5270 = vmatmul.msk.bf16.gmra.mxu3 %vm665_vm1, %v1337_v43  ;;  %v6058_v43 = vld [vmem:[%s7867_s4 + $0x8] sm:$0xff] }
 0x36d   :  { %5282 = vmatmul.msk.bf16.gmra.mxu1 %vm665_vm1, %v1441_v32  ;;  %5379 = vmatmul.msk.bf16.vlgmr.msra.gmra.mxu2 %vm621_vm0, %v2295_v46 }
 0x36e   :  { %2713 = vmatpush.bf16.msra.mxu2 %v7279_v49 }
 0x36f   :  { %v786_v49 = vpop.f32.mrf.mxu3 }
 0x370   :  { %v1528_v53 = vpop.f32.mrf.mxu2  ;;  %v6207_v15 = vpack.c.bf16 %v786_v49, %v784_v52  ;;  %v6055_v52 = vld [vmem:[%s7867_s4 + $0xf0] sm:$0xff] }
 0x372   :  { %v1626_v54 = vpop.f32.mrf.mxu0  ;;  %6511 = vst [vmem:[#allocation2 + $0x18] sm:$0xff] %v6207_v15  }
 0x376   :  { %5391 = vmatmul.msk.bf16.vlgmr.msrb.gmra.mxu0 %vm621_vm0, %v7360_v18  ;;  %v7414_v59 = vpop.permute.xlu2 %3174  ;;  %v6052_v18 = vld [vmem:[%s7867_s4 + $0xd8] sm:$0xff] }
 0x377   :  { %2811 = vmatpush.bf16.msrb.mxu0 %v7300_v13  ;;  %v975_v4 = vpop.f32.mrf.mxu3 }
 0x378   :  { %v1530_v61 = vpop.f32.mrf.mxu2 }
 0x379   :  { %v1538_v31 = vpack.c.bf16 %v1530_v61, %v1528_v53  ;;  %v2296_v61 = vpop.trf.xlu0 }
 0x37a   :  { %v1628_v62 = vpop.f32.mrf.mxu0 }
 0x37b   :  { %v1636_v3 = vpack.c.bf16 %v1628_v62, %v1626_v54  ;;  %5293 = vmatmul.msk.bf16.vlgmr.msra.gmra.mxu3 %vm665_vm1, %v1538_v31 }
 0x37c   :  { %1962 = vmatpush.bf16.msra.mxu3 %v6052_v18  ;;  %v7470_v18 = vpop.permute.xlu1 %3291 }
 0x37d   :  { %5305 = vmatmul.msk.bf16.vlgmr.msrb.gmra.mxu1 %vm665_vm1, %v1636_v3  ;;  %5380 = vmatmul.msk.bf16.gmra.mxu2 %vm621_vm0, %v2296_v61 }
 0x37e   :  { %v3667_v13 = vpop.permute.xlu2 %3666  ;;  %2060 = vmatpush.bf16.msrb.mxu1 %v6054_v20 }
 0x37f   :  { %3669 = vxpose.xlu2.c.b16.start.end [1/1] (short) (narrow) %v3667_v13, 32  ;;  %v977_v7 = vpop.f32.mrf.mxu3 }
 0x380   :  { %v1533_v5 = vpop.f32.mrf.mxu2  ;;  %v6222_v10 = vpack.c.bf16 %v977_v7, %v975_v4  ;;  %1963 = vmatpush.bf16.msra.mxu3 %v6051_v27 }
 0x382   :  { %v1631_v6 = vpop.f32.mrf.mxu0  ;;  %6514 = vst [vmem:[#allocation2 + $0x130] sm:$0xff] %v6222_v10   ;;  %2061 = vmatpush.bf16.msrb.mxu1 %v6053_v39 }
 0x386   :  { %5392 = vmatmul.msk.bf16.gmra.mxu0 %vm621_vm0, %v7369_v26 }
 0x387   :  { %v980_v55 = vpop.f32.mrf.mxu3 }
 0x388   :  { %v1535_v9 = vpop.f32.mrf.mxu2 }
 0x389   :  { %v1539_v11 = vpack.c.bf16 %v1535_v9, %v1533_v5 }
 0x38a   :  { %v1633_v63 = vpop.f32.mrf.mxu0 }
 0x38b   :  { %v1637_v12 = vpack.c.bf16 %v1633_v63, %v1631_v6  ;;  %5294 = vmatmul.msk.bf16.gmra.mxu3 %vm665_vm1, %v1539_v11 }
 0x38d   :  { %5306 = vmatmul.msk.bf16.gmra.mxu1 %vm665_vm1, %v1637_v12 }
 0x38f   :  { %v982_v23 = vpop.f32.mrf.mxu3 }
 0x390   :  { %v1724_v16 = vpop.f32.mrf.mxu2  ;;  %v6227_v26 = vpack.c.bf16 %v982_v23, %v980_v55 }
 0x392   :  { %v1824_v17 = vpop.f32.mrf.mxu0  ;;  %6515 = vst [vmem:[#allocation2 + $0x48] sm:$0xff] %v6227_v26  }
 0x397   :  { %v1173_v44 = vpop.f32.mrf.mxu3 }
 0x398   :  { %v1726_v0 = vpop.f32.mrf.mxu2 }
 0x399   :  { %v1734_v29 = vpack.c.bf16 %v1726_v0, %v1724_v16 }
 0x39a   :  { %v1826_v30 = vpop.f32.mrf.mxu0 }
 0x39b   :  { %v1834_v33 = vpack.c.bf16 %v1826_v30, %v1824_v17  ;;  %5317 = vmatmul.msk.bf16.vlgmr.msrb.gmra.mxu3 %vm665_vm1, %v1734_v29 }
 0x39c   :  { %2158 = vmatpush.bf16.msrb.mxu3 %v6056_v42 }
 0x39d   :  { %5329 = vmatmul.msk.bf16.vlgmr.msra.gmra.mxu1 %vm665_vm1, %v1834_v33 }
 0x39e   :  { %2262 = vmatpush.bf16.msra.mxu1 %v6058_v43 }
 0x39f   :  { %v1175_v14 = vpop.f32.mrf.mxu3 }
 0x3a0   :  { %v1729_v48 = vpop.f32.mrf.mxu2  ;;  %v6242_v56 = vpack.c.bf16 %v1175_v14, %v1173_v44  ;;  %2159 = vmatpush.bf16.msrb.mxu3 %v6055_v52 }
 0x3a2   :  { %v1829_v8 = vpop.f32.mrf.mxu0  ;;  %6518 = vst [vmem:[#allocation2 + $0x118] sm:$0xff] %v6242_v56   ;;  %2263 = vmatpush.bf16.msra.mxu1 %v6057_v57 }
 0x3a7   :  { %v1178_v40 = vpop.f32.mrf.mxu3 }
 0x3a8   :  { %v1731_v35 = vpop.f32.mrf.mxu2 }
 0x3a9   :  { %v1735_v36 = vpack.c.bf16 %v1731_v35, %v1729_v48 }
 0x3aa   :  { %v1831_v51 = vpop.f32.mrf.mxu0 }
 0x3ab   :  { %v1835_v37 = vpack.c.bf16 %v1831_v51, %v1829_v8  ;;  %5318 = vmatmul.msk.bf16.gmra.mxu3 %vm665_vm1, %v1735_v36 }
 0x3ad   :  { %5330 = vmatmul.msk.bf16.gmra.mxu1 %vm665_vm1, %v1835_v37 }
 0x3af   :  { %v1180_v45 = vpop.f32.mrf.mxu3 }
 0x3b0   :  { %v1922_v24 = vpop.f32.mrf.mxu2  ;;  %v6247_v32 = vpack.c.bf16 %v1180_v45, %v1178_v40 }
 0x3b2   :  { %v2020_v41 = vpop.f32.mrf.mxu0  ;;  %6519 = vst [vmem:[#allocation2 + $0x98] sm:$0xff] %v6247_v32  }
 0x3b8   :  { %v1924_v46 = vpop.f32.mrf.mxu2 }
 0x3b9   :  { %v1932_v53 = vpack.c.bf16 %v1924_v46, %v1922_v24 }
 0x3ba   :  { %v2022_v54 = vpop.f32.mrf.mxu0 }
 0x3bb   :  { %v2030_v58 = vpack.c.bf16 %v2022_v54, %v2020_v41  ;;  %5341 = vmatmul.msk.bf16.vlgmr.msra.gmra.mxu3 %vm665_vm1, %v1932_v53 }
 0x3bd   :  { %5353 = vmatmul.msk.bf16.vlgmr.msrb.gmra.mxu1 %vm665_vm1, %v2030_v58 }
 0x3c0   :  { %v1927_v49 = vpop.f32.mrf.mxu2 }
 0x3c3   :  { %v2025_v15 = vpop.f32.mrf.mxu0 }
 0x3c8   :  { %v1929_v25 = vpop.f32.mrf.mxu2 }
 0x3c9   :  { %v1933_v31 = vpack.c.bf16 %v1929_v25, %v1927_v49 }
 0x3cb   :  { %v2027_v62 = vpop.f32.mrf.mxu0  ;;  %5342 = vmatmul.msk.bf16.gmra.mxu3 %vm665_vm1, %v1933_v31 }
 0x3cc   :  { %v2031_v1 = vpack.c.bf16 %v2027_v62, %v2025_v15 }
 0x3ce   :  { %5354 = vmatmul.msk.bf16.gmra.mxu1 %vm665_vm1, %v2031_v1 }
 0x3d0   :  { %v2118_v3 = vpop.f32.mrf.mxu2 }
 0x3d3   :  { %v2222_v13 = vpop.f32.mrf.mxu0  ;;  %3272 = vrot.lane.b32.xlu0 %v7214_v60, %s6650_s3 }
 0x3d8   :  { %v2120_v4 = vpop.f32.mrf.mxu2 }
 0x3d9   :  { %v2128_v5 = vpack.c.bf16 %v2120_v4, %v2118_v3  ;;  %v6060_v3 = vld [vmem:[%s7867_s4 + $0x18] sm:$0xff] }
 0x3da   :  { %v1473_v6 = vpop.f32.mrf.mxu1  ;;  %2361 = vmatpush.bf16.msra.mxu3 %v6060_v3 }
 0x3db   :  { %v2224_v7 = vpop.f32.mrf.mxu0  ;;  %5365 = vmatmul.msk.bf16.vlgmr.msrb.gmra.mxu3 %vm665_vm1, %v2128_v5  ;;  %3193 = vrot.lane.b32.xlu0 %v7227_v2, %s6651_s15  ;;  %v6059_v5 = vld [vmem:[%s7867_s4 + $0x10] sm:$0xff] }
 0x3dc   :  { %v2232_v9 = vpack.c.bf16 %v2224_v7, %v2222_v13 }
 0x3de   :  { %5377 = vmatmul.msk.bf16.vlgmr.msra.gmra.mxu1 %vm665_vm1, %v2232_v9  ;;  %v1369_v10 = vpop.f32.mrf.mxu3  ;;  %2362 = vmatpush.bf16.msra.mxu3 %v6059_v5  ;;  %v6071_v5 = vld [vmem:[%s7867_s4 + $0x70] sm:$0xff] }
 0x3e0   :  { %v2123_v11 = vpop.f32.mrf.mxu2 }
 0x3e2   :  { %v1475_v63 = vpop.f32.mrf.mxu1 }
 0x3e3   :  { %v6272_v12 = vpack.c.bf16 %v1475_v63, %v1473_v6  ;;  %v2227_v55 = vpop.f32.mrf.mxu0  ;;  %3489 = vrot.lane.b32.xlu0 %v7195_v50, %s6652_s16 }
 0x3e5   :  { %6524 = vst [vmem:[#allocation2 + $0xe0] sm:$0xff] %v6272_v12  }
 0x3e6   :  { %v1371_v16 = vpop.f32.mrf.mxu3 }
 0x3e7   :  { %v6262_v17 = vpack.c.bf16 %v1371_v16, %v1369_v10 }
 0x3e8   :  { %v2125_v20 = vpop.f32.mrf.mxu2 }
 0x3e9   :  { %6522 = vst [vmem:[#allocation2 + $0x108] sm:$0xff] %v6262_v17   ;;  %v2129_v23 = vpack.c.bf16 %v2125_v20, %v2123_v11 }
 0x3ea   :  { %v1478_v0 = vpop.f32.mrf.mxu1 }
 0x3eb   :  { %v2229_v26 = vpop.f32.mrf.mxu0  ;;  %5366 = vmatmul.msk.bf16.gmra.mxu3 %vm665_vm1, %v2129_v23 }
 0x3ec   :  { %v2233_v27 = vpack.c.bf16 %v2229_v26, %v2227_v55 }
 0x3ee   :  { %5378 = vmatmul.msk.bf16.gmra.mxu1 %vm665_vm1, %v2233_v27  ;;  %v1374_v29 = vpop.f32.mrf.mxu3 }
 0x3f0   :  { %v2321_v1 = vpop.f32.mrf.mxu2 }
 0x3f1   :  { %v6609_v30 = vpop.trf.xlu1 }
 0x3f2   :  { %v1480_v39 = vpop.f32.mrf.mxu1  ;;  %5403 = vmatmul.msk.bf16.vlgmr.msrb.gmra.mxu2 %vm621_vm0, %v6609_v30 }
 0x3f3   :  { %v6277_v33 = vpack.c.bf16 %v1480_v39, %v1478_v0  ;;  %2909 = vmatpush.bf16.msrb.mxu2 %v7339_v22  ;;  %v6062_v39 = vld [vmem:[%s7867_s4 + $0x28] sm:$0xff] }
 0x3f4   :  { %2459 = vmatpush.bf16.msrb.mxu1 %v6062_v39 }
 0x3f5   :  { %6525 = vst [vmem:[#allocation2 + $0x188] sm:$0xff] %v6277_v33   ;;  %v6061_v33 = vld [vmem:[%s7867_s4 + $0x20] sm:$0xff] }
 0x3f6   :  { %v1376_v44 = vpop.f32.mrf.mxu3 }
 0x3f7   :  { %v6267_v48 = vpack.c.bf16 %v1376_v44, %v1374_v29  ;;  %v2419_v29 = vpop.f32.mrf.mxu0 }
 0x3f8   :  { %v2323_v6 = vpop.f32.mrf.mxu2  ;;  %2460 = vmatpush.bf16.msrb.mxu1 %v6061_v33 }
 0x3f9   :  { %6523 = vst [vmem:[#allocation2 + $0x60] sm:$0xff] %v6267_v48   ;;  %v6610_v8 = vpop.trf.xlu1  ;;  %v2331_v7 = vpack.c.bf16 %v2323_v6, %v2321_v1 }
 0x3fa   :  { %v1669_v14 = vpop.f32.mrf.mxu1 }
 0x3fb   :  { %5389 = vmatmul.msk.bf16.vlgmr.msra.gmra.mxu3 %vm665_vm1, %v2331_v7 }
 0x3fe   :  { %v1571_v35 = vpop.f32.mrf.mxu3 }
 0x3ff   :  { %v2421_v48 = vpop.f32.mrf.mxu0 }
 0x400   :  { %v2326_v12 = vpop.f32.mrf.mxu2 }
 0x401   :  { %v6611_v56 = vpop.trf.xlu1  ;;  %v6599_v36 = vpop.trf.xlu0 }
 0x402   :  { %v1671_v51 = vpop.f32.mrf.mxu1  ;;  %5404 = vmatmul.msk.bf16.gmra.mxu2 %vm621_vm0, %v6611_v56  ;;  %5415 = vmatmul.msk.bf16.vlgmr.msra.gmra.mxu0 %vm621_vm0, %v6599_v36 }
 0x403   :  { %v6292_v37 = vpack.c.bf16 %v1671_v51, %v1669_v14  ;;  %3013 = vmatpush.bf16.msra.mxu0 %v7227_v2 }
 0x405   :  { %6528 = vst [vmem:[#allocation2 + $0x80] sm:$0xff] %v6292_v37  }
 0x406   :  { %v1573_v40 = vpop.f32.mrf.mxu3 }
 0x407   :  { %v6282_v22 = vpack.c.bf16 %v1573_v40, %v1571_v35  ;;  %v2429_v35 = vpack.c.bf16 %v2421_v48, %v2419_v29  ;;  %v2424_v51 = vpop.f32.mrf.mxu0 }
 0x408   :  { %v2328_v20 = vpop.f32.mrf.mxu2 }
 0x409   :  { %6526 = vst [vmem:[#allocation2 + $0x138] sm:$0xff] %v6282_v22   ;;  %v6600_v24 = vpop.trf.xlu0  ;;  %v6612_v54 = vpop.trf.xlu1  ;;  %v2332_v23 = vpack.c.bf16 %v2328_v20, %v2326_v12  ;;  %5401 = vmatmul.msk.bf16.vlgmr.msrb.gmra.mxu1 %vm665_vm1, %v2429_v35 }
 0x40a   :  { %v1674_v41 = vpop.f32.mrf.mxu1 }
 0x40b   :  { %5390 = vmatmul.msk.bf16.gmra.mxu3 %vm665_vm1, %v2332_v23 }
 0x40e   :  { %v1576_v42 = vpop.f32.mrf.mxu3 }
 0x411   :  { %v6601_v43 = vpop.trf.xlu0 }
 0x412   :  { %v1676_v45 = vpop.f32.mrf.mxu1  ;;  %5427 = vmatmul.msk.bf16.vlgmr.msra.gmra.mxu2 %vm621_vm0, %v6610_v8  ;;  %5416 = vmatmul.msk.bf16.gmra.mxu0 %vm621_vm0, %v6601_v43  ;;  %v6063_v8 = vld [vmem:[%s7867_s4 + $0x30] sm:$0xff] }
 0x413   :  { %v6297_v46 = vpack.c.bf16 %v1676_v45, %v1674_v41  ;;  %3111 = vmatpush.bf16.msra.mxu2 %v7305_v19 }
 0x415   :  { %6529 = vst [vmem:[#allocation2 + $0x1a8] sm:$0xff] %v6297_v46  }
 0x416   :  { %v1578_v32 = vpop.f32.mrf.mxu3 }
 0x417   :  { %v6287_v52 = vpack.c.bf16 %v1578_v32, %v1576_v42  ;;  %v6068_v32 = vld [vmem:[%s7867_s4 + $0x58] sm:$0xff] }
 0x419   :  { %6527 = vst [vmem:[#allocation2 + $0x140] sm:$0xff] %v6287_v52   ;;  %v6602_v4 = vpop.trf.xlu0 }
 0x41a   :  { %v1867_v2 = vpop.f32.mrf.mxu1 }
 0x41e   :  { %v1767_v53 = vpop.f32.mrf.mxu3 }
 0x422   :  { %v1869_v57 = vpop.f32.mrf.mxu1  ;;  %5428 = vmatmul.msk.bf16.gmra.mxu2 %vm621_vm0, %v6612_v54  ;;  %5439 = vmatmul.msk.bf16.vlgmr.msrb.gmra.mxu0 %vm621_vm0, %v7375_v28 }
 0x423   :  { %v6312_v58 = vpack.c.bf16 %v1869_v57, %v1867_v2  ;;  %v6067_v57 = vld [vmem:[%s7867_s4 + $0x50] sm:$0xff] }
 0x425   :  { %6532 = vst [vmem:[#allocation2 + $0x1e8] sm:$0xff] %v6312_v58  }
 0x426   :  { %v1769_v49 = vpop.f32.mrf.mxu3 }
 0x427   :  { %v6302_v61 = vpack.c.bf16 %v1769_v49, %v1767_v53  ;;  %v6065_v53 = vld [vmem:[%s7867_s4 + $0x40] sm:$0xff] }
 0x429   :  { %6530 = vst [vmem:[#allocation2 + $0x1b8] sm:$0xff] %v6302_v61  }
 0x42a   :  { %v1872_v15 = vpop.f32.mrf.mxu1 }
 0x42e   :  { %v1772_v19 = vpop.f32.mrf.mxu3 }
 0x432   :  { %v1874_v25 = vpop.f32.mrf.mxu1  ;;  %5451 = vmatmul.msk.bf16.vlgmr.msrb.gmra.mxu2 %vm621_vm0, %v6600_v24  ;;  %5440 = vmatmul.msk.bf16.gmra.mxu0 %vm621_vm0, %v7397_v21  ;;  %v2426_v24 = vpop.f32.mrf.mxu0 }
 0x433   :  { %v6317_v31 = vpack.c.bf16 %v1874_v25, %v1872_v15  ;;  %3307 = vmatpush.bf16.msrb.mxu2 %v7470_v18  ;;  %v2430_v42 = vpack.c.bf16 %v2426_v24, %v2424_v51 }
 0x435   :  { %6533 = vst [vmem:[#allocation2 + $0xf8] sm:$0xff] %v6317_v31   ;;  %5402 = vmatmul.msk.bf16.gmra.mxu1 %vm665_vm1, %v2430_v42 }
 0x436   :  { %v1774_v62 = vpop.f32.mrf.mxu3 }
 0x437   :  { %v6307_v28 = vpack.c.bf16 %v1774_v62, %v1772_v19 }
 0x439   :  { %6531 = vst [vmem:[#allocation2 + $0x28] sm:$0xff] %v6307_v28   ;;  %v6072_v28 = vld [vmem:[%s7867_s4 + $0x78] sm:$0xff] }
 0x43a   :  { %v2063_v13 = vpop.f32.mrf.mxu1 }
 0x43e   :  { %v1965_v21 = vpop.f32.mrf.mxu3 }
 0x442   :  { %v2065_v9 = vpop.f32.mrf.mxu1  ;;  %5452 = vmatmul.msk.bf16.gmra.mxu2 %vm621_vm0, %v6602_v4 }
 0x443   :  { %v6332_v10 = vpack.c.bf16 %v2065_v9, %v2063_v13 }
 0x445   :  { %6536 = vst [vmem:[#allocation2 + $0x1e0] sm:$0xff] %v6332_v10   ;;  %v3273_v11 = vpop.permute.xlu0 %3272 }
 0x446   :  { %v1967_v63 = vpop.f32.mrf.mxu3  ;;  %6613 = vxpose.binary.xlu1.c.b16.start.end [1/2] (short) (narrow) %v3273_v11, %v7214_v60, 32 }
 0x447   :  { %v6322_v55 = vpack.c.bf16 %v1967_v63, %v1965_v21 }
 0x449   :  { %6534 = vst [vmem:[#allocation2 + $0x160] sm:$0xff] %v6322_v55  }
 0x44b   :  { %v2068_v16 = vpop.f32.mrf.mxu1 }
 0x44d   :  { %v3194_v17 = vpop.permute.xlu0 %3193 }
 0x44e   :  { %v1970_v18 = vpop.f32.mrf.mxu3  ;;  %3209 = vmatpush.bf16.msrb.mxu0 %v3194_v17 }
 0x452   :  { %5475 = vmatmul.msk.bf16.vlgmr.msra.gmra.mxu2 %vm621_vm0, %v7386_v34  ;;  %v6064_v34 = vld [vmem:[%s7867_s4 + $0x38] sm:$0xff] }
 0x453   :  { %v2070_v0 = vpop.f32.mrf.mxu1  ;;  %2557 = vmatpush.bf16.msrb.mxu3 %v6064_v34  ;;  %v7545_v34 = vpop.permute.xlu2 %3568 }
 0x454   :  { %v6337_v26 = vpack.c.bf16 %v2070_v0, %v2068_v16 }
 0x455   :  { %v3490_v27 = vpop.permute.xlu0 %3489 }
 0x456   :  { %6537 = vst [vmem:[#allocation2] sm:$0xff] %v6337_v26   ;;  %v1972_v60 = vpop.f32.mrf.mxu3  ;;  %3505 = vmatpush.bf16.msra.mxu2 %v3490_v27 }
 0x457   :  { %v6327_v30 = vpack.c.bf16 %v1972_v60, %v1970_v18  ;;  %2558 = vmatpush.bf16.msrb.mxu3 %v6063_v8 }
 0x459   :  { %6535 = vst [vmem:[#allocation2 + $0x30] sm:$0xff] %v6327_v30  }
 0x45b   :  { %v2265_v44 = vpop.f32.mrf.mxu1  ;;  %2755 = vmatpush.bf16.msra.mxu3 %v6068_v32  ;;  %v3686_v8 = vpop.permute.xlu2 %3685 }
 0x45e   :  { %v2161_v14 = vpop.f32.mrf.mxu3 }
 0x45f   :  { %2756 = vmatpush.bf16.msra.mxu3 %v6067_v57  ;;  %v6069_v57 = vld [vmem:[%s7867_s4 + $0x60] sm:$0xff] }
 0x462   :  { %5476 = vmatmul.msk.bf16.gmra.mxu2 %vm621_vm0, %v7401_v47  ;;  %v6066_v47 = vld [vmem:[%s7867_s4 + $0x48] sm:$0xff] }
 0x463   :  { %v2267_v56 = vpop.f32.mrf.mxu1  ;;  %2657 = vmatpush.bf16.msra.mxu1 %v6066_v47 }
 0x464   :  { %v6352_v36 = vpack.c.bf16 %v2267_v56, %v2265_v44 }
 0x466   :  { %6353 = vst [vmem:[#allocation2 + $0x148] sm:$0xff] %v6352_v36   ;;  %v2163_v37 = vpop.f32.mrf.mxu3 }
 0x467   :  { %v6342_v40 = vpack.c.bf16 %v2163_v37, %v2161_v14  ;;  %2658 = vmatpush.bf16.msra.mxu1 %v6065_v53 }
 0x469   :  { %6538 = vst [vmem:[#allocation2 + $0xf0] sm:$0xff] %v6342_v40  }
 0x46b   :  { %v2270_v22 = vpop.f32.mrf.mxu1 }
 0x46e   :  { %v2166_v41 = vpop.f32.mrf.mxu3 }
 0x473   :  { %v2272_v43 = vpop.f32.mrf.mxu1 }
 0x474   :  { %v6357_v45 = vpack.c.bf16 %v2272_v43, %v2270_v22 }
 0x475   :  { %v2517_v46 = vpop.f32.mrf.mxu2 }
 0x476   :  { %6540 = vst [vmem:[#allocation2 + $0x1d0] sm:$0xff] %v6357_v45   ;;  %v2168_v52 = vpop.f32.mrf.mxu3 }
 0x477   :  { %v6347_v2 = vpack.c.bf16 %v2168_v52, %v2166_v41 }
 0x479   :  { %6539 = vst [vmem:[#allocation2 + $0x8] sm:$0xff] %v6347_v2  }
 0x47d   :  { %v2519_v54 = vpop.f32.mrf.mxu2 }
 0x47e   :  { %v2527_v58 = vpack.c.bf16 %v2519_v54, %v2517_v46  ;;  %v2364_v55 = vpop.f32.mrf.mxu3  ;;  %v6070_v54 = vld [vmem:[%s7867_s4 + $0x68] sm:$0xff] }
 0x47f   :  { %v2617_v49 = vpop.f32.mrf.mxu0  ;;  %2853 = vmatpush.bf16.msrb.mxu1 %v6070_v54 }
 0x480   :  { %5413 = vmatmul.msk.bf16.vlgmr.msrb.gmra.mxu3 %vm665_vm1, %v2527_v58 }
 0x481   :  { %2951 = vmatpush.bf16.msrb.mxu3 %v6072_v28 }
 0x483   :  { %2854 = vmatpush.bf16.msrb.mxu1 %v6069_v57  ;;  %v5633_v57 = vld [vmem:[%s7865_s2 + $0x68] sm:$0xf] }
 0x485   :  { %v2522_v61 = vpop.f32.mrf.mxu2  ;;  %2952 = vmatpush.bf16.msrb.mxu3 %v6071_v5 }
 0x486   :  { %v2366_v17 = vpop.f32.mrf.mxu3  ;;  %v2462_v26 = vpop.f32.mrf.mxu1 }
 0x487   :  { %v2619_v15 = vpop.f32.mrf.mxu0  ;;  %v6362_v20 = vpack.c.bf16 %v2366_v17, %v2364_v55  ;;  %v6079_v55 = vld [vmem:[%s7867_s4 + $0xb0] sm:$0xff] }
 0x488   :  { %v2627_v19 = vpack.c.bf16 %v2619_v15, %v2617_v49 }
 0x489   :  { %6541 = vst [vmem:[#allocation2 + $0x100] sm:$0xff] %v6362_v20  }
 0x48a   :  { %5425 = vmatmul.msk.bf16.vlgmr.msra.gmra.mxu1 %vm665_vm1, %v2627_v19 }
 0x48d   :  { %v2524_v25 = vpop.f32.mrf.mxu2 }
 0x48e   :  { %v2528_v31 = vpack.c.bf16 %v2524_v25, %v2522_v61  ;;  %v2369_v23 = vpop.f32.mrf.mxu3  ;;  %v2464_v29 = vpop.f32.mrf.mxu1  ;;  %v6076_v25 = vld [vmem:[%s7867_s4 + $0x98] sm:$0xff] }
 0x48f   :  { %v2622_v62 = vpop.f32.mrf.mxu0  ;;  %v6372_v60 = vpack.c.bf16 %v2464_v29, %v2462_v26 }
 0x490   :  { %5414 = vmatmul.msk.bf16.gmra.mxu3 %vm665_vm1, %v2528_v31 }
 0x491   :  { %6543 = vst [vmem:[#allocation2 + $0x40] sm:$0xff] %v6372_v60  }
 0x495   :  { %v2715_v1 = vpop.f32.mrf.mxu2 }
 0x496   :  { %v2371_v0 = vpop.f32.mrf.mxu3 }
 0x497   :  { %v2624_v3 = vpop.f32.mrf.mxu0  ;;  %v6367_v27 = vpack.c.bf16 %v2371_v0, %v2369_v23 }
 0x498   :  { %v2628_v13 = vpack.c.bf16 %v2624_v3, %v2622_v62  ;;  %v6075_v62 = vld [vmem:[%s7867_s4 + $0x90] sm:$0xff] }
 0x499   :  { %6542 = vst [vmem:[#allocation2 + $0xc8] sm:$0xff] %v6367_v27  }
 0x49a   :  { %5426 = vmatmul.msk.bf16.gmra.mxu1 %vm665_vm1, %v2628_v13 }
 0x49d   :  { %v2717_v4 = vpop.f32.mrf.mxu2 }
 0x49e   :  { %v2725_v21 = vpack.c.bf16 %v2717_v4, %v2715_v1 }
 0x49f   :  { %v2813_v2 = vpop.f32.mrf.mxu0 }
 0x4a0   :  { %5437 = vmatmul.msk.bf16.vlgmr.msra.gmra.mxu3 %vm665_vm1, %v2725_v21 }
 0x4a1   :  { %3153 = vmatpush.bf16.msra.mxu3 %v6076_v25 }
 0x4a5   :  { %v2720_v6 = vpop.f32.mrf.mxu2  ;;  %3154 = vmatpush.bf16.msra.mxu3 %v6075_v62  ;;  %v5689_v62 = vld [vmem:[%s7865_s2 + $0xe0] sm:$0xf] }
 0x4a7   :  { %v2815_v58 = vpop.f32.mrf.mxu0 }
 0x4a8   :  { %v2823_v49 = vpack.c.bf16 %v2815_v58, %v2813_v2  ;;  %v6112_v2 = vld [vmem:[%s7865_s2 + $0x94] sm:$0xf0] }
 0x4a9   :  { %v6108_v58 = vld [vmem:[%s7865_s2 + $0x74] sm:$0xf0] }
 0x4aa   :  { %5449 = vmatmul.msk.bf16.vlgmr.msrb.gmra.mxu1 %vm665_vm1, %v2823_v49 }
 0x4ad   :  { %v2722_v7 = vpop.f32.mrf.mxu2 }
 0x4ae   :  { %v2726_v9 = vpack.c.bf16 %v2722_v7, %v2720_v6 }
 0x4af   :  { %v2818_v19 = vpop.f32.mrf.mxu0 }
 0x4b0   :  { %3470 = vrot.lane.b32.xlu1 %v7125_v38, %s6652_s16  ;;  %5438 = vmatmul.msk.bf16.gmra.mxu3 %vm665_vm1, %v2726_v9 }
 0x4b2   :  { %v2467_v30 = vpop.f32.mrf.mxu1 }
 0x4b5   :  { %v2911_v10 = vpop.f32.mrf.mxu2 }
 0x4b7   :  { %v2820_v28 = vpop.f32.mrf.mxu0 }
 0x4b8   :  { %v2824_v13 = vpack.c.bf16 %v2820_v28, %v2818_v19  ;;  %v6104_v19 = vld [vmem:[%s7865_s2 + $0x54] sm:$0xf0]  ;;  %v5601_v28 = vld [vmem:[%s7865_s2 + $0x28] sm:$0xf] }
 0x4ba   :  { %v2469_v33 = vpop.f32.mrf.mxu1  ;;  %5450 = vmatmul.msk.bf16.gmra.mxu1 %vm665_vm1, %v2824_v13 }
 0x4bb   :  { %v6377_v44 = vpack.c.bf16 %v2469_v33, %v2467_v30 }
 0x4bd   :  { %v2913_v11 = vpop.f32.mrf.mxu2  ;;  %6544 = vst [vmem:[#allocation2 + $0x1f8] sm:$0xff] %v6377_v44  }
 0x4be   :  { %v2921_v63 = vpack.c.bf16 %v2913_v11, %v2911_v10  ;;  %v6073_v10 = vld [vmem:[%s7867_s4 + $0x80] sm:$0xff] }
 0x4c0   :  { %5461 = vmatmul.msk.bf16.vlgmr.msrb.gmra.mxu3 %vm665_vm1, %v2921_v63 }
 0x4c5   :  { %v2916_v12 = vpop.f32.mrf.mxu2 }
 0x4cd   :  { %v2918_v16 = vpop.f32.mrf.mxu2 }
 0x4ce   :  { %v2922_v18 = vpack.c.bf16 %v2918_v16, %v2916_v12  ;;  %v6080_v12 = vld [vmem:[%s7867_s4 + $0xb8] sm:$0xff] }
 0x4cf   :  { %3349 = vmatpush.bf16.msrb.mxu3 %v6080_v12 }
 0x4d0   :  { %5462 = vmatmul.msk.bf16.gmra.mxu3 %vm665_vm1, %v2922_v18 }
 0x4d3   :  { %3350 = vmatpush.bf16.msrb.mxu3 %v6079_v55 }
 0x4f2   :  { %v6614_v39 = vpop.trf.xlu1 }
 0x4f3   :  { %5463 = vmatmul.msk.bf16.vlgmr.msra.gmra.mxu0 %vm621_vm0, %v6614_v39 }
 0x4f4   :  { %3407 = vmatpush.bf16.msra.mxu0 %v7195_v50 }
 0x4fa   :  { %v6615_v48 = vpop.trf.xlu1 }
 0x4fb   :  { %5499 = vmatmul.msk.bf16.vlgmr.msrb.gmra.mxu2 %vm621_vm0, %v6615_v48 }
 0x4fc   :  { %3701 = vmatpush.bf16.msrb.mxu2 %v3686_v8 }
 0x502   :  { %v6616_v14 = vpop.trf.xlu1 }
 0x503   :  { %v2560_v35 = vpop.f32.mrf.mxu3  ;;  %5464 = vmatmul.msk.bf16.gmra.mxu0 %vm621_vm0, %v6616_v14 }
 0x507   :  { %v2660_v56 = vpop.f32.mrf.mxu1 }
 0x50a   :  { %v6617_v36 = vpop.trf.xlu1 }
 0x50b   :  { %v2562_v51 = vpop.f32.mrf.mxu3  ;;  %5500 = vmatmul.msk.bf16.gmra.mxu2 %vm621_vm0, %v6617_v36  ;;  %v5697_v36 = vld [vmem:[%s7865_s2 + $0xe8] sm:$0xf] }
 0x50c   :  { %v6382_v37 = vpack.c.bf16 %v2562_v51, %v2560_v35  ;;  %v3588_v35 = vpop.permute.xlu2 %3587  ;;  %v6124_v51 = vld [vmem:[%s7865_s2 + $0xf4] sm:$0xf0] }
 0x50e   :  { %6545 = vst [vmem:[#allocation2 + $0x20] sm:$0xff] %v6382_v37  }
 0x50f   :  { %v2662_v50 = vpop.f32.mrf.mxu1 }
 0x510   :  { %v6392_v40 = vpack.c.bf16 %v2662_v50, %v2660_v56 }
 0x512   :  { %6547 = vst [vmem:[#allocation2 + $0x1a0] sm:$0xff] %v6392_v40   ;;  %v5698_v40 = vor.u32 %v6124_v51, %v5697_v36  ;;  %v5577_v51 = vld [vmem:[%s7865_s2] sm:$0xf] }
 0x513   :  { %v2565_v22 = vpop.f32.mrf.mxu3 }
 0x514   :  { %v3677_v12 = vpop.trf.xlu2 }
 0x517   :  { %v2665_v24 = vpop.f32.mrf.mxu1 }
 0x51b   :  { %v2567_v41 = vpop.f32.mrf.mxu3 }
 0x51c   :  { %v6387_v42 = vpack.c.bf16 %v2567_v41, %v2565_v22  ;;  %v6120_v41 = vld [vmem:[%s7865_s2 + $0xd4] sm:$0xf0] }
 0x51e   :  { %6546 = vst [vmem:[#allocation2 + $0x128] sm:$0xff] %v6387_v42  }
 0x51f   :  { %v2667_v43 = vpop.f32.mrf.mxu1 }
 0x520   :  { %v6397_v45 = vpack.c.bf16 %v2667_v43, %v2665_v24  ;;  %v5681_v24 = vld [vmem:[%s7865_s2 + $0xc8] sm:$0xf] }
 0x521   :  { %v5682_v43 = vor.u32 %v6120_v41, %v5681_v24  ;;  %v6143_v24 = vld [vmem:[#allocation2 + $0x138] sm:$0xff] }
 0x522   :  { %v3471_v46 = vpop.permute.xlu1 %3470  ;;  %6548 = vst [vmem:[#allocation2 + $0x1f0] sm:$0xff] %v6397_v45   ;;  %v5665_v45 = vld [vmem:[%s7865_s2 + $0xa8] sm:$0xf] }
 0x523   :  { %v2758_v47 = vpop.f32.mrf.mxu3  ;;  %6618 = vxpose.binary.xlu0.c.b16.start.end [1/2] (short) (narrow) %v3471_v46, %v7414_v59, 32  ;;  %v3113_v59 = vpop.f32.mrf.mxu2  ;;  %v6116_v46 = vld [vmem:[%s7865_s2 + $0xb4] sm:$0xf0] }
 0x52b   :  { %v2760_v32 = vpop.f32.mrf.mxu3  ;;  %v3115_v1 = vpop.f32.mrf.mxu2 }
 0x52c   :  { %v6402_v52 = vpack.c.bf16 %v2760_v32, %v2758_v47  ;;  %v3123_v3 = vpack.c.bf16 %v3115_v1, %v3113_v59  ;;  %v5666_v32 = vor.u32 %v6116_v46, %v5665_v45  ;;  %v5617_v59 = vld [vmem:[%s7865_s2 + $0x48] sm:$0xf]  ;;  %v6123_v1 = vld [vmem:[%s7865_s2 + $0xec] sm:$0xf0] }
 0x52d   :  { %v5690_v13 = vor.u32 %v6123_v1, %v5689_v62  ;;  %v6142_v45 = vld [vmem:[#allocation2 + $0x188] sm:$0xff]  ;;  %v6077_v62 = vld [vmem:[%s7867_s4 + $0xa0] sm:$0xff]  ;;  %v6126_v1 = vld [vmem:[#allocation2 + $0x1b0] sm:$0xff] }
 0x52e   :  { %6549 = vst [vmem:[#allocation2 + $0xe8] sm:$0xff] %v6402_v52   ;;  %5485 = vmatmul.msk.bf16.vlgmr.msra.gmra.mxu3 %vm665_vm1, %v3123_v3  ;;  %v5649_v52 = vld [vmem:[%s7865_s2 + $0x88] sm:$0xf]  ;;  %v6100_v3 = vld [vmem:[%s7865_s2 + $0x34] sm:$0xf0] }
 0x52f   :  { %v5650_v54 = vor.u32 %v6112_v2, %v5649_v52  ;;  %v6141_v52 = vld [vmem:[#allocation2 + $0xe0] sm:$0xff] }
 0x533   :  { %v2763_v53 = vpop.f32.mrf.mxu3  ;;  %v3118_v21 = vpop.f32.mrf.mxu2 }
 0x53b   :  { %v2765_v61 = vpop.f32.mrf.mxu3  ;;  %v3120_v7 = vpop.f32.mrf.mxu2 }
 0x53c   :  { %v6407_v15 = vpack.c.bf16 %v2765_v61, %v2763_v53  ;;  %v3124_v9 = vpack.c.bf16 %v3120_v7, %v3118_v21  ;;  %v5634_v61 = vor.u32 %v6108_v58, %v5633_v57  ;;  %v6119_v21 = vld [vmem:[%s7865_s2 + $0xcc] sm:$0xf0]  ;;  %v6078_v57 = vld [vmem:[%s7867_s4 + $0xa8] sm:$0xff] }
 0x53d   :  { %v6130_v58 = vld [vmem:[#allocation2 + $0x168] sm:$0xff] }
 0x53e   :  { %6550 = vst [vmem:[#allocation2 + $0x78] sm:$0xff] %v6407_v15   ;;  %5486 = vmatmul.msk.bf16.gmra.mxu3 %vm665_vm1, %v3124_v9 }
 0x543   :  { %v2954_v31 = vpop.f32.mrf.mxu3  ;;  %3374 = vxpose.xlu0.c.b16.start.end [1/1] (short) (narrow) %v7125_v38, 32  ;;  %v6074_v38 = vld [vmem:[%s7867_s4 + $0x88] sm:$0xff] }
 0x544   :  { %3055 = vmatpush.bf16.msra.mxu1 %v6074_v38  ;;  %v5585_v38 = vld [vmem:[%s7865_s2 + $0x8] sm:$0xf] }
 0x548   :  { %3056 = vmatpush.bf16.msra.mxu1 %v6073_v10 }
 0x54b   :  { %v2956_v4 = vpop.f32.mrf.mxu3 }
 0x54c   :  { %v6422_v5 = vpack.c.bf16 %v2956_v4, %v2954_v31  ;;  %v5618_v31 = vor.u32 %v6104_v19, %v5617_v59  ;;  %v5602_v4 = vor.u32 %v6100_v3, %v5601_v28  ;;  %3251 = vmatpush.bf16.msrb.mxu1 %v6078_v57  ;;  %v6128_v59 = vld [vmem:[#allocation2 + $0x18] sm:$0xff]  ;;  %v6125_v28 = vld [vmem:[#allocation2 + $0xb0] sm:$0xff] }
 0x54d   :  { %v6127_v19 = vld [vmem:[#allocation2 + $0xd8] sm:$0xff] }
 0x54e   :  { %6553 = vst [vmem:[#allocation2 + $0x1d8] sm:$0xff] %v6422_v5   ;;  %v5673_v5 = vld [vmem:[%s7865_s2 + $0xc0] sm:$0xf]  ;;  %v6084_v3 = vld [vmem:[%s7867_s4 + $0xd8] sm:$0xff] }
 0x54f   :  { %v5674_v9 = vor.u32 %v6119_v21, %v5673_v5  ;;  %3547 = vmatpush.bf16.msra.mxu3 %v6084_v3  ;;  %v6163_v21 = vld [vmem:[#allocation2 + $0x20] sm:$0xff]  ;;  %v6094_v3 = vld [vmem:[%s7865_s2 + $0xc] sm:$0xf] }
 0x550   :  { %3252 = vmatpush.bf16.msrb.mxu1 %v6077_v62  ;;  %v5659_v62 = vld [vmem:[%s7865_s2 + $0xb0] sm:$0xf0] }
 0x553   :  { %v2959_v6 = vpop.f32.mrf.mxu3 }
 0x55b   :  { %v2961_v11 = vpop.f32.mrf.mxu3 }
 0x55c   :  { %v6427_v63 = vpack.c.bf16 %v2961_v11, %v2959_v6  ;;  %v6096_v6 = vld [vmem:[%s7865_s2 + $0x14] sm:$0xf0]  ;;  %v5657_v11 = vld [vmem:[%s7865_s2 + $0xa0] sm:$0xf] }
 0x55d   :  { %v5586_v10 = vor.u32 %v6096_v6, %v5585_v38  ;;  %v6162_v38 = vld [vmem:[#allocation2 + $0x1f8] sm:$0xff]  ;;  %v6082_v6 = vld [vmem:[%s7867_s4 + $0xc8] sm:$0xff] }
 0x55e   :  { %6554 = vst [vmem:[#allocation2 + $0xd0] sm:$0xff] %v6427_v63   ;;  %v6115_v63 = vld [vmem:[%s7865_s2 + $0xac] sm:$0xf0] }
 0x55f   :  { %v5658_v55 = vor.u32 %v6115_v63, %v5657_v11  ;;  %v6159_v11 = vld [vmem:[#allocation2 + $0x100] sm:$0xff]  ;;  %v6088_v63 = vld [vmem:[%s7867_s4 + $0xf8] sm:$0xff] }
 0x563   :  { %3571 = vxpose.xlu0.c.b16.start.end [1/1] (short) (narrow) %v7545_v34, 32  ;;  %v2856_v34 = vpop.f32.mrf.mxu1 }
 0x56b   :  { %v2858_v33 = vpop.f32.mrf.mxu1 }
 0x56c   :  { %v6412_v44 = vpack.c.bf16 %v2858_v33, %v2856_v34  ;;  %v6146_v34 = vld [vmem:[#allocation2 + $0x1a8] sm:$0xff] }
 0x56e   :  { %6551 = vst [vmem:[#allocation2 + $0x70] sm:$0xff] %v6412_v44  }
 0x570   :  { %v3015_v16 = vpop.f32.mrf.mxu0 }
 0x573   :  { %v2861_v48 = vpop.f32.mrf.mxu1 }
 0x578   :  { %v3017_v17 = vpop.f32.mrf.mxu0 }
 0x579   :  { %v3025_v18 = vpack.c.bf16 %v3017_v17, %v3015_v16  ;;  %v5641_v16 = vld [vmem:[%s7865_s2 + $0x80] sm:$0xf]  ;;  %v6111_v17 = vld [vmem:[%s7865_s2 + $0x8c] sm:$0xf0] }
 0x57b   :  { %5473 = vmatmul.msk.bf16.vlgmr.msra.gmra.mxu1 %vm665_vm1, %v3025_v18  ;;  %v2863_v56 = vpop.f32.mrf.mxu1  ;;  %v6148_v18 = vld [vmem:[#allocation2 + $0x28] sm:$0xff] }
 0x57c   :  { %v6417_v37 = vpack.c.bf16 %v2863_v56, %v2861_v48  ;;  %v3678_v56 = vpop.trf.xlu2  ;;  %3449 = vmatpush.bf16.msra.mxu1 %v6082_v6 }
 0x57e   :  { %v3309_v20 = vpop.f32.mrf.mxu2  ;;  %6552 = vst [vmem:[#allocation2 + $0x90] sm:$0xff] %v6417_v37   ;;  %v6095_v37 = vld [vmem:[%s7865_s2 + $0xc] sm:$0xf0] }
 0x580   :  { %v3020_v23 = vpop.f32.mrf.mxu0 }
 0x586   :  { %v3311_v0 = vpop.f32.mrf.mxu2 }
 0x587   :  { %v3319_v26 = vpack.c.bf16 %v3311_v0, %v3309_v20  ;;  %v5625_v0 = vld [vmem:[%s7865_s2 + $0x60] sm:$0xf] }
 0x588   :  { %v3022_v27 = vpop.f32.mrf.mxu0 }
 0x589   :  { %v3026_v29 = vpack.c.bf16 %v3022_v27, %v3020_v23  ;;  %5509 = vmatmul.msk.bf16.vlgmr.msrb.gmra.mxu3 %vm665_vm1, %v3319_v26  ;;  %v5642_v23 = vor.u32 %v6111_v17, %v5641_v16  ;;  %v6107_v26 = vld [vmem:[%s7865_s2 + $0x6c] sm:$0xf0]  ;;  %v6147_v27 = vld [vmem:[#allocation2 + $0x1b8] sm:$0xff]  ;;  %v6157_v17 = vld [vmem:[#allocation2 + $0x148] sm:$0xff] }
 0x58a   :  { %v6087_v16 = vld [vmem:[%s7867_s4 + $0xf0] sm:$0xff] }
 0x58b   :  { %5474 = vmatmul.msk.bf16.gmra.mxu1 %vm665_vm1, %v3026_v29  ;;  %v5626_v29 = vor.u32 %v6107_v26, %v5625_v0  ;;  %v6086_v0 = vld [vmem:[%s7867_s4 + $0xe8] sm:$0xff]  ;;  %v6085_v26 = vld [vmem:[%s7867_s4 + $0xe0] sm:$0xff] }
 0x58e   :  { %v3314_v60 = vpop.f32.mrf.mxu2 }
 0x596   :  { %v3316_v30 = vpop.f32.mrf.mxu2 }
 0x597   :  { %v3320_v39 = vpack.c.bf16 %v3316_v30, %v3314_v60  ;;  %v5609_v60 = vld [vmem:[%s7865_s2 + $0x40] sm:$0xf]  ;;  %v6103_v30 = vld [vmem:[%s7865_s2 + $0x4c] sm:$0xf0] }
 0x598   :  { %v5610_v48 = vor.u32 %v6103_v30, %v5609_v60  ;;  %v6122_v60 = vld [vmem:[%s7865_s2 + $0xec] sm:$0xf]  ;;  %v5699_v30 = vld [vmem:[%s7865_s2 + $0xf8] sm:$0xf0] }
 0x599   :  { %5510 = vmatmul.msk.bf16.gmra.mxu3 %vm665_vm1, %v3320_v39 }
 0x5b1   :  { %v3156_v8 = vpop.f32.mrf.mxu3 }
 0x5b9   :  { %v3158_v50 = vpop.f32.mrf.mxu3 }
 0x5ba   :  { %v6442_v22 = vpack.c.bf16 %v3158_v50, %v3156_v8  ;;  %v5593_v8 = vld [vmem:[%s7865_s2 + $0x20] sm:$0xf] }
 0x5bb   :  { %v6144_v50 = vld [vmem:[#allocation2 + $0x140] sm:$0xff] }
 0x5bc   :  { %6557 = vst [vmem:[#allocation2 + $0xa8] sm:$0xff] %v6442_v22   ;;  %v5578_v22 = vor.u32 %v6095_v37, %v5577_v51 }
 0x5c1   :  { %v3161_v47 = vpop.f32.mrf.mxu3 }
 0x5c9   :  { %v3163_v49 = vpop.f32.mrf.mxu3 }
 0x5ca   :  { %v6447_v15 = vpack.c.bf16 %v3163_v49, %v3161_v47  ;;  %v6129_v49 = vld [vmem:[#allocation2 + $0x50] sm:$0xff] }
 0x5cc   :  { %6558 = vst [vmem:[#allocation2 + $0x1c8] sm:$0xff] %v6447_v15  }
 0x5cf   :  { %v6619_v14 = vpop.trf.xlu0 }
 0x5d0   :  { %5487 = vmatmul.msk.bf16.vlgmr.msrb.gmra.mxu0 %vm621_vm0, %v6619_v14  ;;  %v6099_v14 = vld [vmem:[%s7865_s2 + $0x2c] sm:$0xf0] }
 0x5d1   :  { %3603 = vmatpush.bf16.msrb.mxu0 %v3588_v35  ;;  %v6145_v35 = vld [vmem:[#allocation2 + $0x80] sm:$0xff]  ;;  %v5594_v36 = vor.u32 %v6099_v14, %v5593_v8 }
 0x5d7   :  { %v6620_v42 = vpop.trf.xlu0 }
 0x5d8   :  { %5523 = vmatmul.msk.bf16.vlgmr.msra.gmra.mxu2 %vm621_vm0, %v6620_v42 }
 0x5d9   :  { %4046 = vmatpush.bf16.msra.mxu2 %v5698_v40 }
 0x5dd   :  { %4047 = vmatpush.bf16.msra.mxu2 %v5682_v43  ;;  %v6132_v43 = vld [vmem:[#allocation2 + $0x48] sm:$0xff] }
 0x5df   :  { %v6621_v53 = vpop.trf.xlu0 }
 0x5e0   :  { %5488 = vmatmul.msk.bf16.gmra.mxu0 %vm621_vm0, %v6621_v53  ;;  %v7695_v53 = vld [vmem:[%s7863_s0] sm:$0xff] }
 0x5e1   :  { %4048 = vmatpush.bf16.msra.mxu2 %v5666_v32  ;;  %v6131_v32 = vld [vmem:[#allocation2 + $0x130] sm:$0xff] }
 0x5e5   :  { %4049 = vmatpush.bf16.msra.mxu2 %v5650_v54 }
 0x5e7   :  { %v6622_v25 = vpop.trf.xlu0 }
 0x5e8   :  { %5524 = vmatmul.msk.bf16.gmra.mxu2 %vm621_vm0, %v6622_v25 }
 0x5e9   :  { %4050 = vmatpush.bf16.msra.mxu2 %v5634_v61 }
 0x5ed   :  { %4051 = vmatpush.bf16.msra.mxu2 %v5618_v31 }
 0x5ef   :  { %v3382_v7 = vpop.trf.xlu0 }
 0x5f0   :  { %5511 = vmatmul.msk.bf16.vlgmr.msra.gmra.mxu0 %vm621_vm0, %v3382_v7  ;;  %v6161_v7 = vld [vmem:[#allocation2 + $0x40] sm:$0xff] }
 0x5f1   :  { %3988 = vmatpush.bf16.msra.mxu0 %v5690_v13  ;;  %4052 = vmatpush.bf16.msra.mxu2 %v5602_v4  ;;  %v6164_v4 = vld [vmem:[#allocation2 + $0x128] sm:$0xff] }
 0x5f5   :  { %3989 = vmatpush.bf16.msra.mxu0 %v5674_v9  ;;  %4053 = vmatpush.bf16.msra.mxu2 %v5586_v10  ;;  %v6083_v9 = vld [vmem:[%s7867_s4 + $0xd0] sm:$0xff]  ;;  %v6160_v10 = vld [vmem:[#allocation2 + $0xc8] sm:$0xff] }
 0x5f6   :  { %3548 = vmatpush.bf16.msra.mxu3 %v6083_v9  ;;  %v6105_v9 = vld [vmem:[%s7865_s2 + $0x64] sm:$0xf] }
 0x5f8   :  { %v3058_v20 = vpop.f32.mrf.mxu1  ;;  %5547 = vmatmul.msk.bf16.vlgmr.msrb.gmra.mxu2 %vm621_vm0, %v3677_v12  ;;  %v6158_v12 = vld [vmem:[#allocation2 + $0x1d0] sm:$0xff] }
 0x5f9   :  { %4455 = vmatpush.bf16.msrb.mxu2 %v6148_v18  ;;  %3990 = vmatpush.bf16.msra.mxu0 %v5658_v55  ;;  %v6081_v55 = vld [vmem:[%s7867_s4 + $0xc0] sm:$0xff] }
 0x5fa   :  { %3743 = vmatpush.bf16.msrb.mxu3 %v6088_v63  ;;  %3450 = vmatpush.bf16.msra.mxu1 %v6081_v55  ;;  %v6156_v55 = vld [vmem:[#allocation2 + $0x8] sm:$0xff] }
 0x5fd   :  { %4456 = vmatpush.bf16.msrb.mxu2 %v6147_v27  ;;  %3991 = vmatpush.bf16.msra.mxu0 %v5642_v23 }
 0x5fe   :  { %3744 = vmatpush.bf16.msrb.mxu3 %v6087_v16 }
 0x5ff   :  { %v3383_v39 = vpop.trf.xlu0 }
 0x600   :  { %v3060_v33 = vpop.f32.mrf.mxu1  ;;  %5512 = vmatmul.msk.bf16.gmra.mxu0 %vm621_vm0, %v3383_v39 }
 0x601   :  { %v6432_v44 = vpack.c.bf16 %v3060_v33, %v3058_v20  ;;  %4457 = vmatpush.bf16.msrb.mxu2 %v6146_v34  ;;  %3992 = vmatpush.bf16.msra.mxu0 %v5626_v29  ;;  %v5702_v34 = vor.u32 %v6122_v60, %v5699_v30  ;;  %v6154_v30 = vld [vmem:[#allocation2] sm:$0xff] }
 0x603   :  { %6555 = vst [vmem:[#allocation2 + $0xb8] sm:$0xff] %v6432_v44   ;;  %v6118_v44 = vld [vmem:[%s7865_s2 + $0xcc] sm:$0xf] }
 0x605   :  { %4458 = vmatpush.bf16.msrb.mxu2 %v6145_v35  ;;  %3993 = vmatpush.bf16.msra.mxu0 %v5610_v48  ;;  %v5683_v48 = vld [vmem:[%s7865_s2 + $0xd8] sm:$0xf0] }
 0x606   :  { %v5686_v35 = vor.u32 %v6118_v44, %v5683_v48  ;;  %v6153_v44 = vld [vmem:[#allocation2 + $0x1e0] sm:$0xff] }
 0x608   :  { %v3063_v40 = vpop.f32.mrf.mxu1  ;;  %5548 = vmatmul.msk.bf16.gmra.mxu2 %vm621_vm0, %v3678_v56  ;;  %v6114_v56 = vld [vmem:[%s7865_s2 + $0xac] sm:$0xf] }
 0x609   :  { %4459 = vmatpush.bf16.msrb.mxu2 %v6144_v50  ;;  %3994 = vmatpush.bf16.msra.mxu0 %v5594_v36  ;;  %v5667_v36 = vld [vmem:[%s7865_s2 + $0xb8] sm:$0xf0]  ;;  %v6110_v50 = vld [vmem:[%s7865_s2 + $0x8c] sm:$0xf] }
 0x60a   :  { %v5670_v37 = vor.u32 %v6114_v56, %v5667_v36  ;;  %v6152_v56 = vld [vmem:[#allocation2 + $0x30] sm:$0xff]  ;;  %v6090_v36 = vld [vmem:[%s7863_s0 + $0x8] sm:$0xff] }
 0x60c   :  { %v3352_v41 = vpop.f32.mrf.mxu3 }
 0x60d   :  { %4460 = vmatpush.bf16.msrb.mxu2 %v6143_v24  ;;  %3995 = vmatpush.bf16.msra.mxu0 %v5578_v22 }
 0x60f   :  { %v3579_v42 = vpop.trf.xlu0 }
 0x610   :  { %v3065_v46 = vpop.f32.mrf.mxu1  ;;  %5535 = vmatmul.msk.bf16.vlgmr.msrb.gmra.mxu0 %vm621_vm0, %v3579_v42  ;;  %v5635_v42 = vld [vmem:[%s7865_s2 + $0x78] sm:$0xf0] }
 0x611   :  { %v6437_v47 = vpack.c.bf16 %v3065_v46, %v3063_v40  ;;  %4417 = vmatpush.bf16.msrb.mxu0 %v6132_v43  ;;  %4461 = vmatpush.bf16.msrb.mxu2 %v6142_v45  ;;  %v5651_v40 = vld [vmem:[%s7865_s2 + $0x98] sm:$0xf0]  ;;  %v6121_v43 = vld [vmem:[%s7865_s2 + $0xe4] sm:$0xf]  ;;  %v5691_v45 = vld [vmem:[%s7865_s2 + $0xf0] sm:$0xf0] }
 0x612   :  { %v5654_v24 = vor.u32 %v6110_v50, %v5651_v40  ;;  %v5694_v57 = vor.u32 %v6121_v43, %v5691_v45  ;;  %v6151_v50 = vld [vmem:[#allocation2 + $0x160] sm:$0xff]  ;;  %v6139_v40 = vld [vmem:[#allocation2 + $0x108] sm:$0xff] }
 0x613   :  { %6556 = vst [vmem:[#allocation2 + $0x88] sm:$0xff] %v6437_v47   ;;  %v6137_v43 = vld [vmem:[#allocation2 + $0x120] sm:$0xff] }
 0x614   :  { %v3354_v2 = vpop.f32.mrf.mxu3 }
 0x615   :  { %v6462_v54 = vpack.c.bf16 %v3354_v2, %v3352_v41  ;;  %4418 = vmatpush.bf16.msrb.mxu0 %v6131_v32  ;;  %4462 = vmatpush.bf16.msrb.mxu2 %v6141_v52  ;;  %v6106_v41 = vld [vmem:[%s7865_s2 + $0x6c] sm:$0xf]  ;;  %v5619_v2 = vld [vmem:[%s7865_s2 + $0x58] sm:$0xf0] }
 0x616   :  { %v5638_v47 = vor.u32 %v6106_v41, %v5635_v42  ;;  %v6102_v52 = vld [vmem:[%s7865_s2 + $0x4c] sm:$0xf]  ;;  %v6138_v41 = vld [vmem:[#allocation2 + $0x150] sm:$0xff] }
 0x617   :  { %6561 = vst [vmem:[#allocation2 + $0x68] sm:$0xff] %v6462_v54   ;;  %v6149_v42 = vld [vmem:[#allocation2 + $0x1e8] sm:$0xff] }
 0x618   :  { %4054 = vmatmul.bf16.vlgmr.msra.gmra.mxu2 %v7695_v53 }
 0x619   :  { %4419 = vmatpush.bf16.msrb.mxu0 %v6130_v58 }
 0x61c   :  { %v3357_v61 = vpop.f32.mrf.mxu3 }
 0x61d   :  { %4420 = vmatpush.bf16.msrb.mxu0 %v6129_v49  ;;  %v6117_v49 = vld [vmem:[%s7865_s2 + $0xc4] sm:$0xf] }
 0x61e   :  { %v6179_v5 = vld [vmem:[#allocation2 + $0x68] sm:$0xff] }
 0x61f   :  { %v3580_v15 = vpop.trf.xlu0 }
 0x620   :  { %5536 = vmatmul.msk.bf16.gmra.mxu0 %vm621_vm0, %v3580_v15  ;;  %v5622_v15 = vor.u32 %v6102_v52, %v5619_v2  ;;  %v6135_v52 = vld [vmem:[#allocation2 + $0x118] sm:$0xff]  ;;  %v6134_v2 = vld [vmem:[#allocation2 + $0x110] sm:$0xff] }
 0x621   :  { %4421 = vmatpush.bf16.msrb.mxu0 %v6128_v59  ;;  %v6098_v59 = vld [vmem:[%s7865_s2 + $0x2c] sm:$0xf] }
 0x624   :  { %v3359_v25 = vpop.f32.mrf.mxu3 }
 0x625   :  { %v6467_v31 = vpack.c.bf16 %v3359_v25, %v3357_v61  ;;  %4422 = vmatpush.bf16.msrb.mxu0 %v6127_v19  ;;  %v5675_v61 = vld [vmem:[%s7865_s2 + $0xd0] sm:$0xf0]  ;;  %v5603_v19 = vld [vmem:[%s7865_s2 + $0x38] sm:$0xf0] }
 0x626   :  { %v5678_v25 = vor.u32 %v6117_v49, %v5675_v61  ;;  %v6171_v49 = vld [vmem:[#allocation2 + $0x1d8] sm:$0xff]  ;;  %v6170_v61 = vld [vmem:[#allocation2 + $0x90] sm:$0xff] }
 0x627   :  { %6562 = vst [vmem:[#allocation2 + $0x190] sm:$0xff] %v6467_v31   ;;  %v6113_v31 = vld [vmem:[%s7865_s2 + $0xa4] sm:$0xf] }
 0x628   :  { %4059 = vmatmul.bf16.gmra.mxu2 %v6090_v36 }
 0x629   :  { %4423 = vmatpush.bf16.msrb.mxu0 %v6126_v1 }
 0x62d   :  { %4424 = vmatpush.bf16.msrb.mxu0 %v6125_v28  ;;  %v5606_v28 = vor.u32 %v6098_v59, %v5603_v19  ;;  %v6168_v59 = vld [vmem:[#allocation2 + $0x78] sm:$0xff]  ;;  %v6167_v19 = vld [vmem:[#allocation2 + $0xe8] sm:$0xff] }
 0x62e   :  { %v6180_v13 = vld [vmem:[#allocation2 + $0x190] sm:$0xff] }
 0x62f   :  { %4842 = vmatpush.bf16.msra.mxu2 %v6180_v13  ;;  %v5587_v13 = vld [vmem:[%s7865_s2 + $0x18] sm:$0xf0] }
 0x630   :  { %3996 = vmatmul.bf16.vlgmr.msra.gmra.mxu0 %v7695_v53  ;;  %v5590_v6 = vor.u32 %v6094_v3, %v5587_v13 }
 0x631   :  { %4804 = vmatpush.bf16.msra.mxu0 %v6164_v4 }
 0x633   :  { %4843 = vmatpush.bf16.msra.mxu2 %v6179_v5  ;;  %v5662_v5 = vor.u32 %v6113_v31, %v5659_v62  ;;  %v6165_v31 = vld [vmem:[#allocation2 + $0x1a0] sm:$0xff] }
 0x635   :  { %4805 = vmatpush.bf16.msra.mxu0 %v6163_v21  ;;  %v6109_v21 = vld [vmem:[%s7865_s2 + $0x84] sm:$0xf] }
 0x639   :  { %4806 = vmatpush.bf16.msra.mxu0 %v6162_v38  ;;  %v5643_v38 = vld [vmem:[%s7865_s2 + $0x90] sm:$0xf0] }
 0x63d   :  { %4807 = vmatpush.bf16.msra.mxu0 %v6161_v7  ;;  %v5646_v7 = vor.u32 %v6109_v21, %v5643_v38 }
 0x640   :  { %4001 = vmatmul.bf16.gmra.mxu0 %v6090_v36 }
 0x641   :  { %4808 = vmatpush.bf16.msra.mxu0 %v6160_v10  ;;  %v5627_v10 = vld [vmem:[%s7865_s2 + $0x70] sm:$0xf0] }
 0x642   :  { %v5630_v16 = vor.u32 %v6105_v9, %v5627_v10 }
 0x645   :  { %4809 = vmatpush.bf16.msra.mxu0 %v6159_v11 }
 0x649   :  { %4810 = vmatpush.bf16.msra.mxu0 %v6158_v12 }
 0x64d   :  { %4811 = vmatpush.bf16.msra.mxu0 %v6157_v17  ;;  %v3211_v18 = vpop.f32.mrf.mxu0 }
 0x655   :  { %v3213_v20 = vpop.f32.mrf.mxu0 }
 0x656   :  { %v3221_v23 = vpack.c.bf16 %v3213_v20, %v3211_v18  ;;  %v6101_v18 = vld [vmem:[%s7865_s2 + $0x44] sm:$0xf]  ;;  %v5611_v20 = vld [vmem:[%s7865_s2 + $0x50] sm:$0xf0] }
 0x658   :  { %5497 = vmatmul.msk.bf16.vlgmr.msrb.gmra.mxu1 %vm665_vm1, %v3221_v23  ;;  %v6155_v23 = vld [vmem:[#allocation2 + $0xf0] sm:$0xff] }
 0x659   :  { %3645 = vmatpush.bf16.msrb.mxu1 %v6086_v0  ;;  %v5614_v0 = vor.u32 %v6101_v18, %v5611_v20  ;;  %v6174_v18 = vld [vmem:[#allocation2 + $0x88] sm:$0xff] }
 0x65b   :  { %v3507_v27 = vpop.f32.mrf.mxu2 }
 0x65d   :  { %v3216_v29 = vpop.f32.mrf.mxu0  ;;  %3646 = vmatpush.bf16.msrb.mxu1 %v6085_v26  ;;  %v6097_v26 = vld [vmem:[%s7865_s2 + $0x24] sm:$0xf] }
 0x663   :  { %v3509_v39 = vpop.f32.mrf.mxu2 }
 0x664   :  { %v3517_v33 = vpack.c.bf16 %v3509_v39, %v3507_v27  ;;  %v5595_v27 = vld [vmem:[%s7865_s2 + $0x30] sm:$0xf0] }
 0x665   :  { %v3218_v8 = vpop.f32.mrf.mxu0  ;;  %v5598_v39 = vor.u32 %v6097_v26, %v5595_v27 }
 0x666   :  { %v3222_v14 = vpack.c.bf16 %v3218_v8, %v3216_v29  ;;  %5533 = vmatmul.msk.bf16.vlgmr.msra.gmra.mxu3 %vm665_vm1, %v3517_v33  ;;  %v5579_v33 = vld [vmem:[%s7865_s2 + $0x10] sm:$0xf0] }
 0x667   :  { %4075 = vmatpush.bf16.msra.mxu3 %v5702_v34  ;;  %v6093_v34 = vld [vmem:[%s7865_s2 + $0x4] sm:$0xf] }
 0x668   :  { %5498 = vmatmul.msk.bf16.gmra.mxu1 %vm665_vm1, %v3222_v14  ;;  %v5582_v48 = vor.u32 %v6093_v34, %v5579_v33 }
 0x66b   :  { %v3512_v51 = vpop.f32.mrf.mxu2  ;;  %4076 = vmatpush.bf16.msra.mxu3 %v5686_v35 }
 0x66d   :  { %v3409_v22 = vpop.f32.mrf.mxu0 }
 0x66f   :  { %4077 = vmatpush.bf16.msra.mxu3 %v5670_v37  ;;  %v6140_v37 = vld [vmem:[#allocation2 + $0x60] sm:$0xff] }
 0x673   :  { %v3514_v46 = vpop.f32.mrf.mxu2  ;;  %4078 = vmatpush.bf16.msra.mxu3 %v5654_v24  ;;  %v6150_v24 = vld [vmem:[#allocation2 + $0xf8] sm:$0xff] }
 0x674   :  { %v3518_v32 = vpack.c.bf16 %v3514_v46, %v3512_v51  ;;  %v6091_v46 = vld [vmem:[%s7863_s0 + $0x10] sm:$0xff] }
 0x675   :  { %v3411_v54 = vpop.f32.mrf.mxu0  ;;  %4064 = vmatmul.bf16.gmra.mxu2 %v6091_v46  ;;  %4006 = vmatmul.bf16.gmra.mxu0 %v6091_v46 }
 0x676   :  { %v3419_v58 = vpack.c.bf16 %v3411_v54, %v3409_v22  ;;  %5534 = vmatmul.msk.bf16.gmra.mxu3 %vm665_vm1, %v3518_v32  ;;  %v6136_v32 = vld [vmem:[#allocation2 + $0x98] sm:$0xff]  ;;  %v6133_v54 = vld [vmem:[#allocation2 + $0x180] sm:$0xff] }
 0x677   :  { %4079 = vmatpush.bf16.msra.mxu3 %v5638_v47 }
 0x678   :  { %5521 = vmatmul.msk.bf16.vlgmr.msra.gmra.mxu1 %vm665_vm1, %v3419_v58  ;;  %v6172_v58 = vld [vmem:[#allocation2 + $0xd0] sm:$0xff] }
 0x679   :  { %4017 = vmatpush.bf16.msra.mxu1 %v5694_v57  ;;  %v6092_v57 = vld [vmem:[%s7863_s0 + $0x18] sm:$0xff] }
 0x67b   :  { %v3703_v1 = vpop.f32.mrf.mxu2  ;;  %4080 = vmatpush.bf16.msra.mxu3 %v5622_v15  ;;  %v6169_v15 = vld [vmem:[#allocation2 + $0x70] sm:$0xff] }
 0x67d   :  { %v3414_v4 = vpop.f32.mrf.mxu0  ;;  %4018 = vmatpush.bf16.msra.mxu1 %v5678_v25  ;;  %v6166_v25 = vld [vmem:[#allocation2 + $0x1f0] sm:$0xff] }
 0x67f   :  { %4081 = vmatpush.bf16.msra.mxu3 %v5606_v28 }
 0x681   :  { %4019 = vmatpush.bf16.msra.mxu1 %v5662_v5 }
 0x683   :  { %v3705_v11 = vpop.f32.mrf.mxu2  ;;  %4082 = vmatpush.bf16.msra.mxu3 %v5590_v6 }
 0x684   :  { %v3713_v63 = vpack.c.bf16 %v3705_v11, %v3703_v1 }
 0x685   :  { %v3416_v12 = vpop.f32.mrf.mxu0  ;;  %4020 = vmatpush.bf16.msra.mxu1 %v5646_v7  ;;  %4069 = vmatmul.bf16.gmra.mxu2 %v6092_v57 }
 0x686   :  { %v3420_v17 = vpack.c.bf16 %v3416_v12, %v3414_v4  ;;  %5557 = vmatmul.msk.bf16.vlgmr.msrb.gmra.mxu3 %vm665_vm1, %v3713_v63  ;;  %4011 = vmatmul.bf16.gmra.mxu0 %v6092_v57  ;;  %v6176_v63 = vld [vmem:[#allocation2 + $0x1c8] sm:$0xff] }
 0x687   :  { %4474 = vmatpush.bf16.msrb.mxu3 %v6156_v55 }
 0x688   :  { %5522 = vmatmul.msk.bf16.gmra.mxu1 %vm665_vm1, %v3420_v17 }
 0x689   :  { %4021 = vmatpush.bf16.msra.mxu1 %v5630_v16  ;;  %v6175_v16 = vld [vmem:[#allocation2 + $0xa8] sm:$0xff] }
 0x68b   :  { %4475 = vmatpush.bf16.msrb.mxu3 %v6155_v23  ;;  %v3708_v29 = vpop.f32.mrf.mxu2  ;;  %v6173_v23 = vld [vmem:[#allocation2 + $0xb8] sm:$0xff] }
 0x68d   :  { %v3605_v60 = vpop.f32.mrf.mxu0  ;;  %4022 = vmatpush.bf16.msra.mxu1 %v5614_v0 }
 0x68f   :  { %4476 = vmatpush.bf16.msrb.mxu3 %v6154_v30 }
 0x691   :  { %4023 = vmatpush.bf16.msra.mxu1 %v5598_v39 }
 0x693   :  { %4477 = vmatpush.bf16.msrb.mxu3 %v6153_v44  ;;  %v3710_v8 = vpop.f32.mrf.mxu2 }
 0x694   :  { %v3714_v14 = vpack.c.bf16 %v3710_v8, %v3708_v29 }
 0x695   :  { %v3607_v35 = vpop.f32.mrf.mxu0  ;;  %4024 = vmatpush.bf16.msra.mxu1 %v5582_v48 }
 0x696   :  { %v3615_v51 = vpack.c.bf16 %v3607_v35, %v3605_v60  ;;  %5558 = vmatmul.msk.bf16.gmra.mxu3 %vm665_vm1, %v3714_v14 }
 0x697   :  { %4478 = vmatpush.bf16.msrb.mxu3 %v6152_v56 }
 0x698   :  { %5545 = vmatmul.msk.bf16.vlgmr.msrb.gmra.mxu1 %vm665_vm1, %v3615_v51 }
 0x699   :  { %4436 = vmatpush.bf16.msrb.mxu1 %v6140_v37 }
 0x69b   :  { %4479 = vmatpush.bf16.msrb.mxu3 %v6151_v50  ;;  %v4055_v39 = vpop.f32.mrf.mxu2 }
 0x69d   :  { %4437 = vmatpush.bf16.msrb.mxu1 %v6139_v40  ;;  %v3610_v22 = vpop.f32.mrf.mxu0 }
 0x69f   :  { %4480 = vmatpush.bf16.msrb.mxu3 %v6150_v24 }
 0x6a1   :  { %4438 = vmatpush.bf16.msrb.mxu1 %v6138_v41 }
 0x6a3   :  { %4481 = vmatpush.bf16.msrb.mxu3 %v6149_v42  ;;  %v4057_v8 = vpop.f32.mrf.mxu2 }
 0x6a5   :  { %4439 = vmatpush.bf16.msrb.mxu1 %v6137_v43  ;;  %v3612_v45 = vpop.f32.mrf.mxu0 }
 0x6a6   :  { %v3616_v47 = vpack.c.bf16 %v3612_v45, %v3610_v22  ;;  %4083 = vmatmul.bf16.vlgmr.msra.gmra.mxu3 %v7695_v53 }
 0x6a8   :  { %5546 = vmatmul.msk.bf16.gmra.mxu1 %vm665_vm1, %v3616_v47 }
 0x6a9   :  { %4440 = vmatpush.bf16.msrb.mxu1 %v6136_v32 }
 0x6ab   :  { %v4060_v37 = vpop.f32.mrf.mxu2 }
 0x6ad   :  { %4441 = vmatpush.bf16.msrb.mxu1 %v6135_v52  ;;  %v3997_v35 = vpop.f32.mrf.mxu0 }
 0x6b1   :  { %4442 = vmatpush.bf16.msrb.mxu1 %v6134_v2 }
 0x6b5   :  { %4443 = vmatpush.bf16.msrb.mxu1 %v6133_v54  ;;  %v3999_v41 = vpop.f32.mrf.mxu0 }
 0x6b6   :  { %4088 = vmatmul.bf16.gmra.mxu3 %v6090_v36 }
 0x6b8   :  { %4025 = vmatmul.bf16.vlgmr.msra.gmra.mxu1 %v7695_v53 }
 0x6b9   :  { %4823 = vmatpush.bf16.msra.mxu1 %v6172_v58 }
 0x6bd   :  { %4824 = vmatpush.bf16.msra.mxu1 %v6171_v49  ;;  %v4002_v49 = vpop.f32.mrf.mxu0 }
 0x6c1   :  { %4825 = vmatpush.bf16.msra.mxu1 %v6170_v61 }
 0x6c5   :  { %4826 = vmatpush.bf16.msra.mxu1 %v6169_v15 }
 0x6c6   :  { %4093 = vmatmul.bf16.gmra.mxu3 %v6091_v46 }
 0x6c8   :  { %4030 = vmatmul.bf16.gmra.mxu1 %v6090_v36 }
 0x6c9   :  { %4827 = vmatpush.bf16.msra.mxu1 %v6168_v59 }
 0x6cd   :  { %4828 = vmatpush.bf16.msra.mxu1 %v6167_v19 }
 0x6d1   :  { %4829 = vmatpush.bf16.msra.mxu1 %v6166_v25 }
 0x6d5   :  { %4830 = vmatpush.bf16.msra.mxu1 %v6165_v31  ;;  %v3254_v62 = vpop.f32.mrf.mxu1 }
 0x6d6   :  { %4098 = vmatmul.bf16.gmra.mxu3 %v6092_v57 }
 0x6d8   :  { %4035 = vmatmul.bf16.gmra.mxu1 %v6091_v46 }
 0x6dd   :  { %v3256_v53 = vpop.f32.mrf.mxu1 }
 0x6de   :  { %v6452_v1 = vpack.c.bf16 %v3256_v53, %v3254_v62 }
 0x6e0   :  { %6559 = vst [vmem:[#allocation2 + $0x170] sm:$0xff] %v6452_v1  }
 0x6e5   :  { %v3259_v28 = vpop.f32.mrf.mxu1 }
 0x6e7   :  { %v6177_v9 = vld [vmem:[#allocation2 + $0x170] sm:$0xff] }
 0x6e8   :  { %4040 = vmatmul.bf16.gmra.mxu1 %v6092_v57  ;;  %v4062_v57 = vpop.f32.mrf.mxu2 }
 0x6e9   :  { %v3550_v3 = vpop.f32.mrf.mxu3 }
 0x6ed   :  { %v3261_v13 = vpop.f32.mrf.mxu1 }
 0x6ee   :  { %v6457_v4 = vpack.c.bf16 %v3261_v13, %v3259_v28 }
 0x6f0   :  { %6560 = vst [vmem:[#allocation2 + $0x178] sm:$0xff] %v6457_v4  }
 0x6f1   :  { %v3552_v5 = vpop.f32.mrf.mxu3 }
 0x6f2   :  { %v6482_v21 = vpack.c.bf16 %v3552_v5, %v3550_v3 }
 0x6f4   :  { %6565 = vst [vmem:[#allocation2 + $0xc0] sm:$0xff] %v6482_v21  }
 0x6f5   :  { %v3452_v38 = vpop.f32.mrf.mxu1 }
 0x6f7   :  { %v6178_v6 = vld [vmem:[#allocation2 + $0x178] sm:$0xff] }
 0x6f8   :  { %4844 = vmatpush.bf16.msra.mxu2 %v6178_v6  ;;  %v4065_v4 = vpop.f32.mrf.mxu2 }
 0x6f9   :  { %v3555_v7 = vpop.f32.mrf.mxu3 }
 0x6fc   :  { %4845 = vmatpush.bf16.msra.mxu2 %v6177_v9 }
 0x6fd   :  { %v3454_v10 = vpop.f32.mrf.mxu1 }
 0x6fe   :  { %v6472_v11 = vpack.c.bf16 %v3454_v10, %v3452_v38 }
 0x700   :  { %6563 = vst [vmem:[#allocation2 + $0x198] sm:$0xff] %v6472_v11   ;;  %4846 = vmatpush.bf16.msra.mxu2 %v6176_v63  ;;  %v4004_v11 = vpop.f32.mrf.mxu0 }
 0x701   :  { %v3557_v12 = vpop.f32.mrf.mxu3 }
 0x702   :  { %v6487_v55 = vpack.c.bf16 %v3557_v12, %v3555_v7  ;;  %v6183_v7 = vld [vmem:[#allocation2 + $0xc0] sm:$0xff] }
 0x704   :  { %6566 = vst [vmem:[#allocation2 + $0x1c0] sm:$0xff] %v6487_v55   ;;  %4847 = vmatpush.bf16.msra.mxu2 %v6175_v16 }
 0x705   :  { %v3457_v17 = vpop.f32.mrf.mxu1 }
 0x708   :  { %4848 = vmatpush.bf16.msra.mxu2 %v6174_v18  ;;  %v6181_v18 = vld [vmem:[#allocation2 + $0x198] sm:$0xff] }
 0x709   :  { %v3746_v20 = vpop.f32.mrf.mxu3 }
 0x70b   :  { %v6184_v31 = vld [vmem:[#allocation2 + $0x1c0] sm:$0xff] }
 0x70c   :  { %4849 = vmatpush.bf16.msra.mxu2 %v6173_v23 }
 0x70d   :  { %v3459_v0 = vpop.f32.mrf.mxu1 }
 0x70e   :  { %v6477_v26 = vpack.c.bf16 %v3459_v0, %v3457_v17 }
 0x710   :  { %6564 = vst [vmem:[#allocation2 + $0x38] sm:$0xff] %v6477_v26  }
 0x711   :  { %v3748_v27 = vpop.f32.mrf.mxu3 }
 0x712   :  { %v6502_v29 = vpack.c.bf16 %v3748_v27, %v3746_v20  ;;  %v4067_v20 = vpop.f32.mrf.mxu2 }
 0x714   :  { %6569 = vst [vmem:[#allocation2 + $0x58] sm:$0xff] %v6502_v29   ;;  %v4007_v29 = vpop.f32.mrf.mxu0 }
 0x715   :  { %v3648_v60 = vpop.f32.mrf.mxu1 }
 0x717   :  { %v6182_v16 = vld [vmem:[#allocation2 + $0x38] sm:$0xff] }
 0x719   :  { %v3751_v30 = vpop.f32.mrf.mxu3 }
 0x71b   :  { %v6187_v22 = vld [vmem:[#allocation2 + $0x58] sm:$0xff] }
 0x71d   :  { %v3650_v34 = vpop.f32.mrf.mxu1 }
 0x71e   :  { %v6492_v33 = vpack.c.bf16 %v3650_v34, %v3648_v60 }
 0x720   :  { %6567 = vst [vmem:[#allocation2 + $0x158] sm:$0xff] %v6492_v33  }
 0x721   :  { %v3753_v44 = vpop.f32.mrf.mxu3 }
 0x722   :  { %v6507_v48 = vpack.c.bf16 %v3753_v44, %v3751_v30 }
 0x724   :  { %6570 = vst [vmem:[#allocation2 + $0xa0] sm:$0xff] %v6507_v48  }
 0x725   :  { %v3653_v14 = vpop.f32.mrf.mxu1 }
 0x727   :  { %v6185_v61 = vld [vmem:[#allocation2 + $0x158] sm:$0xff] }
 0x729   :  { %v4084_v56 = vpop.f32.mrf.mxu3 }
 0x72a   :  { %v4105_v50 = vpack.c.bf16 %v4084_v56, %v4055_v39 }
 0x72b   :  { %v6188_v36 = vld [vmem:[#allocation2 + $0xa0] sm:$0xff] }
 0x72c   :  { %4861 = vmatpush.bf16.msra.mxu3 %v6188_v36  ;;  %v4195_v42 = vunpack.c.l.b16 %v4105_v50  ;;  %v4196_v43 = vunpack.c.h.b16 %v4105_v50 }
 0x72d   :  { %v3655_v51 = vpop.f32.mrf.mxu1 }
 0x72e   :  { %v6497_v40 = vpack.c.bf16 %v3655_v51, %v3653_v14 }
 0x730   :  { %6568 = vst [vmem:[#allocation2 + $0x10] sm:$0xff] %v6497_v40   ;;  %4862 = vmatpush.bf16.msra.mxu3 %v6187_v22  ;;  %v4009_v22 = vpop.f32.mrf.mxu0 }
 0x731   :  { %v4086_v24 = vpop.f32.mrf.mxu3 }
 0x732   :  { %v4107_v45 = vpack.c.bf16 %v4086_v24, %v4057_v8 }
 0x734   :  { %v4199_v46 = vunpack.c.l.b16 %v4107_v45  ;;  %v4200_v47 = vunpack.c.h.b16 %v4107_v45 }
 0x735   :  { %v4026_v32 = vpop.f32.mrf.mxu1 }
 0x736   :  { %v4211_v52 = vpack.c.b16 %v4199_v46, %v4195_v42  ;;  %v4212_v2 = vpack.c.b16 %v4200_v47, %v4196_v43  ;;  %v4104_v15 = vpack.c.bf16 %v4026_v32, %v3997_v35 }
 0x737   :  { %v6186_v54 = vld [vmem:[#allocation2 + $0x10] sm:$0xff] }
 0x738   :  { %4463 = vmatmul.bf16.vlgmr.msrb.gmra.mxu2 %v4211_v52  ;;  %4482 = vmatmul.bf16.vlgmr.msrb.gmra.mxu3 %v4212_v2  ;;  %v4193_v62 = vunpack.c.l.b16 %v4104_v15  ;;  %v4194_v53 = vunpack.c.h.b16 %v4104_v15 }
 0x739   :  { %v4089_v58 = vpop.f32.mrf.mxu3  ;;  %4863 = vmatpush.bf16.msra.mxu3 %v6186_v54 }
 0x73a   :  { %v4109_v59 = vpack.c.bf16 %v4089_v58, %v4060_v37  ;;  %v4070_v37 = vpop.f32.mrf.mxu2 }
 0x73c   :  { %v4203_v3 = vunpack.c.l.b16 %v4109_v59  ;;  %v4204_v5 = vunpack.c.h.b16 %v4109_v59  ;;  %v4012_v59 = vpop.f32.mrf.mxu0 }
 0x73d   :  { %v4028_v19 = vpop.f32.mrf.mxu1  ;;  %4864 = vmatpush.bf16.msra.mxu3 %v6185_v61 }
 0x73e   :  { %v4106_v25 = vpack.c.bf16 %v4028_v19, %v3999_v41 }
 0x740   :  { %v4197_v1 = vunpack.c.l.b16 %v4106_v25  ;;  %v4198_v28 = vunpack.c.h.b16 %v4106_v25 }
 0x741   :  { %v4091_v13 = vpop.f32.mrf.mxu3  ;;  %4865 = vmatpush.bf16.msra.mxu3 %v6184_v31 }
 0x742   :  { %v4209_v21 = vpack.c.b16 %v4197_v1, %v4193_v62  ;;  %v4210_v38 = vpack.c.b16 %v4198_v28, %v4194_v53  ;;  %v4111_v6 = vpack.c.bf16 %v4091_v13, %v4062_v57  ;;  %v4072_v46 = vpop.f32.mrf.mxu2 }
 0x744   :  { %v4207_v9 = vunpack.c.l.b16 %v4111_v6  ;;  %v4208_v10 = vunpack.c.h.b16 %v4111_v6  ;;  %4425 = vmatmul.bf16.vlgmr.msrb.gmra.mxu0 %v4209_v21  ;;  %4444 = vmatmul.bf16.vlgmr.msrb.gmra.mxu1 %v4210_v38  ;;  %v4014_v28 = vpop.f32.mrf.mxu0 }
 0x745   :  { %v4031_v63 = vpop.f32.mrf.mxu1  ;;  %4866 = vmatpush.bf16.msra.mxu3 %v6183_v7 }
 0x746   :  { %v4215_v12 = vpack.c.b16 %v4207_v9, %v4203_v3  ;;  %v4216_v55 = vpack.c.b16 %v4208_v10, %v4204_v5  ;;  %v4108_v23 = vpack.c.bf16 %v4031_v63, %v4002_v49 }
 0x748   :  { %4468 = vmatmul.bf16.gmra.mxu2 %v4215_v12  ;;  %4487 = vmatmul.bf16.gmra.mxu3 %v4216_v55  ;;  %v4201_v60 = vunpack.c.l.b16 %v4108_v23  ;;  %v4202_v30 = vunpack.c.h.b16 %v4108_v23 }
 0x749   :  { %v4094_v17 = vpop.f32.mrf.mxu3  ;;  %4867 = vmatpush.bf16.msra.mxu3 %v6182_v16 }
 0x74a   :  { %v4113_v0 = vpack.c.bf16 %v4094_v17, %v4065_v4 }
 0x74c   :  { %v4582_v33 = vunpack.c.l.b16 %v4113_v0  ;;  %v4583_v48 = vunpack.c.h.b16 %v4113_v0 }
 0x74d   :  { %v4033_v26 = vpop.f32.mrf.mxu1  ;;  %4868 = vmatpush.bf16.msra.mxu3 %v6181_v18 }
 0x74e   :  { %v4110_v27 = vpack.c.bf16 %v4033_v26, %v4004_v11 }
 0x750   :  { %v4205_v39 = vunpack.c.l.b16 %v4110_v27  ;;  %v4206_v34 = vunpack.c.h.b16 %v4110_v27 }
 0x751   :  { %v4096_v44 = vpop.f32.mrf.mxu3 }
 0x752   :  { %v4115_v8 = vpack.c.bf16 %v4096_v44, %v4067_v20  ;;  %v4213_v14 = vpack.c.b16 %v4205_v39, %v4201_v60  ;;  %v4214_v35 = vpack.c.b16 %v4206_v34, %v4202_v30  ;;  %v7850_v20 = vld [vmem:[%s7868_s5] ss:$0 sm:$0xff]  ;;  %s6653_s5 = smov [#allocation3]  }
 0x753   :  { %s4897_s24 = sshll.u32 %s6653_s5, 4  ;;  %s4898_s24 = int_to_ptr.vmem [resolvable:$true] %s4897_s24 }
 0x754   :  { %v4586_v56 = vunpack.c.l.b16 %v4115_v8  ;;  %v4587_v36 = vunpack.c.h.b16 %v4115_v8  ;;  %4430 = vmatmul.bf16.gmra.mxu0 %v4213_v14  ;;  %4449 = vmatmul.bf16.gmra.mxu1 %v4214_v35 }
 0x755   :  { %v4036_v51 = vpop.f32.mrf.mxu1 }
 0x756   :  { %v4598_v50 = vpack.c.b16 %v4586_v56, %v4582_v33  ;;  %v4599_v40 = vpack.c.b16 %v4587_v36, %v4583_v48  ;;  %v4112_v41 = vpack.c.bf16 %v4036_v51, %v4007_v29 }
 0x758   :  { %4850 = vmatmul.bf16.vlgmr.msra.gmra.mxu2 %v4598_v50  ;;  %4869 = vmatmul.bf16.vlgmr.msra.gmra.mxu3 %v4599_v40  ;;  %v4580_v47 = vunpack.c.l.b16 %v4112_v41  ;;  %v4581_v32 = vunpack.c.h.b16 %v4112_v41 }
 0x759   :  { %v4099_v24 = vpop.f32.mrf.mxu3 }
 0x75a   :  { %v4117_v42 = vpack.c.bf16 %v4099_v24, %v4070_v37 }
 0x75c   :  { %v4590_v54 = vunpack.c.l.b16 %v4117_v42  ;;  %v4591_v58 = vunpack.c.h.b16 %v4117_v42 }
 0x75d   :  { %v4038_v43 = vpop.f32.mrf.mxu1 }
 0x75e   :  { %v4114_v45 = vpack.c.bf16 %v4038_v43, %v4009_v22 }
 0x760   :  { %v4584_v52 = vunpack.c.l.b16 %v4114_v45  ;;  %v4585_v2 = vunpack.c.h.b16 %v4114_v45 }
 0x761   :  { %v4101_v57 = vpop.f32.mrf.mxu3 }
 0x762   :  { %v4596_v49 = vpack.c.b16 %v4584_v52, %v4580_v47  ;;  %v4597_v61 = vpack.c.b16 %v4585_v2, %v4581_v32  ;;  %v4119_v15 = vpack.c.bf16 %v4101_v57, %v4072_v46 }
 0x764   :  { %v4594_v19 = vunpack.c.l.b16 %v4119_v15  ;;  %v4595_v25 = vunpack.c.h.b16 %v4119_v15  ;;  %4812 = vmatmul.bf16.vlgmr.msra.gmra.mxu0 %v4596_v49  ;;  %4831 = vmatmul.bf16.vlgmr.msra.gmra.mxu1 %v4597_v61 }
 0x765   :  { %v4041_v31 = vpop.f32.mrf.mxu1 }
 0x766   :  { %v4602_v62 = vpack.c.b16 %v4594_v19, %v4590_v54  ;;  %v4603_v53 = vpack.c.b16 %v4595_v25, %v4591_v58  ;;  %v4116_v1 = vpack.c.bf16 %v4041_v31, %v4012_v59 }
 0x768   :  { %4855 = vmatmul.bf16.gmra.mxu2 %v4602_v62  ;;  %4874 = vmatmul.bf16.gmra.mxu3 %v4603_v53  ;;  %v4588_v4 = vunpack.c.l.b16 %v4116_v1  ;;  %v4589_v5 = vunpack.c.h.b16 %v4116_v1 }
 0x76d   :  { %v4043_v3 = vpop.f32.mrf.mxu1 }
 0x76e   :  { %v4118_v13 = vpack.c.bf16 %v4043_v3, %v4014_v28 }
 0x770   :  { %v4592_v21 = vunpack.c.l.b16 %v4118_v13  ;;  %v4593_v38 = vunpack.c.h.b16 %v4118_v13 }
 0x772   :  { %v4600_v6 = vpack.c.b16 %v4592_v21, %v4588_v4  ;;  %v4601_v7 = vpack.c.b16 %v4593_v38, %v4589_v5 }
 0x774   :  { %4817 = vmatmul.bf16.gmra.mxu0 %v4600_v6  ;;  %4836 = vmatmul.bf16.gmra.mxu1 %v4601_v7 }
 0x7bb   :  { %v4464_v9 = vpop.f32.mrf.mxu2  ;;  %v4483_v10 = vpop.f32.mrf.mxu3 }
 0x7c1   :  { %v4426_v11 = vpop.f32.mrf.mxu0  ;;  %v4445_v63 = vpop.f32.mrf.mxu1 }
 0x7c2   :  { %v4446_v12 = vadd.f32 %v4445_v63, %v4426_v11 }
 0x7c3   :  { %v4466_v55 = vpop.f32.mrf.mxu2  ;;  %v4485_v16 = vpop.f32.mrf.mxu3 }
 0x7c4   :  { %v4465_v17 = vadd.f32 %v4464_v9, %v4446_v12 }
 0x7c6   :  { %v4484_v18 = vadd.f32 %v4483_v10, %v4465_v17 }
 0x7c8   :  { %v4493_v23 = vmul.f32 0.088388346, %v4484_v18 }
 0x7c9   :  { %v4428_v0 = vpop.f32.mrf.mxu0  ;;  %v4447_v26 = vpop.f32.mrf.mxu1 }
 0x7ca   :  { %v4500_v27 = vadd.f32 %v7850_v20, %v4493_v23  ;;  %v4448_v29 = vadd.f32 %v4447_v26, %v4428_v0 }
 0x7cb   :  { %v4469_v60 = vpop.f32.mrf.mxu2  ;;  %v4488_v30 = vpop.f32.mrf.mxu3 }
 0x7cc   :  { %4504 = vst [vmem:[#allocation3] sm:$0xff] %v4500_v27  ;;  %v4467_v39 = vadd.f32 %v4466_v55, %v4448_v29 }
 0x7ce   :  { %v4486_v34 = vadd.f32 %v4485_v16, %v4467_v39 }
 0x7d0   :  { %v4494_v33 = vmul.f32 0.088388346, %v4486_v34 }
 0x7d1   :  { %v4431_v44 = vpop.f32.mrf.mxu0  ;;  %v4450_v48 = vpop.f32.mrf.mxu1 }
 0x7d2   :  { %v4501_v8 = vadd.f32 %v7850_v20, %v4494_v33  ;;  %v4451_v14 = vadd.f32 %v4450_v48, %v4431_v44 }
 0x7d3   :  { %v4471_v35 = vpop.f32.mrf.mxu2  ;;  %v4490_v36 = vpop.f32.mrf.mxu3 }
 0x7d4   :  { %4505 = vst [vmem:[#allocation3 + $0x8] sm:$0xff] %v4501_v8  ;;  %v4470_v56 = vadd.f32 %v4469_v60, %v4451_v14 }
 0x7d6   :  { %v4489_v51 = vadd.f32 %v4488_v30, %v4470_v56 }
 0x7d8   :  { %v4495_v37 = vmul.f32 0.088388346, %v4489_v51 }
 0x7d9   :  { %v4433_v50 = vpop.f32.mrf.mxu0  ;;  %v4452_v40 = vpop.f32.mrf.mxu1 }
 0x7da   :  { %v4502_v22 = vadd.f32 %v7850_v20, %v4495_v37  ;;  %v4453_v24 = vadd.f32 %v4452_v40, %v4433_v50 }
 0x7db   :  { %v4851_v42 = vpop.f32.mrf.mxu2  ;;  %v4870_v45 = vpop.f32.mrf.mxu3 }
 0x7dc   :  { %4506 = vst [vmem:[#allocation3 + $0x10] sm:$0xff] %v4502_v22  ;;  %v4472_v41 = vadd.f32 %v4471_v35, %v4453_v24 }
 0x7de   :  { %v4491_v43 = vadd.f32 %v4490_v36, %v4472_v41 }
 0x7e0   :  { %v4496_v46 = vmul.f32 0.088388346, %v4491_v43 }
 0x7e1   :  { %v4813_v47 = vpop.f32.mrf.mxu0  ;;  %v4832_v32 = vpop.f32.mrf.mxu1 }
 0x7e2   :  { %v4503_v52 = vadd.f32 %v7850_v20, %v4496_v46  ;;  %v4833_v2 = vadd.f32 %v4832_v32, %v4813_v47 }
 0x7e3   :  { %v4853_v58 = vpop.f32.mrf.mxu2  ;;  %v4872_v61 = vpop.f32.mrf.mxu3 }
 0x7e4   :  { %4507 = vst [vmem:[#allocation3 + $0x18] sm:$0xff] %v4503_v52  ;;  %v4852_v54 = vadd.f32 %v4851_v42, %v4833_v2 }
 0x7e6   :  { %v4871_v57 = vadd.f32 %v4870_v45, %v4852_v54 }
 0x7e8   :  { %v4880_v49 = vmul.f32 0.088388346, %v4871_v57 }
 0x7e9   :  { %v4815_v15 = vpop.f32.mrf.mxu0  ;;  %v4834_v59 = vpop.f32.mrf.mxu1 }
 0x7ea   :  { %v4884_v19 = vadd.f32 %v7850_v20, %v4880_v49  ;;  %v4835_v25 = vadd.f32 %v4834_v59, %v4815_v15 }
 0x7eb   :  { %v4856_v1 = vpop.f32.mrf.mxu2  ;;  %v4875_v5 = vpop.f32.mrf.mxu3 }
 0x7ec   :  { %4889 = vst [vmem:[#allocation3 + $0x20] sm:$0xff] %v4884_v19  ;;  %v4854_v31 = vadd.f32 %v4853_v58, %v4835_v25 }
 0x7ee   :  { %v4873_v62 = vadd.f32 %v4872_v61, %v4854_v31 }
 0x7f0   :  { %v4881_v53 = vmul.f32 0.088388346, %v4873_v62 }
 0x7f1   :  { %v4818_v28 = vpop.f32.mrf.mxu0  ;;  %v4837_v3 = vpop.f32.mrf.mxu1 }
 0x7f2   :  { %v4885_v13 = vadd.f32 %v7850_v20, %v4881_v53  ;;  %v4838_v4 = vadd.f32 %v4837_v3, %v4818_v28 }
 0x7f3   :  { %v4858_v63 = vpop.f32.mrf.mxu2  ;;  %v4877_v55 = vpop.f32.mrf.mxu3 }
 0x7f4   :  { %4890 = vst [vmem:[#allocation3 + $0x28] sm:$0xff] %v4885_v13  ;;  %v4857_v21 = vadd.f32 %v4856_v1, %v4838_v4 }
 0x7f6   :  { %v4876_v38 = vadd.f32 %v4875_v5, %v4857_v21 }
 0x7f8   :  { %v4882_v6 = vmul.f32 0.088388346, %v4876_v38 }
 0x7f9   :  { %v4820_v7 = vpop.f32.mrf.mxu0  ;;  %v4839_v9 = vpop.f32.mrf.mxu1 }
 0x7fa   :  { %v4886_v10 = vadd.f32 %v7850_v20, %v4882_v6  ;;  %v4840_v11 = vadd.f32 %v4839_v9, %v4820_v7 }
 0x7fc   :  { %4891 = vst [vmem:[#allocation3 + $0x30] sm:$0xff] %v4886_v10  ;;  %v4859_v12 = vadd.f32 %v4858_v63, %v4840_v11 }
 0x7fe   :  { %v4878_v16 = vadd.f32 %v4877_v55, %v4859_v12 }
 0x800   :  { %v4883_v17 = vmul.f32 0.088388346, %v4878_v16 }
 0x802   :  { %v4887_v18 = vadd.f32 %v7850_v20, %v4883_v17 }
 0x804   :  { %4892 = vst [vmem:[#allocation3 + $0x38] sm:$0xff] %v4887_v18 }
 0x805   :  { %4905 = dma.vmem_to_hbm [thread:$0]  %s4898_s24, 1024, %s4900_s27, [#allocation4], %s6654_s28, %s6654_s28, %s6655_s29  }
 0x806   :  { %6648 = dma.done.wait [#allocation4], 1024  }
 0x807   :  { %6649 = vsyncadd [#allocation4], 4294966272 }
 0x808   :  { %4910 = vsyncpa [#allocation4], 1 }

</bundles_post_ra>
